<compile_context>
chip_gen: v7x
topology: tpu7x:2x2x1
jax: 0.10.0
libtpu: 0.0.40
codegen_flags: <defaults>
</compile_context>

<pallas_src>
import functools

import jax
import jax.numpy as jnp
import numpy as np
from jax import lax
from jax.experimental import pallas as pl
from jax.experimental.pallas import tpu as pltpu


# ----------------------------------------------------------------------------
# helpers
# ----------------------------------------------------------------------------
def _round_up(x, m):
    return ((x + m - 1) // m) * m


def _pick_tile(n, cap, align):
    """Largest divisor of n that is <= cap and a multiple of `align`; fallback n."""
    best = None
    for d in range(1, min(n, cap) + 1):
        if n % d == 0 and d % align == 0:
            best = d
    return best if best is not None else n


def _vmem_limit(need_bytes):
    """Explicit scoped-VMEM limit: computed need + headroom, never below the
    32 MiB default, capped at 56 MiB so v7x (64 MiB physical) is not overcommitted."""
    return int(min(max(int(need_bytes * 1.25) + (2 << 20), 32 << 20), 56 << 20))


# ----------------------------------------------------------------------------
# Kernel 1: tiled (M,K)@(K,N) + bias  -- gates_x for layers>0 and the final fc.
#           Weights are bf16; activations cast to bf16 in-kernel; f32 accumulate.
# ----------------------------------------------------------------------------
def _matmul_bias_kernel(x_ref, w_ref, b_ref, o_ref):
    o_ref[...] = (
        jnp.dot(x_ref[...].astype(jnp.bfloat16), w_ref[...],
                preferred_element_type=jnp.float32)
        + b_ref[...])


def matmul_bias(x, w_bf16, b):
    """x: (M, K) f32, w_bf16: (K, N) bf16, b: (1, N) f32 -> (M, N) f32."""
    M, K = x.shape
    _, N = w_bf16.shape
    tm = _pick_tile(M, 512, 8)
    tn = _pick_tile(N, 1024, 128)
    grid = (M // tm, N // tn)
    need = 2 * (tm * K * 4 + K * tn * 2 + tn * 4 + tm * tn * 4)
    return pl.pallas_call(
        _matmul_bias_kernel,
        grid_spec=pltpu.PrefetchScalarGridSpec(
            num_scalar_prefetch=0,
            grid=grid,
            in_specs=[
                pl.BlockSpec((tm, K), lambda i, j: (i, 0)),
                pl.BlockSpec((K, tn), lambda i, j: (0, j)),
                pl.BlockSpec((1, tn), lambda i, j: (0, j)),
            ],
            out_specs=pl.BlockSpec((tm, tn), lambda i, j: (i, j)),
        ),
        out_shape=jax.ShapeDtypeStruct((M, N), jnp.float32),
        compiler_params=pltpu.CompilerParams(
            dimension_semantics=("parallel", "parallel"),
            vmem_limit_bytes=_vmem_limit(need)),
    )(x, w_bf16, b)


# ----------------------------------------------------------------------------
# Kernel 2: layer-0 "one-hot" gates via in-kernel iota==ids one-hot + MXU matmul.
#           Replaces the scalar row-gather loop (no masked single-sublane stores).
# ----------------------------------------------------------------------------
def _onehot_gates_kernel(ids_ref, tbl_ref, b_ref, gx_ref):
    rb = gx_ref.shape[0]
    Vk = tbl_ref.shape[0]
    ids = ids_ref[...]                                        # (rb, 1) int32
    iota = lax.broadcasted_iota(jnp.int32, (rb, Vk), 1)
    onehot = (iota == ids).astype(jnp.bfloat16)               # (rb, Vk), exact 0/1
    gx_ref[...] = (
        jnp.dot(onehot, tbl_ref[...], preferred_element_type=jnp.float32)
        + b_ref[...])


def onehot_gates(token_ids, table_bf16, bias):
    """token_ids: (M,1) int32; table_bf16: (Vk, 4*Hp) bf16; bias: (1, 4*Hp) f32."""
    M = token_ids.shape[0]
    Vk, N = table_bf16.shape
    row_blk = _pick_tile(M, 512, 8)
    grid = (M // row_blk,)
    need = (2 * (row_blk * 4 + Vk * N * 2 + N * 4 + row_blk * N * 4)
            + 2 * row_blk * Vk * 2)
    return pl.pallas_call(
        _onehot_gates_kernel,
        grid_spec=pltpu.PrefetchScalarGridSpec(
            num_scalar_prefetch=0,
            grid=grid,
            in_specs=[
                pl.BlockSpec((row_blk, 1), lambda r: (r, 0)),
                pl.BlockSpec((Vk, N), lambda r: (0, 0)),
                pl.BlockSpec((1, N), lambda r: (0, 0)),
            ],
            out_specs=pl.BlockSpec((row_blk, N), lambda r: (r, 0)),
        ),
        out_shape=jax.ShapeDtypeStruct((M, N), jnp.float32),
        compiler_params=pltpu.CompilerParams(
            dimension_semantics=("parallel",),
            vmem_limit_bytes=_vmem_limit(need)),
    )(token_ids, table_bf16, bias)


# ----------------------------------------------------------------------------
# Kernel 3: sequential LSTM recurrence over time-chunks.
#   gates = gates_x[t] (precomputed, bias folded) + h_prev @ W_hh^T (bf16 MXU)
#   h/c carried in vregs through the unrolled loop; W_hh^T copied to VMEM once.
# ----------------------------------------------------------------------------
def _lstm_recurrent_kernel(gx_ref, whh_any, h0_ref, c0_ref,
                           y_ref, hN_ref, cN_ref,
                           whh_vmem, h_scr, c_scr, dma_sem,
                           *, seq_len, t_blk, unroll):
    Hp = h_scr.shape[-1]

    @pl.when(pl.program_id(0) == 0)
    def _init():
        # one-time, single-buffered copy of W_hh^T into VMEM (persists across chunks)
        cp = pltpu.make_async_copy(whh_any, whh_vmem, dma_sem)
        cp.start()
        cp.wait()
        h_scr[...] = h0_ref[...]
        c_scr[...] = c0_ref[...]

    t0 = pl.program_id(0) * t_blk

    def step(tl, carry):
        h_prev, c_prev = carry
        gates = gx_ref[tl] + jnp.dot(h_prev.astype(jnp.bfloat16), whh_vmem[...],
                                     preferred_element_type=jnp.float32)
        # gate slices are lane-aligned (Hp is a multiple of 128)
        i_g = jax.nn.sigmoid(gates[:, 0 * Hp:1 * Hp])
        f_g = jax.nn.sigmoid(gates[:, 1 * Hp:2 * Hp])
        g_g = jnp.tanh(gates[:, 2 * Hp:3 * Hp])
        o_g = jax.nn.sigmoid(gates[:, 3 * Hp:4 * Hp])
        c_new = f_g * c_prev + i_g * g_g
        h_new = o_g * jnp.tanh(c_new)
        y_ref[tl] = h_new

        # store final state only at the real last timestep (handles padded tail)
        @pl.when(t0 + tl == seq_len - 1)
        def _store_final():
            hN_ref[...] = h_new
            cN_ref[...] = c_new

        return h_new, c_new

    h, c = lax.fori_loop(0, t_blk, step, (h_scr[...], c_scr[...]), unroll=unroll)
    h_scr[...] = h
    c_scr[...] = c


def lstm_recurrent(gx, whh_bf16, h0, c0, *, seq_len, t_blk):
    """gx: (S_pad, Bp, 4*Hp) f32, whh_bf16: (Hp, 4*Hp) bf16, h0/c0: (Bp, Hp) f32."""
    S_pad, Bp, N4 = gx.shape
    Hp = whh_bf16.shape[0]
    grid = (S_pad // t_blk,)
    # cap the unroll when the per-step working set would blow the vreg file
    unroll = t_blk if (Bp * 4 * Hp * 4) <= (64 * 1024) else min(t_blk, 4)
    need = (2 * t_blk * Bp * N4 * 4        # gx blocks (double-buffered)
            + 2 * t_blk * Bp * Hp * 4      # y blocks (double-buffered)
            + Hp * N4 * 2                  # W_hh^T (single-buffered VMEM scratch)
            + 10 * Bp * Hp * 4)            # h0/c0/hN/cN/scratch
    kern = functools.partial(_lstm_recurrent_kernel,
                             seq_len=seq_len, t_blk=t_blk, unroll=unroll)
    return pl.pallas_call(
        kern,
        grid_spec=pltpu.PrefetchScalarGridSpec(
            num_scalar_prefetch=0,
            grid=grid,
            in_specs=[
                pl.BlockSpec((t_blk, Bp, N4), lambda t: (t, 0, 0)),
                pl.BlockSpec(memory_space=pl.ANY),   # W_hh^T: copied to VMEM once
                pl.BlockSpec((Bp, Hp), lambda t: (0, 0)),
                pl.BlockSpec((Bp, Hp), lambda t: (0, 0)),
            ],
            out_specs=[
                pl.BlockSpec((t_blk, Bp, Hp), lambda t: (t, 0, 0)),
                pl.BlockSpec((Bp, Hp), lambda t: (0, 0)),
                pl.BlockSpec((Bp, Hp), lambda t: (0, 0)),
            ],
            scratch_shapes=[
                pltpu.VMEM((Hp, N4), jnp.bfloat16),
                pltpu.VMEM((Bp, Hp), jnp.float32),
                pltpu.VMEM((Bp, Hp), jnp.float32),
                pltpu.SemaphoreType.DMA(()),
            ],
        ),
        out_shape=(
            jax.ShapeDtypeStruct((S_pad, Bp, Hp), jnp.float32),
            jax.ShapeDtypeStruct((Bp, Hp), jnp.float32),
            jax.ShapeDtypeStruct((Bp, Hp), jnp.float32),
        ),
        compiler_params=pltpu.CompilerParams(
            dimension_semantics=("arbitrary",),
            vmem_limit_bytes=_vmem_limit(need)),
    )(gx, whh_bf16, h0, c0)


# ----------------------------------------------------------------------------
# Full forward pass (matches LSTMOneHot.forward, eval mode).
# ----------------------------------------------------------------------------
@functools.partial(jax.jit, static_argnames=("vocab_size",))
def lstm_onehot_forward(x, hidden, memory, packed, *, vocab_size):
    """
    x:      (batch, seq) int32 token indices
    hidden: (num_layers, batch, hidden) float32
    memory: (num_layers, batch, hidden) float32
    returns (logits (batch, seq, vocab), hidden, memory)
    """
    B, S = x.shape
    L, _, H = hidden.shape
    Hp = packed["lstm"][0][1].shape[0]          # W_hh_pad is (Hp, 4*Hp)
    Vp = packed["fc_w_t"].shape[1]
    Bp = _round_up(B, 8)

    # time chunk: cap 32, no exact-divisor requirement (S padded up to a multiple);
    # shrink if the double-buffered gx+y chunk would exceed ~24 MiB.
    t_blk = min(32, S)
    while t_blk > 8 and 2 * t_blk * Bp * 5 * Hp * 4 > (24 << 20):
        t_blk //= 2
    t_blk = max(t_blk, 1)
    S_pad = _round_up(S, t_blk)

    # padding: batch rows use token 0, padded timesteps use token 0; both sliced off.
    x_p = jnp.pad(x, ((0, Bp - B), (0, S_pad - S)))
    tokens = jnp.transpose(x_p, (1, 0)).reshape(S_pad * Bp, 1).astype(jnp.int32)

    h0 = jnp.pad(hidden, ((0, 0), (0, Bp - B), (0, Hp - H)))
    c0 = jnp.pad(memory, ((0, 0), (0, Bp - B), (0, Hp - H)))

    y = None
    h_fin, c_fin = [], []
    for layer in range(L):
        w_ih_p, w_hh_p, bias_p = packed["lstm"][layer]
        if layer == 0:
            gx_flat = onehot_gates(tokens, w_ih_p, bias_p)              # (S_pad*Bp, 4Hp)
        else:
            gx_flat = matmul_bias(y.reshape(S_pad * Bp, Hp), w_ih_p, bias_p)
        gx = gx_flat.reshape(S_pad, Bp, 4 * Hp)
        y, hN, cN = lstm_recurrent(gx, w_hh_p, h0[layer], c0[layer],
                                   seq_len=S, t_blk=t_blk)
        h_fin.append(hN)
        c_fin.append(cN)

    logits_flat = matmul_bias(y.reshape(S_pad * Bp, Hp),
                              packed["fc_w_t"], packed["fc_b"])         # (S_pad*Bp, Vp)
    logits = (logits_flat.reshape(S_pad, Bp, Vp)
              .transpose(1, 0, 2)[:B, :S, :vocab_size])                 # (B, S, V)

    h_out = jnp.stack(h_fin)[:, :B, :H]
    c_out = jnp.stack(c_fin)[:, :B, :H]
    return logits, h_out, c_out


# ----------------------------------------------------------------------------
# Pure-JAX reference (torch.nn.LSTM eval semantics) using raw PyTorch-layout weights
# ----------------------------------------------------------------------------
def lstm_onehot_reference(x, hidden, memory, raw, vocab_size):
    x_oh = jax.nn.one_hot(x, vocab_size, dtype=jnp.float32)   # (B, S, V)
    B, S, _ = x_oh.shape
    H = hidden.shape[-1]
    inp = jnp.transpose(x_oh, (1, 0, 2))                      # (S, B, V)
    h_fin, c_fin = [], []
    for layer, (w_ih, w_hh, b_ih, b_hh) in enumerate(raw["lstm"]):
        h = hidden[layer]
        c = memory[layer]
        ys = []
        for t in range(S):
            gates = inp[t] @ w_ih.T + h @ w_hh.T + b_ih + b_hh
            i = jax.nn.sigmoid(gates[:, 0 * H:1 * H])
            f = jax.nn.sigmoid(gates[:, 1 * H:2 * H])
            g = jnp.tanh(gates[:, 2 * H:3 * H])
            o = jax.nn.sigmoid(gates[:, 3 * H:4 * H])
            c = f * c + i * g
            h = o * jnp.tanh(c)
            ys.append(h)
        inp = jnp.stack(ys)
        h_fin.append(h)
        c_fin.append(c)
    logits = inp @ raw["fc_w"].T + raw["fc_b"]
    return jnp.transpose(logits, (1, 0, 2)), jnp.stack(h_fin), jnp.stack(c_fin)


# ----------------------------------------------------------------------------
# Parameter init (PyTorch layout) and kernel-layout packing (padded / gate-aligned,
# weights in bf16, biases in f32)
# ----------------------------------------------------------------------------
def init_raw_params(key, vocab_size, hidden_size, num_layers):
    bound = 1.0 / np.sqrt(hidden_size)
    params = {"lstm": []}
    for layer in range(num_layers):
        in_size = vocab_size if layer == 0 else hidden_size
        key, k1, k2, k3, k4 = jax.random.split(key, 5)
        w_ih = jax.random.uniform(k1, (4 * hidden_size, in_size),
                                  jnp.float32, -bound, bound)
        w_hh = jax.random.uniform(k2, (4 * hidden_size, hidden_size),
                                  jnp.float32, -bound, bound)
        b_ih = jax.random.uniform(k3, (4 * hidden_size,), jnp.float32, -bound, bound)
        b_hh = jax.random.uniform(k4, (4 * hidden_size,), jnp.float32, -bound, bound)
        params["lstm"].append((w_ih, w_hh, b_ih, b_hh))
    key, k1, k2 = jax.random.split(key, 3)
    params["fc_w"] = jax.random.uniform(k1, (vocab_size, hidden_size),
                                        jnp.float32, -bound, bound)
    params["fc_b"] = jax.random.uniform(k2, (vocab_size,), jnp.float32, -bound, bound)
    return params


def _gate_pad_cols(w, H, Hp):
    """(rows, 4H) -> (rows, 4*Hp): each gate's H columns zero-padded to Hp lanes."""
    rows = w.shape[0]
    w4 = w.reshape(rows, 4, H)
    w4 = jnp.pad(w4, ((0, 0), (0, 0), (0, Hp - H)))
    return w4.reshape(rows, 4 * Hp)


def pack_params(raw, hidden_size, vocab_size):
    H = hidden_size
    Hp = _round_up(H, 128)
    Vp = _round_up(vocab_size, 128)
    Vk = _round_up(vocab_size, 128)
    packed = {"lstm": []}
    for layer, (w_ih, w_hh, b_ih, b_hh) in enumerate(raw["lstm"]):
        w_ih_t = _gate_pad_cols(w_ih.T, H, Hp)                 # (in, 4*Hp)
        if layer == 0:
            w_ih_t = jnp.pad(w_ih_t, ((0, Vk - vocab_size), (0, 0)))   # rows V -> Vk
        else:
            w_ih_t = jnp.pad(w_ih_t, ((0, Hp - H), (0, 0)))            # rows H -> Hp
        w_hh_t = _gate_pad_cols(w_hh.T, H, Hp)                 # (H, 4*Hp)
        w_hh_t = jnp.pad(w_hh_t, ((0, Hp - H), (0, 0)))        # (Hp, 4*Hp)
        bias = _gate_pad_cols((b_ih + b_hh).reshape(1, 4 * H), H, Hp)  # (1, 4*Hp) f32
        packed["lstm"].append((w_ih_t.astype(jnp.bfloat16),
                               w_hh_t.astype(jnp.bfloat16),
                               bias))
    packed["fc_w_t"] = jnp.pad(raw["fc_w"].T,
                               ((0, Hp - H), (0, Vp - vocab_size))
                               ).astype(jnp.bfloat16)          # (Hp, Vp) bf16
    packed["fc_b"] = jnp.pad(raw["fc_b"], (0, Vp - vocab_size)).reshape(1, Vp)
    return packed


if __name__ == "__main__":
    vocab_size, hidden_size, num_layers = 16, 32, 2
    batch, seq = 2, 8

    key = jax.random.PRNGKey(0)
    key, kx, kh, kc, kp = jax.random.split(key, 5)
    x = jax.random.randint(kx, (batch, seq), 0, vocab_size, dtype=jnp.int32)
    hidden = jax.random.normal(kh, (num_layers, batch, hidden_size), jnp.float32)
    memory = jax.random.normal(kc, (num_layers, batch, hidden_size), jnp.float32)

    raw = init_raw_params(kp, vocab_size, hidden_size, num_layers)
    packed = pack_params(raw, hidden_size, vocab_size)

    logits, h_out, c_out = lstm_onehot_forward(
        x, hidden, memory, packed, vocab_size=vocab_size)
    jax.block_until_ready((logits, h_out, c_out))

    # sanity check against pure-JAX f32 reference (bf16 MXU inputs -> looser tol)
    ref_logits, ref_h, ref_c = lstm_onehot_reference(x, hidden, memory, raw, vocab_size)
    np.testing.assert_allclose(np.asarray(logits), np.asarray(ref_logits),
                               rtol=5e-2, atol=5e-2)
    np.testing.assert_allclose(np.asarray(h_out), np.asarray(ref_h),
                               rtol=5e-2, atol=5e-2)
    np.testing.assert_allclose(np.asarray(c_out), np.asarray(ref_c),
                               rtol=5e-2, atol=5e-2)

    print("KERNEL_OK")
</pallas_src>

<mosaic_0001>
module attributes {stable_mosaic.version = 11 : i64} {
  func.func @_matmul_bias_kernel(%arg0: i32, %arg1: i32, %arg2: memref<64x128xf32, #tpu.memory_space<vmem>>, %arg3: memref<128x512xbf16, #tpu.memory_space<vmem>>, %arg4: memref<1x512xf32, #tpu.memory_space<vmem>>, %arg5: memref<64x512xf32, #tpu.memory_space<vmem>>) attributes {dimension_semantics = [#tpu.dimension_semantics<parallel>, #tpu.dimension_semantics<parallel>], iteration_bounds = array<i64: 1, 1>, scalar_prefetch = 0 : i64, scratch_operands = 0 : i64, tpu.core_type = #tpu.core_type<tc>, window_params = [{transform_indices = @transform_0, window_bounds = array<i64: 64, 128>}, {transform_indices = @transform_1, window_bounds = array<i64: 128, 512>}, {transform_indices = @transform_2, window_bounds = array<i64: 1, 512>}, {transform_indices = @transform_3, window_bounds = array<i64: 64, 512>}]} {
    %c0 = arith.constant 0 : index
    %c0_0 = arith.constant 0 : index
    %0 = vector.load %arg2[%c0, %c0_0] : memref<64x128xf32, #tpu.memory_space<vmem>>, vector<64x128xf32>
    %1 = arith.truncf %0 : vector<64x128xf32> to vector<64x128xbf16>
    %c0_1 = arith.constant 0 : index
    %c0_2 = arith.constant 0 : index
    %2 = vector.load %arg3[%c0_1, %c0_2] : memref<128x512xbf16, #tpu.memory_space<vmem>>, vector<128x512xbf16>
    %cst = arith.constant dense<0.000000e+00> : vector<64x512xf32>
    %3 = tpu.matmul %1, %2, %cst {dimension_numbers = #tpu.dot_dimension_numbers<[1], [0], [0], [1], [0, 0, 1, 1], [], []>} : vector<64x128xbf16>, vector<128x512xbf16>, vector<64x512xf32> -> vector<64x512xf32>
    %c0_3 = arith.constant 0 : index
    %c0_4 = arith.constant 0 : index
    %4 = vector.load %arg4[%c0_3, %c0_4] : memref<1x512xf32, #tpu.memory_space<vmem>>, vector<1x512xf32>
    %5 = vector.broadcast %4 : vector<1x512xf32> to vector<64x512xf32>
    %6 = arith.addf %3, %5 : vector<64x512xf32>
    %c0_5 = arith.constant 0 : index
    %c0_6 = arith.constant 0 : index
    %7 = vector.load %arg5[%c0_5, %c0_6] : memref<64x512xf32, #tpu.memory_space<vmem>>, vector<64x512xf32>
    tpu.vector_store %arg5[%c0_5, %c0_6], %6 {strides = array<i32>} : memref<64x512xf32, #tpu.memory_space<vmem>>, vector<64x512xf32>,
    return
  }
  func.func @transform_0(%arg0: i32, %arg1: i32) -> (i32, i32) {
    %c0_i32 = arith.constant 0 : i32
    %c0_i32_0 = arith.constant 0 : i32
    return %arg0, %c0_i32 : i32, i32
  }
  func.func @transform_1(%arg0: i32, %arg1: i32) -> (i32, i32) {
    %c0_i32 = arith.constant 0 : i32
    %c0_i32_0 = arith.constant 0 : i32
    return %c0_i32, %arg1 : i32, i32
  }
  func.func @transform_2(%arg0: i32, %arg1: i32) -> (i32, i32) {
    %c0_i32 = arith.constant 0 : i32
    %c0_i32_0 = arith.constant 0 : i32
    return %c0_i32, %arg1 : i32, i32
  }
  func.func @transform_3(%arg0: i32, %arg1: i32) -> (i32, i32) {
    %c0_i32 = arith.constant 0 : i32
    return %arg0, %arg1 : i32, i32
  }
}

module attributes {stable_mosaic.version = 11 : i64} {
  func.func @_onehot_gates_kernel(%arg0: i32, %arg1: memref<64x1xi32, #tpu.memory_space<vmem>>, %arg2: memref<128x512xbf16, #tpu.memory_space<vmem>>, %arg3: memref<1x512xf32, #tpu.memory_space<vmem>>, %arg4: memref<64x512xf32, #tpu.memory_space<vmem>>) attributes {dimension_semantics = [#tpu.dimension_semantics<parallel>], iteration_bounds = array<i64: 1>, scalar_prefetch = 0 : i64, scratch_operands = 0 : i64, tpu.core_type = #tpu.core_type<tc>, window_params = [{transform_indices = @transform_0, window_bounds = array<i64: 64, 1>}, {pipeline_mode = #tpu.pipeline_mode<synchronous>, transform_indices = @transform_1, window_bounds = array<i64: 128, 512>}, {pipeline_mode = #tpu.pipeline_mode<synchronous>, transform_indices = @transform_2, window_bounds = array<i64: 1, 512>}, {transform_indices = @transform_3, window_bounds = array<i64: 64, 512>}]} {
    %c0 = arith.constant 0 : index
    %c0_0 = arith.constant 0 : index
    %0 = vector.load %arg1[%c0, %c0_0] : memref<64x1xi32, #tpu.memory_space<vmem>>, vector<64x1xi32>
    %1 = tpu.iota {dimensions = array<i32: 1>} : vector<64x128xi32>
    %2 = vector.broadcast %0 : vector<64x1xi32> to vector<64x128xi32>
    %3 = arith.cmpi eq, %1, %2 : vector<64x128xi32>
    %4 = arith.extui %3 : vector<64x128xi1> to vector<64x128xi32>
    %5 = arith.sitofp %4 : vector<64x128xi32> to vector<64x128xf32>
    %6 = arith.truncf %5 : vector<64x128xf32> to vector<64x128xbf16>
    %c0_1 = arith.constant 0 : index
    %c0_2 = arith.constant 0 : index
    %7 = vector.load %arg2[%c0_1, %c0_2] : memref<128x512xbf16, #tpu.memory_space<vmem>>, vector<128x512xbf16>
    %cst = arith.constant dense<0.000000e+00> : vector<64x512xf32>
    %8 = tpu.matmul %6, %7, %cst {dimension_numbers = #tpu.dot_dimension_numbers<[1], [0], [0], [1], [0, 0, 1, 1], [], []>} : vector<64x128xbf16>, vector<128x512xbf16>, vector<64x512xf32> -> vector<64x512xf32>
    %c0_3 = arith.constant 0 : index
    %c0_4 = arith.constant 0 : index
    %9 = vector.load %arg3[%c0_3, %c0_4] : memref<1x512xf32, #tpu.memory_space<vmem>>, vector<1x512xf32>
    %10 = vector.broadcast %9 : vector<1x512xf32> to vector<64x512xf32>
    %11 = arith.addf %8, %10 : vector<64x512xf32>
    %c0_5 = arith.constant 0 : index
    %c0_6 = arith.constant 0 : index
    %12 = vector.load %arg4[%c0_5, %c0_6] : memref<64x512xf32, #tpu.memory_space<vmem>>, vector<64x512xf32>
    tpu.vector_store %arg4[%c0_5, %c0_6], %11 {strides = array<i32>} : memref<64x512xf32, #tpu.memory_space<vmem>>, vector<64x512xf32>,
    return
  }
  func.func @transform_0(%arg0: i32) -> (i32, i32) {
    %c0_i32 = arith.constant 0 : i32
    %c0_i32_0 = arith.constant 0 : i32
    return %arg0, %c0_i32 : i32, i32
  }
  func.func @transform_1(%arg0: i32) -> (i32, i32) {
    %c0_i32 = arith.constant 0 : i32
    %c0_i32_0 = arith.constant 0 : i32
    %c0_i32_1 = arith.constant 0 : i32
    return %c0_i32, %c0_i32_0 : i32, i32
  }
  func.func @transform_2(%arg0: i32) -> (i32, i32) {
    %c0_i32 = arith.constant 0 : i32
    %c0_i32_0 = arith.constant 0 : i32
    %c0_i32_1 = arith.constant 0 : i32
    return %c0_i32, %c0_i32_0 : i32, i32
  }
  func.func @transform_3(%arg0: i32) -> (i32, i32) {
    %c0_i32 = arith.constant 0 : i32
    %c0_i32_0 = arith.constant 0 : i32
    return %arg0, %c0_i32 : i32, i32
  }
}

module attributes {stable_mosaic.version = 11 : i64} {
  func.func @_matmul_bias_kernel(%arg0: i32, %arg1: i32, %arg2: memref<64x128xf32, #tpu.memory_space<vmem>>, %arg3: memref<128x128xbf16, #tpu.memory_space<vmem>>, %arg4: memref<1x128xf32, #tpu.memory_space<vmem>>, %arg5: memref<64x128xf32, #tpu.memory_space<vmem>>) attributes {dimension_semantics = [#tpu.dimension_semantics<parallel>, #tpu.dimension_semantics<parallel>], iteration_bounds = array<i64: 1, 1>, scalar_prefetch = 0 : i64, scratch_operands = 0 : i64, tpu.core_type = #tpu.core_type<tc>, window_params = [{transform_indices = @transform_0, window_bounds = array<i64: 64, 128>}, {transform_indices = @transform_1, window_bounds = array<i64: 128, 128>}, {transform_indices = @transform_2, window_bounds = array<i64: 1, 128>}, {transform_indices = @transform_3, window_bounds = array<i64: 64, 128>}]} {
    %c0 = arith.constant 0 : index
    %c0_0 = arith.constant 0 : index
    %0 = vector.load %arg2[%c0, %c0_0] : memref<64x128xf32, #tpu.memory_space<vmem>>, vector<64x128xf32>
    %1 = arith.truncf %0 : vector<64x128xf32> to vector<64x128xbf16>
    %c0_1 = arith.constant 0 : index
    %c0_2 = arith.constant 0 : index
    %2 = vector.load %arg3[%c0_1, %c0_2] : memref<128x128xbf16, #tpu.memory_space<vmem>>, vector<128x128xbf16>
    %cst = arith.constant dense<0.000000e+00> : vector<64x128xf32>
    %3 = tpu.matmul %1, %2, %cst {dimension_numbers = #tpu.dot_dimension_numbers<[1], [0], [0], [1], [0, 0, 1, 1], [], []>} : vector<64x128xbf16>, vector<128x128xbf16>, vector<64x128xf32> -> vector<64x128xf32>
    %c0_3 = arith.constant 0 : index
    %c0_4 = arith.constant 0 : index
    %4 = vector.load %arg4[%c0_3, %c0_4] : memref<1x128xf32, #tpu.memory_space<vmem>>, vector<1x128xf32>
    %5 = vector.broadcast %4 : vector<1x128xf32> to vector<64x128xf32>
    %6 = arith.addf %3, %5 : vector<64x128xf32>
    %c0_5 = arith.constant 0 : index
    %c0_6 = arith.constant 0 : index
    %7 = vector.load %arg5[%c0_5, %c0_6] : memref<64x128xf32, #tpu.memory_space<vmem>>, vector<64x128xf32>
    tpu.vector_store %arg5[%c0_5, %c0_6], %6 {strides = array<i32>} : memref<64x128xf32, #tpu.memory_space<vmem>>, vector<64x128xf32>,
    return
  }
  func.func @transform_0(%arg0: i32, %arg1: i32) -> (i32, i32) {
    %c0_i32 = arith.constant 0 : i32
    %c0_i32_0 = arith.constant 0 : i32
    return %arg0, %c0_i32 : i32, i32
  }
  func.func @transform_1(%arg0: i32, %arg1: i32) -> (i32, i32) {
    %c0_i32 = arith.constant 0 : i32
    %c0_i32_0 = arith.constant 0 : i32
    return %c0_i32, %arg1 : i32, i32
  }
  func.func @transform_2(%arg0: i32, %arg1: i32) -> (i32, i32) {
    %c0_i32 = arith.constant 0 : i32
    %c0_i32_0 = arith.constant 0 : i32
    return %c0_i32, %arg1 : i32, i32
  }
  func.func @transform_3(%arg0: i32, %arg1: i32) -> (i32, i32) {
    %c0_i32 = arith.constant 0 : i32
    return %arg0, %arg1 : i32, i32
  }
}

module attributes {stable_mosaic.version = 11 : i64} {
  func.func @_lstm_recurrent_kernel(%arg0: i32, %arg1: memref<8x8x512xf32, #tpu.memory_space<vmem>>, %arg2: memref<128x512xbf16, #tpu.memory_space<any>>, %arg3: memref<8x128xf32, #tpu.memory_space<vmem>>, %arg4: memref<8x128xf32, #tpu.memory_space<vmem>>, %arg5: memref<8x8x128xf32, #tpu.memory_space<vmem>>, %arg6: memref<8x128xf32, #tpu.memory_space<vmem>>, %arg7: memref<8x128xf32, #tpu.memory_space<vmem>>, %arg8: memref<128x512xbf16, #tpu.memory_space<vmem>>, %arg9: memref<8x128xf32, #tpu.memory_space<vmem>>, %arg10: memref<8x128xf32, #tpu.memory_space<vmem>>, %arg11: memref<!tpu.dma_semaphore, #tpu.memory_space<semaphore_mem>>) attributes {dimension_semantics = [#tpu.dimension_semantics<arbitrary>], iteration_bounds = array<i64: 1>, scalar_prefetch = 0 : i64, scratch_operands = 4 : i64, tpu.core_type = #tpu.core_type<tc>, window_params = [{transform_indices = @transform_0, window_bounds = array<i64: 8, 8, 512>}, {}, {pipeline_mode = #tpu.pipeline_mode<synchronous>, transform_indices = @transform_2, window_bounds = array<i64: 8, 128>}, {pipeline_mode = #tpu.pipeline_mode<synchronous>, transform_indices = @transform_3, window_bounds = array<i64: 8, 128>}, {transform_indices = @transform_4, window_bounds = array<i64: 8, 8, 128>}, {pipeline_mode = #tpu.pipeline_mode<synchronous>, transform_indices = @transform_5, window_bounds = array<i64: 8, 128>}, {pipeline_mode = #tpu.pipeline_mode<synchronous>, transform_indices = @transform_6, window_bounds = array<i64: 8, 128>}]} {
    %c0_i32 = arith.constant 0 : i32
    %0 = arith.cmpi eq, %arg0, %c0_i32 : i32
    %1 = arith.extui %0 : i1 to i32
    %c0_i32_0 = arith.constant 0 : i32
    %2 = arith.cmpi ne, %1, %c0_i32_0 : i32
    scf.if %2 {
      tpu.enqueue_dma source(%arg2 : memref<128x512xbf16, #tpu.memory_space<any>>) target(%arg8 : memref<128x512xbf16, #tpu.memory_space<vmem>>) target_semaphore(%arg11 : memref<!tpu.dma_semaphore, #tpu.memory_space<semaphore_mem>>)
      tpu.wait_dma2 semaphore(%arg11 : memref<!tpu.dma_semaphore, #tpu.memory_space<semaphore_mem>>) src(%arg2 : memref<128x512xbf16, #tpu.memory_space<any>>) dst(%arg8 : memref<128x512xbf16, #tpu.memory_space<vmem>>)
      %c0_105 = arith.constant 0 : index
      %c0_106 = arith.constant 0 : index
      %328 = vector.load %arg3[%c0_105, %c0_106] : memref<8x128xf32, #tpu.memory_space<vmem>>, vector<8x128xf32>
      %c0_107 = arith.constant 0 : index
      %c0_108 = arith.constant 0 : index
      %329 = vector.load %arg9[%c0_107, %c0_108] : memref<8x128xf32, #tpu.memory_space<vmem>>, vector<8x128xf32>
      tpu.vector_store %arg9[%c0_107, %c0_108], %328 {strides = array<i32>} : memref<8x128xf32, #tpu.memory_space<vmem>>, vector<8x128xf32>,
      %c0_109 = arith.constant 0 : index
      %c0_110 = arith.constant 0 : index
      %330 = vector.load %arg4[%c0_109, %c0_110] : memref<8x128xf32, #tpu.memory_space<vmem>>, vector<8x128xf32>
      %c0_111 = arith.constant 0 : index
      %c0_112 = arith.constant 0 : index
      %331 = vector.load %arg10[%c0_111, %c0_112] : memref<8x128xf32, #tpu.memory_space<vmem>>, vector<8x128xf32>
      tpu.vector_store %arg10[%c0_111, %c0_112], %330 {strides = array<i32>} : memref<8x128xf32, #tpu.memory_space<vmem>>, vector<8x128xf32>,
    } else {
    }
    %c8_i32 = arith.constant 8 : i32
    %3 = arith.muli %arg0, %c8_i32 : i32
    %c0 = arith.constant 0 : index
    %c0_1 = arith.constant 0 : index
    %4 = vector.load %arg9[%c0, %c0_1] : memref<8x128xf32, #tpu.memory_space<vmem>>, vector<8x128xf32>
    %c0_2 = arith.constant 0 : index
    %c0_3 = arith.constant 0 : index
    %5 = vector.load %arg10[%c0_2, %c0_3] : memref<8x128xf32, #tpu.memory_space<vmem>>, vector<8x128xf32>
    %c0_i32_4 = arith.constant 0 : i32
    %6 = arith.index_cast %c0_i32_4 : i32 to index
    %c0_5 = arith.constant 0 : index
    %c0_6 = arith.constant 0 : index
    %7 = vector.load %arg1[%6, %c0_5, %c0_6] : memref<8x8x512xf32, #tpu.memory_space<vmem>>, vector<1x8x512xf32>
    %8 = vector.shape_cast %7 : vector<1x8x512xf32> to vector<8x512xf32>
    %9 = arith.truncf %4 : vector<8x128xf32> to vector<8x128xbf16>
    %c0_7 = arith.constant 0 : index
    %c0_8 = arith.constant 0 : index
    %10 = vector.load %arg8[%c0_7, %c0_8] : memref<128x512xbf16, #tpu.memory_space<vmem>>, vector<128x512xbf16>
    %cst = arith.constant dense<0.000000e+00> : vector<8x512xf32>
    %11 = tpu.matmul %9, %10, %cst {dimension_numbers = #tpu.dot_dimension_numbers<[1], [0], [0], [1], [0, 0, 1, 1], [], []>} : vector<8x128xbf16>, vector<128x512xbf16>, vector<8x512xf32> -> vector<8x512xf32>
    %12 = arith.addf %8, %11 : vector<8x512xf32>
    %13 = vector.extract_strided_slice %12 {offsets = [0, 0], sizes = [8, 128], strides = [1, 1]} : vector<8x512xf32> to vector<8x128xf32>
    %14 = arith.negf %13 : vector<8x128xf32>
    %15 = math.exp %14 : vector<8x128xf32>
    %cst_9 = arith.constant 1.000000e+00 : f32
    %16 = vector.broadcast %cst_9 : f32 to vector<8x128xf32>
    %17 = arith.addf %16, %15 : vector<8x128xf32>
    %18 = arith.divf %16, %17 : vector<8x128xf32>
    %19 = vector.extract_strided_slice %12 {offsets = [0, 128], sizes = [8, 128], strides = [1, 1]} : vector<8x512xf32> to vector<8x128xf32>
    %20 = arith.negf %19 : vector<8x128xf32>
    %21 = math.exp %20 : vector<8x128xf32>
    %cst_10 = arith.constant 1.000000e+00 : f32
    %22 = vector.broadcast %cst_10 : f32 to vector<8x128xf32>
    %23 = arith.addf %22, %21 : vector<8x128xf32>
    %24 = arith.divf %22, %23 : vector<8x128xf32>
    %25 = vector.extract_strided_slice %12 {offsets = [0, 256], sizes = [8, 128], strides = [1, 1]} : vector<8x512xf32> to vector<8x128xf32>
    %26 = math.tanh %25 : vector<8x128xf32>
    %27 = vector.extract_strided_slice %12 {offsets = [0, 384], sizes = [8, 128], strides = [1, 1]} : vector<8x512xf32> to vector<8x128xf32>
    %28 = arith.negf %27 : vector<8x128xf32>
    %29 = math.exp %28 : vector<8x128xf32>
    %cst_11 = arith.constant 1.000000e+00 : f32
    %30 = vector.broadcast %cst_11 : f32 to vector<8x128xf32>
    %31 = arith.addf %30, %29 : vector<8x128xf32>
    %32 = arith.divf %30, %31 : vector<8x128xf32>
    %33 = arith.mulf %24, %5 : vector<8x128xf32>
    %34 = arith.mulf %18, %26 : vector<8x128xf32>
    %35 = arith.addf %33, %34 : vector<8x128xf32>
    %36 = math.tanh %35 : vector<8x128xf32>
    %37 = arith.mulf %32, %36 : vector<8x128xf32>
    %38 = arith.index_cast %c0_i32_4 : i32 to index
    %c0_12 = arith.constant 0 : index
    %c0_13 = arith.constant 0 : index
    %39 = vector.load %arg5[%38, %c0_12, %c0_13] : memref<8x8x128xf32, #tpu.memory_space<vmem>>, vector<1x8x128xf32>
    %40 = vector.shape_cast %39 : vector<1x8x128xf32> to vector<8x128xf32>
    %41 = vector.shape_cast %37 : vector<8x128xf32> to vector<1x8x128xf32>
    tpu.vector_store %arg5[%38, %c0_12, %c0_13], %41 {strides = array<i32>} : memref<8x8x128xf32, #tpu.memory_space<vmem>>, vector<1x8x128xf32>,
    %42 = arith.addi %3, %c0_i32_4 : i32
    %c7_i32 = arith.constant 7 : i32
    %43 = arith.cmpi eq, %42, %c7_i32 : i32
    %44 = arith.extui %43 : i1 to i32
    %c0_i32_14 = arith.constant 0 : i32
    %45 = arith.cmpi ne, %44, %c0_i32_14 : i32
    scf.if %45 {
      %c0_105 = arith.constant 0 : index
      %c0_106 = arith.constant 0 : index
      %328 = vector.load %arg6[%c0_105, %c0_106] : memref<8x128xf32, #tpu.memory_space<vmem>>, vector<8x128xf32>
      tpu.vector_store %arg6[%c0_105, %c0_106], %37 {strides = array<i32>} : memref<8x128xf32, #tpu.memory_space<vmem>>, vector<8x128xf32>,
      %c0_107 = arith.constant 0 : index
      %c0_108 = arith.constant 0 : index
      %329 = vector.load %arg7[%c0_107, %c0_108] : memref<8x128xf32, #tpu.memory_space<vmem>>, vector<8x128xf32>
      tpu.vector_store %arg7[%c0_107, %c0_108], %35 {strides = array<i32>} : memref<8x128xf32, #tpu.memory_space<vmem>>, vector<8x128xf32>,
    } else {
    }
    %c1_i32 = arith.constant 1 : i32
    %46 = arith.index_cast %c1_i32 : i32 to index
    %c0_15 = arith.constant 0 : index
    %c0_16 = arith.constant 0 : index
    %47 = vector.load %arg1[%46, %c0_15, %c0_16] : memref<8x8x512xf32, #tpu.memory_space<vmem>>, vector<1x8x512xf32>
    %48 = vector.shape_cast %47 : vector<1x8x512xf32> to vector<8x512xf32>
    %49 = arith.truncf %37 : vector<8x128xf32> to vector<8x128xbf16>
    %c0_17 = arith.constant 0 : index
    %c0_18 = arith.constant 0 : index
    %50 = vector.load %arg8[%c0_17, %c0_18] : memref<128x512xbf16, #tpu.memory_space<vmem>>, vector<128x512xbf16>
    %cst_19 = arith.constant dense<0.000000e+00> : vector<8x512xf32>
    %51 = tpu.matmul %49, %50, %cst_19 {dimension_numbers = #tpu.dot_dimension_numbers<[1], [0], [0], [1], [0, 0, 1, 1], [], []>} : vector<8x128xbf16>, vector<128x512xbf16>, vector<8x512xf32> -> vector<8x512xf32>
    %52 = arith.addf %48, %51 : vector<8x512xf32>
    %53 = vector.extract_strided_slice %52 {offsets = [0, 0], sizes = [8, 128], strides = [1, 1]} : vector<8x512xf32> to vector<8x128xf32>
    %54 = arith.negf %53 : vector<8x128xf32>
    %55 = math.exp %54 : vector<8x128xf32>
    %cst_20 = arith.constant 1.000000e+00 : f32
    %56 = vector.broadcast %cst_20 : f32 to vector<8x128xf32>
    %57 = arith.addf %56, %55 : vector<8x128xf32>
    %58 = arith.divf %56, %57 : vector<8x128xf32>
    %59 = vector.extract_strided_slice %52 {offsets = [0, 128], sizes = [8, 128], strides = [1, 1]} : vector<8x512xf32> to vector<8x128xf32>
    %60 = arith.negf %59 : vector<8x128xf32>
    %61 = math.exp %60 : vector<8x128xf32>
    %cst_21 = arith.constant 1.000000e+00 : f32
    %62 = vector.broadcast %cst_21 : f32 to vector<8x128xf32>
    %63 = arith.addf %62, %61 : vector<8x128xf32>
    %64 = arith.divf %62, %63 : vector<8x128xf32>
    %65 = vector.extract_strided_slice %52 {offsets = [0, 256], sizes = [8, 128], strides = [1, 1]} : vector<8x512xf32> to vector<8x128xf32>
    %66 = math.tanh %65 : vector<8x128xf32>
    %67 = vector.extract_strided_slice %52 {offsets = [0, 384], sizes = [8, 128], strides = [1, 1]} : vector<8x512xf32> to vector<8x128xf32>
    %68 = arith.negf %67 : vector<8x128xf32>
    %69 = math.exp %68 : vector<8x128xf32>
    %cst_22 = arith.constant 1.000000e+00 : f32
    %70 = vector.broadcast %cst_22 : f32 to vector<8x128xf32>
    %71 = arith.addf %70, %69 : vector<8x128xf32>
    %72 = arith.divf %70, %71 : vector<8x128xf32>
    %73 = arith.mulf %64, %35 : vector<8x128xf32>
    %74 = arith.mulf %58, %66 : vector<8x128xf32>
    %75 = arith.addf %73, %74 : vector<8x128xf32>
    %76 = math.tanh %75 : vector<8x128xf32>
    %77 = arith.mulf %72, %76 : vector<8x128xf32>
    %78 = arith.index_cast %c1_i32 : i32 to index
    %c0_23 = arith.constant 0 : index
    %c0_24 = arith.constant 0 : index
    %79 = vector.load %arg5[%78, %c0_23, %c0_24] : memref<8x8x128xf32, #tpu.memory_space<vmem>>, vector<1x8x128xf32>
    %80 = vector.shape_cast %79 : vector<1x8x128xf32> to vector<8x128xf32>
    %81 = vector.shape_cast %77 : vector<8x128xf32> to vector<1x8x128xf32>
    tpu.vector_store %arg5[%78, %c0_23, %c0_24], %81 {strides = array<i32>} : memref<8x8x128xf32, #tpu.memory_space<vmem>>, vector<1x8x128xf32>,
    %82 = arith.addi %3, %c1_i32 : i32
    %c7_i32_25 = arith.constant 7 : i32
    %83 = arith.cmpi eq, %82, %c7_i32_25 : i32
    %84 = arith.extui %83 : i1 to i32
    %c0_i32_26 = arith.constant 0 : i32
    %85 = arith.cmpi ne, %84, %c0_i32_26 : i32
    scf.if %85 {
      %c0_105 = arith.constant 0 : index
      %c0_106 = arith.constant 0 : index
      %328 = vector.load %arg6[%c0_105, %c0_106] : memref<8x128xf32, #tpu.memory_space<vmem>>, vector<8x128xf32>
      tpu.vector_store %arg6[%c0_105, %c0_106], %77 {strides = array<i32>} : memref<8x128xf32, #tpu.memory_space<vmem>>, vector<8x128xf32>,
      %c0_107 = arith.constant 0 : index
      %c0_108 = arith.constant 0 : index
      %329 = vector.load %arg7[%c0_107, %c0_108] : memref<8x128xf32, #tpu.memory_space<vmem>>, vector<8x128xf32>
      tpu.vector_store %arg7[%c0_107, %c0_108], %75 {strides = array<i32>} : memref<8x128xf32, #tpu.memory_space<vmem>>, vector<8x128xf32>,
    } else {
    }
    %c2_i32 = arith.constant 2 : i32
    %86 = arith.index_cast %c2_i32 : i32 to index
    %c0_27 = arith.constant 0 : index
    %c0_28 = arith.constant 0 : index
    %87 = vector.load %arg1[%86, %c0_27, %c0_28] : memref<8x8x512xf32, #tpu.memory_space<vmem>>, vector<1x8x512xf32>
    %88 = vector.shape_cast %87 : vector<1x8x512xf32> to vector<8x512xf32>
    %89 = arith.truncf %77 : vector<8x128xf32> to vector<8x128xbf16>
    %c0_29 = arith.constant 0 : index
    %c0_30 = arith.constant 0 : index
    %90 = vector.load %arg8[%c0_29, %c0_30] : memref<128x512xbf16, #tpu.memory_space<vmem>>, vector<128x512xbf16>
    %cst_31 = arith.constant dense<0.000000e+00> : vector<8x512xf32>
    %91 = tpu.matmul %89, %90, %cst_31 {dimension_numbers = #tpu.dot_dimension_numbers<[1], [0], [0], [1], [0, 0, 1, 1], [], []>} : vector<8x128xbf16>, vector<128x512xbf16>, vector<8x512xf32> -> vector<8x512xf32>
    %92 = arith.addf %88, %91 : vector<8x512xf32>
    %93 = vector.extract_strided_slice %92 {offsets = [0, 0], sizes = [8, 128], strides = [1, 1]} : vector<8x512xf32> to vector<8x128xf32>
    %94 = arith.negf %93 : vector<8x128xf32>
    %95 = math.exp %94 : vector<8x128xf32>
    %cst_32 = arith.constant 1.000000e+00 : f32
    %96 = vector.broadcast %cst_32 : f32 to vector<8x128xf32>
    %97 = arith.addf %96, %95 : vector<8x128xf32>
    %98 = arith.divf %96, %97 : vector<8x128xf32>
    %99 = vector.extract_strided_slice %92 {offsets = [0, 128], sizes = [8, 128], strides = [1, 1]} : vector<8x512xf32> to vector<8x128xf32>
    %100 = arith.negf %99 : vector<8x128xf32>
    %101 = math.exp %100 : vector<8x128xf32>
    %cst_33 = arith.constant 1.000000e+00 : f32
    %102 = vector.broadcast %cst_33 : f32 to vector<8x128xf32>
    %103 = arith.addf %102, %101 : vector<8x128xf32>
    %104 = arith.divf %102, %103 : vector<8x128xf32>
    %105 = vector.extract_strided_slice %92 {offsets = [0, 256], sizes = [8, 128], strides = [1, 1]} : vector<8x512xf32> to vector<8x128xf32>
    %106 = math.tanh %105 : vector<8x128xf32>
    %107 = vector.extract_strided_slice %92 {offsets = [0, 384], sizes = [8, 128], strides = [1, 1]} : vector<8x512xf32> to vector<8x128xf32>
    %108 = arith.negf %107 : vector<8x128xf32>
    %109 = math.exp %108 : vector<8x128xf32>
    %cst_34 = arith.constant 1.000000e+00 : f32
    %110 = vector.broadcast %cst_34 : f32 to vector<8x128xf32>
    %111 = arith.addf %110, %109 : vector<8x128xf32>
    %112 = arith.divf %110, %111 : vector<8x128xf32>
    %113 = arith.mulf %104, %75 : vector<8x128xf32>
    %114 = arith.mulf %98, %106 : vector<8x128xf32>
    %115 = arith.addf %113, %114 : vector<8x128xf32>
    %116 = math.tanh %115 : vector<8x128xf32>
    %117 = arith.mulf %112, %116 : vector<8x128xf32>
    %118 = arith.index_cast %c2_i32 : i32 to index
    %c0_35 = arith.constant 0 : index
    %c0_36 = arith.constant 0 : index
    %119 = vector.load %arg5[%118, %c0_35, %c0_36] : memref<8x8x128xf32, #tpu.memory_space<vmem>>, vector<1x8x128xf32>
    %120 = vector.shape_cast %119 : vector<1x8x128xf32> to vector<8x128xf32>
    %121 = vector.shape_cast %117 : vector<8x128xf32> to vector<1x8x128xf32>
    tpu.vector_store %arg5[%118, %c0_35, %c0_36], %121 {strides = array<i32>} : memref<8x8x128xf32, #tpu.memory_space<vmem>>, vector<1x8x128xf32>,
    %122 = arith.addi %3, %c2_i32 : i32
    %c7_i32_37 = arith.constant 7 : i32
    %123 = arith.cmpi eq, %122, %c7_i32_37 : i32
    %124 = arith.extui %123 : i1 to i32
    %c0_i32_38 = arith.constant 0 : i32
    %125 = arith.cmpi ne, %124, %c0_i32_38 : i32
    scf.if %125 {
      %c0_105 = arith.constant 0 : index
      %c0_106 = arith.constant 0 : index
      %328 = vector.load %arg6[%c0_105, %c0_106] : memref<8x128xf32, #tpu.memory_space<vmem>>, vector<8x128xf32>
      tpu.vector_store %arg6[%c0_105, %c0_106], %117 {strides = array<i32>} : memref<8x128xf32, #tpu.memory_space<vmem>>, vector<8x128xf32>,
      %c0_107 = arith.constant 0 : index
      %c0_108 = arith.constant 0 : index
      %329 = vector.load %arg7[%c0_107, %c0_108] : memref<8x128xf32, #tpu.memory_space<vmem>>, vector<8x128xf32>
      tpu.vector_store %arg7[%c0_107, %c0_108], %115 {strides = array<i32>} : memref<8x128xf32, #tpu.memory_space<vmem>>, vector<8x128xf32>,
    } else {
    }
    %c3_i32 = arith.constant 3 : i32
    %126 = arith.index_cast %c3_i32 : i32 to index
    %c0_39 = arith.constant 0 : index
    %c0_40 = arith.constant 0 : index
    %127 = vector.load %arg1[%126, %c0_39, %c0_40] : memref<8x8x512xf32, #tpu.memory_space<vmem>>, vector<1x8x512xf32>
    %128 = vector.shape_cast %127 : vector<1x8x512xf32> to vector<8x512xf32>
    %129 = arith.truncf %117 : vector<8x128xf32> to vector<8x128xbf16>
    %c0_41 = arith.constant 0 : index
    %c0_42 = arith.constant 0 : index
    %130 = vector.load %arg8[%c0_41, %c0_42] : memref<128x512xbf16, #tpu.memory_space<vmem>>, vector<128x512xbf16>
    %cst_43 = arith.constant dense<0.000000e+00> : vector<8x512xf32>
    %131 = tpu.matmul %129, %130, %cst_43 {dimension_numbers = #tpu.dot_dimension_numbers<[1], [0], [0], [1], [0, 0, 1, 1], [], []>} : vector<8x128xbf16>, vector<128x512xbf16>, vector<8x512xf32> -> vector<8x512xf32>
    %132 = arith.addf %128, %131 : vector<8x512xf32>
    %133 = vector.extract_strided_slice %132 {offsets = [0, 0], sizes = [8, 128], strides = [1, 1]} : vector<8x512xf32> to vector<8x128xf32>
    %134 = arith.negf %133 : vector<8x128xf32>
    %135 = math.exp %134 : vector<8x128xf32>
    %cst_44 = arith.constant 1.000000e+00 : f32
    %136 = vector.broadcast %cst_44 : f32 to vector<8x128xf32>
    %137 = arith.addf %136, %135 : vector<8x128xf32>
    %138 = arith.divf %136, %137 : vector<8x128xf32>
    %139 = vector.extract_strided_slice %132 {offsets = [0, 128], sizes = [8, 128], strides = [1, 1]} : vector<8x512xf32> to vector<8x128xf32>
    %140 = arith.negf %139 : vector<8x128xf32>
    %141 = math.exp %140 : vector<8x128xf32>
    %cst_45 = arith.constant 1.000000e+00 : f32
    %142 = vector.broadcast %cst_45 : f32 to vector<8x128xf32>
    %143 = arith.addf %142, %141 : vector<8x128xf32>
    %144 = arith.divf %142, %143 : vector<8x128xf32>
    %145 = vector.extract_strided_slice %132 {offsets = [0, 256], sizes = [8, 128], strides = [1, 1]} : vector<8x512xf32> to vector<8x128xf32>
    %146 = math.tanh %145 : vector<8x128xf32>
    %147 = vector.extract_strided_slice %132 {offsets = [0, 384], sizes = [8, 128], strides = [1, 1]} : vector<8x512xf32> to vector<8x128xf32>
    %148 = arith.negf %147 : vector<8x128xf32>
    %149 = math.exp %148 : vector<8x128xf32>
    %cst_46 = arith.constant 1.000000e+00 : f32
    %150 = vector.broadcast %cst_46 : f32 to vector<8x128xf32>
    %151 = arith.addf %150, %149 : vector<8x128xf32>
    %152 = arith.divf %150, %151 : vector<8x128xf32>
    %153 = arith.mulf %144, %115 : vector<8x128xf32>
    %154 = arith.mulf %138, %146 : vector<8x128xf32>
    %155 = arith.addf %153, %154 : vector<8x128xf32>
    %156 = math.tanh %155 : vector<8x128xf32>
    %157 = arith.mulf %152, %156 : vector<8x128xf32>
    %158 = arith.index_cast %c3_i32 : i32 to index
    %c0_47 = arith.constant 0 : index
    %c0_48 = arith.constant 0 : index
    %159 = vector.load %arg5[%158, %c0_47, %c0_48] : memref<8x8x128xf32, #tpu.memory_space<vmem>>, vector<1x8x128xf32>
    %160 = vector.shape_cast %159 : vector<1x8x128xf32> to vector<8x128xf32>
    %161 = vector.shape_cast %157 : vector<8x128xf32> to vector<1x8x128xf32>
    tpu.vector_store %arg5[%158, %c0_47, %c0_48], %161 {strides = array<i32>} : memref<8x8x128xf32, #tpu.memory_space<vmem>>, vector<1x8x128xf32>,
    %162 = arith.addi %3, %c3_i32 : i32
    %c7_i32_49 = arith.constant 7 : i32
    %163 = arith.cmpi eq, %162, %c7_i32_49 : i32
    %164 = arith.extui %163 : i1 to i32
    %c0_i32_50 = arith.constant 0 : i32
    %165 = arith.cmpi ne, %164, %c0_i32_50 : i32
    scf.if %165 {
      %c0_105 = arith.constant 0 : index
      %c0_106 = arith.constant 0 : index
      %328 = vector.load %arg6[%c0_105, %c0_106] : memref<8x128xf32, #tpu.memory_space<vmem>>, vector<8x128xf32>
      tpu.vector_store %arg6[%c0_105, %c0_106], %157 {strides = array<i32>} : memref<8x128xf32, #tpu.memory_space<vmem>>, vector<8x128xf32>,
      %c0_107 = arith.constant 0 : index
      %c0_108 = arith.constant 0 : index
      %329 = vector.load %arg7[%c0_107, %c0_108] : memref<8x128xf32, #tpu.memory_space<vmem>>, vector<8x128xf32>
      tpu.vector_store %arg7[%c0_107, %c0_108], %155 {strides = array<i32>} : memref<8x128xf32, #tpu.memory_space<vmem>>, vector<8x128xf32>,
    } else {
    }
    %c4_i32 = arith.constant 4 : i32
    %166 = arith.index_cast %c4_i32 : i32 to index
    %c0_51 = arith.constant 0 : index
    %c0_52 = arith.constant 0 : index
    %167 = vector.load %arg1[%166, %c0_51, %c0_52] : memref<8x8x512xf32, #tpu.memory_space<vmem>>, vector<1x8x512xf32>
    %168 = vector.shape_cast %167 : vector<1x8x512xf32> to vector<8x512xf32>
    %169 = arith.truncf %157 : vector<8x128xf32> to vector<8x128xbf16>
    %c0_53 = arith.constant 0 : index
    %c0_54 = arith.constant 0 : index
    %170 = vector.load %arg8[%c0_53, %c0_54] : memref<128x512xbf16, #tpu.memory_space<vmem>>, vector<128x512xbf16>
    %cst_55 = arith.constant dense<0.000000e+00> : vector<8x512xf32>
    %171 = tpu.matmul %169, %170, %cst_55 {dimension_numbers = #tpu.dot_dimension_numbers<[1], [0], [0], [1], [0, 0, 1, 1], [], []>} : vector<8x128xbf16>, vector<128x512xbf16>, vector<8x512xf32> -> vector<8x512xf32>
    %172 = arith.addf %168, %171 : vector<8x512xf32>
    %173 = vector.extract_strided_slice %172 {offsets = [0, 0], sizes = [8, 128], strides = [1, 1]} : vector<8x512xf32> to vector<8x128xf32>
    %174 = arith.negf %173 : vector<8x128xf32>
    %175 = math.exp %174 : vector<8x128xf32>
    %cst_56 = arith.constant 1.000000e+00 : f32
    %176 = vector.broadcast %cst_56 : f32 to vector<8x128xf32>
    %177 = arith.addf %176, %175 : vector<8x128xf32>
    %178 = arith.divf %176, %177 : vector<8x128xf32>
    %179 = vector.extract_strided_slice %172 {offsets = [0, 128], sizes = [8, 128], strides = [1, 1]} : vector<8x512xf32> to vector<8x128xf32>
    %180 = arith.negf %179 : vector<8x128xf32>
    %181 = math.exp %180 : vector<8x128xf32>
    %cst_57 = arith.constant 1.000000e+00 : f32
    %182 = vector.broadcast %cst_57 : f32 to vector<8x128xf32>
    %183 = arith.addf %182, %181 : vector<8x128xf32>
    %184 = arith.divf %182, %183 : vector<8x128xf32>
    %185 = vector.extract_strided_slice %172 {offsets = [0, 256], sizes = [8, 128], strides = [1, 1]} : vector<8x512xf32> to vector<8x128xf32>
    %186 = math.tanh %185 : vector<8x128xf32>
    %187 = vector.extract_strided_slice %172 {offsets = [0, 384], sizes = [8, 128], strides = [1, 1]} : vector<8x512xf32> to vector<8x128xf32>
    %188 = arith.negf %187 : vector<8x128xf32>
    %189 = math.exp %188 : vector<8x128xf32>
    %cst_58 = arith.constant 1.000000e+00 : f32
    %190 = vector.broadcast %cst_58 : f32 to vector<8x128xf32>
    %191 = arith.addf %190, %189 : vector<8x128xf32>
    %192 = arith.divf %190, %191 : vector<8x128xf32>
    %193 = arith.mulf %184, %155 : vector<8x128xf32>
    %194 = arith.mulf %178, %186 : vector<8x128xf32>
    %195 = arith.addf %193, %194 : vector<8x128xf32>
    %196 = math.tanh %195 : vector<8x128xf32>
    %197 = arith.mulf %192, %196 : vector<8x128xf32>
    %198 = arith.index_cast %c4_i32 : i32 to index
    %c0_59 = arith.constant 0 : index
    %c0_60 = arith.constant 0 : index
    %199 = vector.load %arg5[%198, %c0_59, %c0_60] : memref<8x8x128xf32, #tpu.memory_space<vmem>>, vector<1x8x128xf32>
    %200 = vector.shape_cast %199 : vector<1x8x128xf32> to vector<8x128xf32>
    %201 = vector.shape_cast %197 : vector<8x128xf32> to vector<1x8x128xf32>
    tpu.vector_store %arg5[%198, %c0_59, %c0_60], %201 {strides = array<i32>} : memref<8x8x128xf32, #tpu.memory_space<vmem>>, vector<1x8x128xf32>,
    %202 = arith.addi %3, %c4_i32 : i32
    %c7_i32_61 = arith.constant 7 : i32
    %203 = arith.cmpi eq, %202, %c7_i32_61 : i32
    %204 = arith.extui %203 : i1 to i32
    %c0_i32_62 = arith.constant 0 : i32
    %205 = arith.cmpi ne, %204, %c0_i32_62 : i32
    scf.if %205 {
      %c0_105 = arith.constant 0 : index
      %c0_106 = arith.constant 0 : index
      %328 = vector.load %arg6[%c0_105, %c0_106] : memref<8x128xf32, #tpu.memory_space<vmem>>, vector<8x128xf32>
      tpu.vector_store %arg6[%c0_105, %c0_106], %197 {strides = array<i32>} : memref<8x128xf32, #tpu.memory_space<vmem>>, vector<8x128xf32>,
      %c0_107 = arith.constant 0 : index
      %c0_108 = arith.constant 0 : index
      %329 = vector.load %arg7[%c0_107, %c0_108] : memref<8x128xf32, #tpu.memory_space<vmem>>, vector<8x128xf32>
      tpu.vector_store %arg7[%c0_107, %c0_108], %195 {strides = array<i32>} : memref<8x128xf32, #tpu.memory_space<vmem>>, vector<8x128xf32>,
    } else {
    }
    %c5_i32 = arith.constant 5 : i32
    %206 = arith.index_cast %c5_i32 : i32 to index
    %c0_63 = arith.constant 0 : index
    %c0_64 = arith.constant 0 : index
    %207 = vector.load %arg1[%206, %c0_63, %c0_64] : memref<8x8x512xf32, #tpu.memory_space<vmem>>, vector<1x8x512xf32>
    %208 = vector.shape_cast %207 : vector<1x8x512xf32> to vector<8x512xf32>
    %209 = arith.truncf %197 : vector<8x128xf32> to vector<8x128xbf16>
    %c0_65 = arith.constant 0 : index
    %c0_66 = arith.constant 0 : index
    %210 = vector.load %arg8[%c0_65, %c0_66] : memref<128x512xbf16, #tpu.memory_space<vmem>>, vector<128x512xbf16>
    %cst_67 = arith.constant dense<0.000000e+00> : vector<8x512xf32>
    %211 = tpu.matmul %209, %210, %cst_67 {dimension_numbers = #tpu.dot_dimension_numbers<[1], [0], [0], [1], [0, 0, 1, 1], [], []>} : vector<8x128xbf16>, vector<128x512xbf16>, vector<8x512xf32> -> vector<8x512xf32>
    %212 = arith.addf %208, %211 : vector<8x512xf32>
    %213 = vector.extract_strided_slice %212 {offsets = [0, 0], sizes = [8, 128], strides = [1, 1]} : vector<8x512xf32> to vector<8x128xf32>
    %214 = arith.negf %213 : vector<8x128xf32>
    %215 = math.exp %214 : vector<8x128xf32>
    %cst_68 = arith.constant 1.000000e+00 : f32
    %216 = vector.broadcast %cst_68 : f32 to vector<8x128xf32>
    %217 = arith.addf %216, %215 : vector<8x128xf32>
    %218 = arith.divf %216, %217 : vector<8x128xf32>
    %219 = vector.extract_strided_slice %212 {offsets = [0, 128], sizes = [8, 128], strides = [1, 1]} : vector<8x512xf32> to vector<8x128xf32>
    %220 = arith.negf %219 : vector<8x128xf32>
    %221 = math.exp %220 : vector<8x128xf32>
    %cst_69 = arith.constant 1.000000e+00 : f32
    %222 = vector.broadcast %cst_69 : f32 to vector<8x128xf32>
    %223 = arith.addf %222, %221 : vector<8x128xf32>
    %224 = arith.divf %222, %223 : vector<8x128xf32>
    %225 = vector.extract_strided_slice %212 {offsets = [0, 256], sizes = [8, 128], strides = [1, 1]} : vector<8x512xf32> to vector<8x128xf32>
    %226 = math.tanh %225 : vector<8x128xf32>
    %227 = vector.extract_strided_slice %212 {offsets = [0, 384], sizes = [8, 128], strides = [1, 1]} : vector<8x512xf32> to vector<8x128xf32>
    %228 = arith.negf %227 : vector<8x128xf32>
    %229 = math.exp %228 : vector<8x128xf32>
    %cst_70 = arith.constant 1.000000e+00 : f32
    %230 = vector.broadcast %cst_70 : f32 to vector<8x128xf32>
    %231 = arith.addf %230, %229 : vector<8x128xf32>
    %232 = arith.divf %230, %231 : vector<8x128xf32>
    %233 = arith.mulf %224, %195 : vector<8x128xf32>
    %234 = arith.mulf %218, %226 : vector<8x128xf32>
    %235 = arith.addf %233, %234 : vector<8x128xf32>
    %236 = math.tanh %235 : vector<8x128xf32>
    %237 = arith.mulf %232, %236 : vector<8x128xf32>
    %238 = arith.index_cast %c5_i32 : i32 to index
    %c0_71 = arith.constant 0 : index
    %c0_72 = arith.constant 0 : index
    %239 = vector.load %arg5[%238, %c0_71, %c0_72] : memref<8x8x128xf32, #tpu.memory_space<vmem>>, vector<1x8x128xf32>
    %240 = vector.shape_cast %239 : vector<1x8x128xf32> to vector<8x128xf32>
    %241 = vector.shape_cast %237 : vector<8x128xf32> to vector<1x8x128xf32>
    tpu.vector_store %arg5[%238, %c0_71, %c0_72], %241 {strides = array<i32>} : memref<8x8x128xf32, #tpu.memory_space<vmem>>, vector<1x8x128xf32>,
    %242 = arith.addi %3, %c5_i32 : i32
    %c7_i32_73 = arith.constant 7 : i32
    %243 = arith.cmpi eq, %242, %c7_i32_73 : i32
    %244 = arith.extui %243 : i1 to i32
    %c0_i32_74 = arith.constant 0 : i32
    %245 = arith.cmpi ne, %244, %c0_i32_74 : i32
    scf.if %245 {
      %c0_105 = arith.constant 0 : index
      %c0_106 = arith.constant 0 : index
      %328 = vector.load %arg6[%c0_105, %c0_106] : memref<8x128xf32, #tpu.memory_space<vmem>>, vector<8x128xf32>
      tpu.vector_store %arg6[%c0_105, %c0_106], %237 {strides = array<i32>} : memref<8x128xf32, #tpu.memory_space<vmem>>, vector<8x128xf32>,
      %c0_107 = arith.constant 0 : index
      %c0_108 = arith.constant 0 : index
      %329 = vector.load %arg7[%c0_107, %c0_108] : memref<8x128xf32, #tpu.memory_space<vmem>>, vector<8x128xf32>
      tpu.vector_store %arg7[%c0_107, %c0_108], %235 {strides = array<i32>} : memref<8x128xf32, #tpu.memory_space<vmem>>, vector<8x128xf32>,
    } else {
    }
    %c6_i32 = arith.constant 6 : i32
    %246 = arith.index_cast %c6_i32 : i32 to index
    %c0_75 = arith.constant 0 : index
    %c0_76 = arith.constant 0 : index
    %247 = vector.load %arg1[%246, %c0_75, %c0_76] : memref<8x8x512xf32, #tpu.memory_space<vmem>>, vector<1x8x512xf32>
    %248 = vector.shape_cast %247 : vector<1x8x512xf32> to vector<8x512xf32>
    %249 = arith.truncf %237 : vector<8x128xf32> to vector<8x128xbf16>
    %c0_77 = arith.constant 0 : index
    %c0_78 = arith.constant 0 : index
    %250 = vector.load %arg8[%c0_77, %c0_78] : memref<128x512xbf16, #tpu.memory_space<vmem>>, vector<128x512xbf16>
    %cst_79 = arith.constant dense<0.000000e+00> : vector<8x512xf32>
    %251 = tpu.matmul %249, %250, %cst_79 {dimension_numbers = #tpu.dot_dimension_numbers<[1], [0], [0], [1], [0, 0, 1, 1], [], []>} : vector<8x128xbf16>, vector<128x512xbf16>, vector<8x512xf32> -> vector<8x512xf32>
    %252 = arith.addf %248, %251 : vector<8x512xf32>
    %253 = vector.extract_strided_slice %252 {offsets = [0, 0], sizes = [8, 128], strides = [1, 1]} : vector<8x512xf32> to vector<8x128xf32>
    %254 = arith.negf %253 : vector<8x128xf32>
    %255 = math.exp %254 : vector<8x128xf32>
    %cst_80 = arith.constant 1.000000e+00 : f32
    %256 = vector.broadcast %cst_80 : f32 to vector<8x128xf32>
    %257 = arith.addf %256, %255 : vector<8x128xf32>
    %258 = arith.divf %256, %257 : vector<8x128xf32>
    %259 = vector.extract_strided_slice %252 {offsets = [0, 128], sizes = [8, 128], strides = [1, 1]} : vector<8x512xf32> to vector<8x128xf32>
    %260 = arith.negf %259 : vector<8x128xf32>
    %261 = math.exp %260 : vector<8x128xf32>
    %cst_81 = arith.constant 1.000000e+00 : f32
    %262 = vector.broadcast %cst_81 : f32 to vector<8x128xf32>
    %263 = arith.addf %262, %261 : vector<8x128xf32>
    %264 = arith.divf %262, %263 : vector<8x128xf32>
    %265 = vector.extract_strided_slice %252 {offsets = [0, 256], sizes = [8, 128], strides = [1, 1]} : vector<8x512xf32> to vector<8x128xf32>
    %266 = math.tanh %265 : vector<8x128xf32>
    %267 = vector.extract_strided_slice %252 {offsets = [0, 384], sizes = [8, 128], strides = [1, 1]} : vector<8x512xf32> to vector<8x128xf32>
    %268 = arith.negf %267 : vector<8x128xf32>
    %269 = math.exp %268 : vector<8x128xf32>
    %cst_82 = arith.constant 1.000000e+00 : f32
    %270 = vector.broadcast %cst_82 : f32 to vector<8x128xf32>
    %271 = arith.addf %270, %269 : vector<8x128xf32>
    %272 = arith.divf %270, %271 : vector<8x128xf32>
    %273 = arith.mulf %264, %235 : vector<8x128xf32>
    %274 = arith.mulf %258, %266 : vector<8x128xf32>
    %275 = arith.addf %273, %274 : vector<8x128xf32>
    %276 = math.tanh %275 : vector<8x128xf32>
    %277 = arith.mulf %272, %276 : vector<8x128xf32>
    %278 = arith.index_cast %c6_i32 : i32 to index
    %c0_83 = arith.constant 0 : index
    %c0_84 = arith.constant 0 : index
    %279 = vector.load %arg5[%278, %c0_83, %c0_84] : memref<8x8x128xf32, #tpu.memory_space<vmem>>, vector<1x8x128xf32>
    %280 = vector.shape_cast %279 : vector<1x8x128xf32> to vector<8x128xf32>
    %281 = vector.shape_cast %277 : vector<8x128xf32> to vector<1x8x128xf32>
    tpu.vector_store %arg5[%278, %c0_83, %c0_84], %281 {strides = array<i32>} : memref<8x8x128xf32, #tpu.memory_space<vmem>>, vector<1x8x128xf32>,
    %282 = arith.addi %3, %c6_i32 : i32
    %c7_i32_85 = arith.constant 7 : i32
    %283 = arith.cmpi eq, %282, %c7_i32_85 : i32
    %284 = arith.extui %283 : i1 to i32
    %c0_i32_86 = arith.constant 0 : i32
    %285 = arith.cmpi ne, %284, %c0_i32_86 : i32
    scf.if %285 {
      %c0_105 = arith.constant 0 : index
      %c0_106 = arith.constant 0 : index
      %328 = vector.load %arg6[%c0_105, %c0_106] : memref<8x128xf32, #tpu.memory_space<vmem>>, vector<8x128xf32>
      tpu.vector_store %arg6[%c0_105, %c0_106], %277 {strides = array<i32>} : memref<8x128xf32, #tpu.memory_space<vmem>>, vector<8x128xf32>,
      %c0_107 = arith.constant 0 : index
      %c0_108 = arith.constant 0 : index
      %329 = vector.load %arg7[%c0_107, %c0_108] : memref<8x128xf32, #tpu.memory_space<vmem>>, vector<8x128xf32>
      tpu.vector_store %arg7[%c0_107, %c0_108], %275 {strides = array<i32>} : memref<8x128xf32, #tpu.memory_space<vmem>>, vector<8x128xf32>,
    } else {
    }
    %c7_i32_87 = arith.constant 7 : i32
    %286 = arith.index_cast %c7_i32_87 : i32 to index
    %c0_88 = arith.constant 0 : index
    %c0_89 = arith.constant 0 : index
    %287 = vector.load %arg1[%286, %c0_88, %c0_89] : memref<8x8x512xf32, #tpu.memory_space<vmem>>, vector<1x8x512xf32>
    %288 = vector.shape_cast %287 : vector<1x8x512xf32> to vector<8x512xf32>
    %289 = arith.truncf %277 : vector<8x128xf32> to vector<8x128xbf16>
    %c0_90 = arith.constant 0 : index
    %c0_91 = arith.constant 0 : index
    %290 = vector.load %arg8[%c0_90, %c0_91] : memref<128x512xbf16, #tpu.memory_space<vmem>>, vector<128x512xbf16>
    %cst_92 = arith.constant dense<0.000000e+00> : vector<8x512xf32>
    %291 = tpu.matmul %289, %290, %cst_92 {dimension_numbers = #tpu.dot_dimension_numbers<[1], [0], [0], [1], [0, 0, 1, 1], [], []>} : vector<8x128xbf16>, vector<128x512xbf16>, vector<8x512xf32> -> vector<8x512xf32>
    %292 = arith.addf %288, %291 : vector<8x512xf32>
    %293 = vector.extract_strided_slice %292 {offsets = [0, 0], sizes = [8, 128], strides = [1, 1]} : vector<8x512xf32> to vector<8x128xf32>
    %294 = arith.negf %293 : vector<8x128xf32>
    %295 = math.exp %294 : vector<8x128xf32>
    %cst_93 = arith.constant 1.000000e+00 : f32
    %296 = vector.broadcast %cst_93 : f32 to vector<8x128xf32>
    %297 = arith.addf %296, %295 : vector<8x128xf32>
    %298 = arith.divf %296, %297 : vector<8x128xf32>
    %299 = vector.extract_strided_slice %292 {offsets = [0, 128], sizes = [8, 128], strides = [1, 1]} : vector<8x512xf32> to vector<8x128xf32>
    %300 = arith.negf %299 : vector<8x128xf32>
    %301 = math.exp %300 : vector<8x128xf32>
    %cst_94 = arith.constant 1.000000e+00 : f32
    %302 = vector.broadcast %cst_94 : f32 to vector<8x128xf32>
    %303 = arith.addf %302, %301 : vector<8x128xf32>
    %304 = arith.divf %302, %303 : vector<8x128xf32>
    %305 = vector.extract_strided_slice %292 {offsets = [0, 256], sizes = [8, 128], strides = [1, 1]} : vector<8x512xf32> to vector<8x128xf32>
    %306 = math.tanh %305 : vector<8x128xf32>
    %307 = vector.extract_strided_slice %292 {offsets = [0, 384], sizes = [8, 128], strides = [1, 1]} : vector<8x512xf32> to vector<8x128xf32>
    %308 = arith.negf %307 : vector<8x128xf32>
    %309 = math.exp %308 : vector<8x128xf32>
    %cst_95 = arith.constant 1.000000e+00 : f32
    %310 = vector.broadcast %cst_95 : f32 to vector<8x128xf32>
    %311 = arith.addf %310, %309 : vector<8x128xf32>
    %312 = arith.divf %310, %311 : vector<8x128xf32>
    %313 = arith.mulf %304, %275 : vector<8x128xf32>
    %314 = arith.mulf %298, %306 : vector<8x128xf32>
    %315 = arith.addf %313, %314 : vector<8x128xf32>
    %316 = math.tanh %315 : vector<8x128xf32>
    %317 = arith.mulf %312, %316 : vector<8x128xf32>
    %318 = arith.index_cast %c7_i32_87 : i32 to index
    %c0_96 = arith.constant 0 : index
    %c0_97 = arith.constant 0 : index
    %319 = vector.load %arg5[%318, %c0_96, %c0_97] : memref<8x8x128xf32, #tpu.memory_space<vmem>>, vector<1x8x128xf32>
    %320 = vector.shape_cast %319 : vector<1x8x128xf32> to vector<8x128xf32>
    %321 = vector.shape_cast %317 : vector<8x128xf32> to vector<1x8x128xf32>
    tpu.vector_store %arg5[%318, %c0_96, %c0_97], %321 {strides = array<i32>} : memref<8x8x128xf32, #tpu.memory_space<vmem>>, vector<1x8x128xf32>,
    %322 = arith.addi %3, %c7_i32_87 : i32
    %c7_i32_98 = arith.constant 7 : i32
    %323 = arith.cmpi eq, %322, %c7_i32_98 : i32
    %324 = arith.extui %323 : i1 to i32
    %c0_i32_99 = arith.constant 0 : i32
    %325 = arith.cmpi ne, %324, %c0_i32_99 : i32
    scf.if %325 {
      %c0_105 = arith.constant 0 : index
      %c0_106 = arith.constant 0 : index
      %328 = vector.load %arg6[%c0_105, %c0_106] : memref<8x128xf32, #tpu.memory_space<vmem>>, vector<8x128xf32>
      tpu.vector_store %arg6[%c0_105, %c0_106], %317 {strides = array<i32>} : memref<8x128xf32, #tpu.memory_space<vmem>>, vector<8x128xf32>,
      %c0_107 = arith.constant 0 : index
      %c0_108 = arith.constant 0 : index
      %329 = vector.load %arg7[%c0_107, %c0_108] : memref<8x128xf32, #tpu.memory_space<vmem>>, vector<8x128xf32>
      tpu.vector_store %arg7[%c0_107, %c0_108], %315 {strides = array<i32>} : memref<8x128xf32, #tpu.memory_space<vmem>>, vector<8x128xf32>,
    } else {
    }
    %c8_i32_100 = arith.constant 8 : i32
    %c0_101 = arith.constant 0 : index
    %c0_102 = arith.constant 0 : index
    %326 = vector.load %arg9[%c0_101, %c0_102] : memref<8x128xf32, #tpu.memory_space<vmem>>, vector<8x128xf32>
    tpu.vector_store %arg9[%c0_101, %c0_102], %317 {strides = array<i32>} : memref<8x128xf32, #tpu.memory_space<vmem>>, vector<8x128xf32>,
    %c0_103 = arith.constant 0 : index
    %c0_104 = arith.constant 0 : index
    %327 = vector.load %arg10[%c0_103, %c0_104] : memref<8x128xf32, #tpu.memory_space<vmem>>, vector<8x128xf32>
    tpu.vector_store %arg10[%c0_103, %c0_104], %315 {strides = array<i32>} : memref<8x128xf32, #tpu.memory_space<vmem>>, vector<8x128xf32>,
    return
  }
  func.func @transform_0(%arg0: i32) -> (i32, i32, i32) {
    %c0_i32 = arith.constant 0 : i32
    %c0_i32_0 = arith.constant 0 : i32
    %c0_i32_1 = arith.constant 0 : i32
    return %arg0, %c0_i32, %c0_i32_0 : i32, i32, i32
  }
  func.func @transform_2(%arg0: i32) -> (i32, i32) {
    %c0_i32 = arith.constant 0 : i32
    %c0_i32_0 = arith.constant 0 : i32
    %c0_i32_1 = arith.constant 0 : i32
    return %c0_i32, %c0_i32_0 : i32, i32
  }
  func.func @transform_3(%arg0: i32) -> (i32, i32) {
    %c0_i32 = arith.constant 0 : i32
    %c0_i32_0 = arith.constant 0 : i32
    %c0_i32_1 = arith.constant 0 : i32
    return %c0_i32, %c0_i32_0 : i32, i32
  }
  func.func @transform_4(%arg0: i32) -> (i32, i32, i32) {
    %c0_i32 = arith.constant 0 : i32
    %c0_i32_0 = arith.constant 0 : i32
    %c0_i32_1 = arith.constant 0 : i32
    return %arg0, %c0_i32, %c0_i32_0 : i32, i32, i32
  }
  func.func @transform_5(%arg0: i32) -> (i32, i32) {
    %c0_i32 = arith.constant 0 : i32
    %c0_i32_0 = arith.constant 0 : i32
    %c0_i32_1 = arith.constant 0 : i32
    return %c0_i32, %c0_i32_0 : i32, i32
  }
  func.func @transform_6(%arg0: i32) -> (i32, i32) {
    %c0_i32 = arith.constant 0 : i32
    %c0_i32_0 = arith.constant 0 : i32
    %c0_i32_1 = arith.constant 0 : i32
    return %c0_i32, %c0_i32_0 : i32, i32
  }
}

</mosaic_0001>

<bundles_post_ra>
// kernel: lstm_onehot_forward.9
= control target key start
LH: loop header
LB: loop body
LE: loop exit
PB: predicated region body
PF: predicated region fallthrough
CT: control target
= control target key end

     0   :  { %s339_s1 = inlined_call_operand.vmem [shape: bf16[128,128], index: 1, kind: input, shape index: {}]   ;;  %s340_s0 = inlined_call_operand.vmem [shape: f32[64,128], index: 0, kind: input, shape index: {}]   ;;  %s341_s2 = inlined_call_operand.vmem [shape: f32[1,128], index: 2, kind: input, shape index: {}]   ;;  %s342_s3 = inlined_call_operand.vmem [shape: f32[64,128], index: 3, kind: output, shape index: {}]  }
   0x1   :  { %v236_v0 = vld [vmem:[%s339_s1] sm:$0xff]   ;;  %v237_v1 = vld [vmem:[%s339_s1 + $0x8] sm:$0xff]   ;;  %v238_v2 = vld [vmem:[%s339_s1 + $0x10] sm:$0xff]  }
   0x2   :  { %196 = vmatprep.subr.bf16.mxu0 %v236_v0  ;;  %220 = vmatprep.subr.bf16.mxu1 %v236_v0  ;;  %v239_v3 = vld [vmem:[%s339_s1 + $0x18] sm:$0xff]   ;;  %v15_v4 = vld [vmem:[%s340_s0] sm:$0xff]  ;;  %v16_v5 = vld [vmem:[%s340_s0 + $0x8] sm:$0xff] }
   0x3   :  { %197 = vmatpush3.bf16.msra.mxu0 %v236_v0  ;;  %228 = vmatpush3.bf16.msra.mxu1 %v236_v0  ;;  %v19_v6 = vld [vmem:[%s340_s0 + $0x20] sm:$0xff]  ;;  %v23_v7 = vpack.c.bf16 %v16_v5, %v15_v4  ;;  %v20_v8 = vld [vmem:[%s340_s0 + $0x28] sm:$0xff]  ;;  %v242_v12 = vld [vmem:[%s339_s1 + $0x30] sm:$0xff]  }
   0x4   :  { %198 = vmatprep.subr.bf16.mxu0 %v237_v1  ;;  %221 = vmatprep.subr.bf16.mxu1 %v237_v1  ;;  %v25_v9 = vpack.c.bf16 %v20_v8, %v19_v6  ;;  %v240_v10 = vld [vmem:[%s339_s1 + $0x20] sm:$0xff]   ;;  %v241_v11 = vld [vmem:[%s339_s1 + $0x28] sm:$0xff]   ;;  %v243_v13 = vld [vmem:[%s339_s1 + $0x38] sm:$0xff]  }
   0x5   :  { %212 = vmatprep.mubr.bf16.mxu0 %v23_v7  ;;  %v17_v14 = vld [vmem:[%s340_s0 + $0x10] sm:$0xff]  ;;  %v18_v15 = vld [vmem:[%s340_s0 + $0x18] sm:$0xff]  ;;  %v175_v20 = vld [vmem:[%s341_s2] ss:$0 sm:$0xff] }
   0x6   :  { %216 = vmatprep.mubr.bf16.mxu1 %v25_v9  ;;  %v21_v16 = vld [vmem:[%s340_s0 + $0x30] sm:$0xff]  ;;  %v22_v17 = vld [vmem:[%s340_s0 + $0x38] sm:$0xff]  ;;  %v24_v18 = vpack.c.bf16 %v18_v15, %v17_v14 }
   0x7   :  { %199 = vmatpush3.bf16.msra.mxu0 %v237_v1  ;;  %229 = vmatpush3.bf16.msra.mxu1 %v237_v1  ;;  %v26_v19 = vpack.c.bf16 %v22_v17, %v21_v16 }
   0x8   :  { %200 = vmatprep.subr.bf16.mxu0 %v238_v2  ;;  %222 = vmatprep.subr.bf16.mxu1 %v238_v2 }
   0xb   :  { %201 = vmatpush3.bf16.msra.mxu0 %v238_v2  ;;  %230 = vmatpush3.bf16.msra.mxu1 %v238_v2 }
   0xc   :  { %202 = vmatprep.subr.bf16.mxu0 %v239_v3  ;;  %223 = vmatprep.subr.bf16.mxu1 %v239_v3 }
   0xf   :  { %203 = vmatpush3.bf16.msra.mxu0 %v239_v3  ;;  %231 = vmatpush3.bf16.msra.mxu1 %v239_v3 }
  0x10   :  { %204 = vmatprep.subr.bf16.mxu0 %v240_v10  ;;  %224 = vmatprep.subr.bf16.mxu1 %v240_v10 }
  0x13   :  { %205 = vmatpush3.bf16.msra.mxu0 %v240_v10  ;;  %232 = vmatpush3.bf16.msra.mxu1 %v240_v10 }
  0x14   :  { %206 = vmatprep.subr.bf16.mxu0 %v241_v11  ;;  %225 = vmatprep.subr.bf16.mxu1 %v241_v11 }
  0x17   :  { %207 = vmatpush3.bf16.msra.mxu0 %v241_v11  ;;  %233 = vmatpush3.bf16.msra.mxu1 %v241_v11 }
  0x18   :  { %208 = vmatprep.subr.bf16.mxu0 %v242_v12  ;;  %226 = vmatprep.subr.bf16.mxu1 %v242_v12 }
  0x1b   :  { %209 = vmatpush3.bf16.msra.mxu0 %v242_v12  ;;  %234 = vmatpush3.bf16.msra.mxu1 %v242_v12 }
  0x1c   :  { %210 = vmatprep.subr.bf16.mxu0 %v243_v13  ;;  %227 = vmatprep.subr.bf16.mxu1 %v243_v13 }
  0x1f   :  { %211 = vmatpush3.bf16.msra.mxu0 %v243_v13  ;;  %235 = vmatpush3.bf16.msra.mxu1 %v243_v13 }
  0x22   :  { %213 = vmatmul.mubr.bf16.vlgmr.msra.gmra.mrb[0].mxu0 %v24_v18  ;;  %217 = vmatmul.mubr.bf16.vlgmr.msra.gmra.mrb[0].mxu1 %v26_v19 }
  0xf5   :  { %v214_v21 = vpop.f32.mrb[0].mxu0  ;;  %v218_v22 = vpop.f32.mrb[0].mxu1 }
  0xf6   :  { %v141_v23 = vadd.f32 %v214_v21, %v175_v20  ;;  %v157_v24 = vadd.f32 %v218_v22, %v175_v20  ;;  %v132_v25 = vpop.f32.mrb[1].mxu0  ;;  %v148_v26 = vpop.f32.mrb[1].mxu1 }
  0xf7   :  { %v133_v27 = vadd.f32 %v175_v20, %v132_v25  ;;  %v149_v28 = vadd.f32 %v175_v20, %v148_v26  ;;  %v215_v29 = vpop.f32.mrb[2].mxu0  ;;  %v219_v30 = vpop.f32.mrb[2].mxu1 }
  0xf8   :  { %165 = vst [vmem:[%s342_s3 + $0x10] sm:$0xff] %v141_v23  ;;  %169 = vst [vmem:[%s342_s3 + $0x30] sm:$0xff] %v157_v24  ;;  %v144_v31 = vadd.f32 %v215_v29, %v175_v20  ;;  %v160_v32 = vadd.f32 %v219_v30, %v175_v20  ;;  %v135_v33 = vpop.f32.mrb[3].mxu0  ;;  %v151_v34 = vpop.f32.mrb[3].mxu1 }
  0xf9   :  { %163 = vst [vmem:[%s342_s3] sm:$0xff] %v133_v27  ;;  %167 = vst [vmem:[%s342_s3 + $0x20] sm:$0xff] %v149_v28  ;;  %v136_v35 = vadd.f32 %v175_v20, %v135_v33  ;;  %v152_v36 = vadd.f32 %v175_v20, %v151_v34 }
  0xfa   :  { %166 = vst [vmem:[%s342_s3 + $0x18] sm:$0xff] %v144_v31  ;;  %170 = vst [vmem:[%s342_s3 + $0x38] sm:$0xff] %v160_v32 }
  0xfb   :  { %164 = vst [vmem:[%s342_s3 + $0x8] sm:$0xff] %v136_v35  ;;  %168 = vst [vmem:[%s342_s3 + $0x28] sm:$0xff] %v152_v36 }

// kernel: lstm_onehot_forward.7
= control target key start
LH: loop header
LB: loop body
LE: loop exit
PB: predicated region body
PF: predicated region fallthrough
CT: control target
= control target key end

     0   :  { %v504_v1 = vmov 0   ;;  %v61_v45 = vlaneseq  ;;  %s792_s1 = inlined_call_operand.vmem [shape: bf16[128,512], index: 1, kind: input, shape index: {}]   ;;  %s793_s0 = inlined_call_operand.vmem [shape: f32[64,128], index: 0, kind: input, shape index: {}]   ;;  %s794_s2 = inlined_call_operand.vmem [shape: f32[1,512], index: 2, kind: input, shape index: {}]   ;;  %s795_s3 = inlined_call_operand.vmem [shape: f32[64,512], index: 3, kind: output, shape index: {}]  }
   0x1   :  { %v456_v0 = vld [vmem:[%s792_s1 + $0x4] ss:$16 sps:$4 sm:$0xff]   ;;  %273 = vmatprep.mubr.bf16.mxu0 %v504_v1  ;;  %346 = vmatprep.mubr.bf16.mxu1 %v504_v1  ;;  %v458_v2 = vld [vmem:[%s792_s1 + $0xc] ss:$16 sps:$4 sm:$0xff]   ;;  %v460_v3 = vld [vmem:[%s792_s1] ss:$16 sps:$4 sm:$0xff]  }
   0x2   :  { %241 = vmatprep.subr.bf16.mxu0 %v456_v0  ;;  %v461_v4 = vld [vmem:[%s792_s1 + $0x8] ss:$16 sps:$4 sm:$0xff]   ;;  %314 = vmatprep.subr.bf16.mxu1 %v458_v2  ;;  %v462_v5 = vld [vmem:[%s792_s1 + $0x24] ss:$16 sps:$4 sm:$0xff]   ;;  %v464_v6 = vld [vmem:[%s792_s1 + $0x2c] ss:$16 sps:$4 sm:$0xff]  }
   0x3   :  { %242 = vmatpush1.bf16.msra.mxu0 %v460_v3  ;;  %315 = vmatpush1.bf16.msra.mxu1 %v461_v4  ;;  %v466_v7 = vld [vmem:[%s792_s1 + $0x20] ss:$16 sps:$4 sm:$0xff]   ;;  %v467_v8 = vld [vmem:[%s792_s1 + $0x28] ss:$16 sps:$4 sm:$0xff]   ;;  %v468_v9 = vld [vmem:[%s792_s1 + $0x44] ss:$16 sps:$4 sm:$0xff]  }
   0x4   :  { %243 = vmatprep.subr.bf16.mxu0 %v462_v5  ;;  %316 = vmatprep.subr.bf16.mxu1 %v464_v6  ;;  %v470_v10 = vld [vmem:[%s792_s1 + $0x4c] ss:$16 sps:$4 sm:$0xff]   ;;  %v472_v11 = vld [vmem:[%s792_s1 + $0x40] ss:$16 sps:$4 sm:$0xff]   ;;  %v473_v12 = vld [vmem:[%s792_s1 + $0x48] ss:$16 sps:$4 sm:$0xff]  }
   0x5   :  { %v474_v13 = vld [vmem:[%s792_s1 + $0x64] ss:$16 sps:$4 sm:$0xff]   ;;  %v476_v14 = vld [vmem:[%s792_s1 + $0x6c] ss:$16 sps:$4 sm:$0xff]   ;;  %v478_v15 = vld [vmem:[%s792_s1 + $0x60] ss:$16 sps:$4 sm:$0xff]  }
   0x6   :  { %v479_v16 = vld [vmem:[%s792_s1 + $0x68] ss:$16 sps:$4 sm:$0xff]   ;;  %v480_v17 = vld [vmem:[%s792_s1 + $0x84] ss:$16 sps:$4 sm:$0xff]   ;;  %v482_v18 = vld [vmem:[%s792_s1 + $0x8c] ss:$16 sps:$4 sm:$0xff]  }
   0x7   :  { %244 = vmatpush1.bf16.msra.mxu0 %v466_v7  ;;  %317 = vmatpush1.bf16.msra.mxu1 %v467_v8  ;;  %v484_v19 = vld [vmem:[%s792_s1 + $0x80] ss:$16 sps:$4 sm:$0xff]   ;;  %v485_v20 = vld [vmem:[%s792_s1 + $0x88] ss:$16 sps:$4 sm:$0xff]   ;;  %v486_v21 = vld [vmem:[%s792_s1 + $0xa4] ss:$16 sps:$4 sm:$0xff]  }
   0x8   :  { %245 = vmatprep.subr.bf16.mxu0 %v468_v9  ;;  %318 = vmatprep.subr.bf16.mxu1 %v470_v10  ;;  %v488_v22 = vld [vmem:[%s792_s1 + $0xac] ss:$16 sps:$4 sm:$0xff]   ;;  %v490_v23 = vld [vmem:[%s792_s1 + $0xa0] ss:$16 sps:$4 sm:$0xff]   ;;  %v491_v24 = vld [vmem:[%s792_s1 + $0xa8] ss:$16 sps:$4 sm:$0xff]  }
   0x9   :  { %v492_v25 = vld [vmem:[%s792_s1 + $0xc4] ss:$16 sps:$4 sm:$0xff]   ;;  %v494_v26 = vld [vmem:[%s792_s1 + $0xcc] ss:$16 sps:$4 sm:$0xff]   ;;  %v496_v27 = vld [vmem:[%s792_s1 + $0xc0] ss:$16 sps:$4 sm:$0xff]  }
   0xa   :  { %v497_v28 = vld [vmem:[%s792_s1 + $0xc8] ss:$16 sps:$4 sm:$0xff]   ;;  %v498_v29 = vld [vmem:[%s792_s1 + $0xe4] ss:$16 sps:$4 sm:$0xff]   ;;  %v500_v30 = vld [vmem:[%s792_s1 + $0xec] ss:$16 sps:$4 sm:$0xff]  }
   0xb   :  { %246 = vmatpush1.bf16.msra.mxu0 %v472_v11  ;;  %319 = vmatpush1.bf16.msra.mxu1 %v473_v12  ;;  %v502_v31 = vld [vmem:[%s792_s1 + $0xe0] ss:$16 sps:$4 sm:$0xff]   ;;  %v503_v32 = vld [vmem:[%s792_s1 + $0xe8] ss:$16 sps:$4 sm:$0xff]   ;;  %v62_v46 = vshrl.u32 %v61_v45, 7 }
   0xc   :  { %247 = vmatprep.subr.bf16.mxu0 %v474_v13  ;;  %320 = vmatprep.subr.bf16.mxu1 %v476_v14  ;;  %v15_v33 = vld [vmem:[%s793_s0] sm:$0xff]  ;;  %v16_v34 = vld [vmem:[%s793_s0 + $0x8] sm:$0xff]  ;;  %v17_v36 = vld [vmem:[%s793_s0 + $0x10] sm:$0xff] }
   0xd   :  { %v23_v35 = vpack.c.bf16 %v16_v34, %v15_v33  ;;  %v18_v37 = vld [vmem:[%s793_s0 + $0x18] sm:$0xff]  ;;  %v19_v39 = vld [vmem:[%s793_s0 + $0x20] sm:$0xff]  ;;  %v20_v40 = vld [vmem:[%s793_s0 + $0x28] sm:$0xff]  ;;  %v63_v47 = vsub.s32 0, %v62_v46  ;;  %v71_v48 = vsub.s32 2, %v62_v46  ;;  %v67_v50 = vsub.s32 1, %v62_v46 }
   0xe   :  { %v24_v38 = vpack.c.bf16 %v18_v37, %v17_v36  ;;  %v25_v41 = vpack.c.bf16 %v20_v40, %v19_v39  ;;  %v21_v42 = vld [vmem:[%s793_s0 + $0x30] sm:$0xff]  ;;  %v22_v43 = vld [vmem:[%s793_s0 + $0x38] sm:$0xff]  ;;  %v59_v49 = vld [vmem:[%s794_s2] sm:$0xf]  ;;  %v75_v51 = vsub.s32 3, %v62_v46 }
   0xf   :  { %248 = vmatpush1.bf16.msra.mxu0 %v478_v15  ;;  %321 = vmatpush1.bf16.msra.mxu1 %v479_v16  ;;  %v26_v44 = vpack.c.bf16 %v22_v43, %v21_v42  ;;  %v656_v52 = vrot.slane %v59_v49, %v63_v47  ;;  %v658_v53 = vrot.slane %v59_v49, %v71_v48 }
  0x10   :  { %249 = vmatprep.subr.bf16.mxu0 %v480_v17  ;;  %322 = vmatprep.subr.bf16.mxu1 %v482_v18  ;;  %v660_v54 = vrot.slane %v59_v49, %v67_v50  ;;  %v662_v55 = vrot.slane %v59_v49, %v75_v51 }
  0x13   :  { %250 = vmatpush1.bf16.msra.mxu0 %v484_v19  ;;  %323 = vmatpush1.bf16.msra.mxu1 %v485_v20 }
  0x14   :  { %251 = vmatprep.subr.bf16.mxu0 %v486_v21  ;;  %324 = vmatprep.subr.bf16.mxu1 %v488_v22 }
  0x17   :  { %252 = vmatpush1.bf16.msra.mxu0 %v490_v23  ;;  %325 = vmatpush1.bf16.msra.mxu1 %v491_v24 }
  0x18   :  { %253 = vmatprep.subr.bf16.mxu0 %v492_v25  ;;  %326 = vmatprep.subr.bf16.mxu1 %v494_v26 }
  0x1b   :  { %254 = vmatpush1.bf16.msra.mxu0 %v496_v27  ;;  %327 = vmatpush1.bf16.msra.mxu1 %v497_v28 }
  0x1c   :  { %255 = vmatprep.subr.bf16.mxu0 %v498_v29  ;;  %328 = vmatprep.subr.bf16.mxu1 %v500_v30 }
  0x1f   :  { %256 = vmatpush1.bf16.msra.mxu0 %v502_v31  ;;  %329 = vmatpush1.bf16.msra.mxu1 %v503_v32 }
  0x22   :  { %274 = vmatmul.mubr.bf16.vlgmr.msra.gmra.mrb[0].mxu0 %v23_v35  ;;  %347 = vmatmul.mubr.bf16.vlgmr.msra.gmra.mrb[0].mxu1 %v23_v35 }
  0x23   :  { %283 = vmatprep.mubr.bf16.mxu0 %v504_v1  ;;  %356 = vmatprep.mubr.bf16.mxu1 %v504_v1 }
  0x2a   :  { %284 = vmatmul.mubr.bf16.gmra.mrb[4].mxu0 %v24_v38  ;;  %357 = vmatmul.mubr.bf16.gmra.mrb[4].mxu1 %v24_v38 }
  0x2b   :  { %293 = vmatprep.mubr.bf16.mxu0 %v504_v1  ;;  %366 = vmatprep.mubr.bf16.mxu1 %v504_v1 }
  0x32   :  { %294 = vmatmul.mubr.bf16.gmra.mrb[8].mxu0 %v25_v41  ;;  %367 = vmatmul.mubr.bf16.gmra.mrb[8].mxu1 %v25_v41 }
  0x33   :  { %303 = vmatprep.mubr.bf16.mxu0 %v504_v1  ;;  %376 = vmatprep.mubr.bf16.mxu1 %v504_v1 }
  0x3a   :  { %304 = vmatmul.mubr.bf16.gmra.mrb[12].mxu0 %v26_v44  ;;  %377 = vmatmul.mubr.bf16.gmra.mrb[12].mxu1 %v26_v44 }
  0xf5   :  { %v275_v56 = vpop.f32.mrb[0].mxu0  ;;  %v348_v57 = vpop.f32.mrb[0].mxu1 }
  0xf6   :  { %v276_v58 = vadd.f32 %v275_v56, %v656_v52  ;;  %v349_v59 = vadd.f32 %v348_v57, %v658_v53  ;;  %v277_v60 = vpop.f32.mrb[1].mxu0  ;;  %v350_v61 = vpop.f32.mrb[1].mxu1 }
  0xf7   :  { %v278_v62 = vadd.f32 %v277_v60, %v660_v54  ;;  %v351_v63 = vadd.f32 %v350_v61, %v662_v55  ;;  %v279_v0 = vpop.f32.mrb[2].mxu0  ;;  %v352_v1 = vpop.f32.mrb[2].mxu1 }
  0xf8   :  { %387 = vst [vmem:[%s795_s3] sm:$0xff] %v276_v58  ;;  %389 = vst [vmem:[%s795_s3 + $0x10] sm:$0xff] %v349_v59  ;;  %v280_v2 = vadd.f32 %v279_v0, %v656_v52  ;;  %v353_v3 = vadd.f32 %v352_v1, %v658_v53  ;;  %v281_v4 = vpop.f32.mrb[3].mxu0  ;;  %v354_v5 = vpop.f32.mrb[3].mxu1 }
  0xf9   :  { %388 = vst [vmem:[%s795_s3 + $0x8] sm:$0xff] %v278_v62  ;;  %390 = vst [vmem:[%s795_s3 + $0x18] sm:$0xff] %v351_v63  ;;  %v282_v6 = vadd.f32 %v281_v4, %v660_v54  ;;  %v355_v7 = vadd.f32 %v354_v5, %v662_v55 }
  0xfa   :  { %391 = vst [vmem:[%s795_s3 + $0x20] sm:$0xff] %v280_v2  ;;  %393 = vst [vmem:[%s795_s3 + $0x30] sm:$0xff] %v353_v3 }
  0xfb   :  { %392 = vst [vmem:[%s795_s3 + $0x28] sm:$0xff] %v282_v6  ;;  %394 = vst [vmem:[%s795_s3 + $0x38] sm:$0xff] %v355_v7 }
  0xfd   :  { %v285_v8 = vpop.f32.mrb[4].mxu0  ;;  %v358_v9 = vpop.f32.mrb[4].mxu1 }
  0xfe   :  { %v286_v10 = vadd.f32 %v285_v8, %v656_v52  ;;  %v359_v11 = vadd.f32 %v358_v9, %v658_v53  ;;  %v287_v12 = vpop.f32.mrb[5].mxu0  ;;  %v360_v13 = vpop.f32.mrb[5].mxu1 }
  0xff   :  { %v288_v14 = vadd.f32 %v287_v12, %v660_v54  ;;  %v361_v15 = vadd.f32 %v360_v13, %v662_v55  ;;  %v289_v16 = vpop.f32.mrb[6].mxu0  ;;  %v362_v17 = vpop.f32.mrb[6].mxu1 }
 0x100   :  { %395 = vst [vmem:[%s795_s3 + $0x40] sm:$0xff] %v286_v10  ;;  %397 = vst [vmem:[%s795_s3 + $0x50] sm:$0xff] %v359_v11  ;;  %v290_v18 = vadd.f32 %v289_v16, %v656_v52  ;;  %v363_v19 = vadd.f32 %v362_v17, %v658_v53  ;;  %v291_v20 = vpop.f32.mrb[7].mxu0  ;;  %v364_v21 = vpop.f32.mrb[7].mxu1 }
 0x101   :  { %396 = vst [vmem:[%s795_s3 + $0x48] sm:$0xff] %v288_v14  ;;  %398 = vst [vmem:[%s795_s3 + $0x58] sm:$0xff] %v361_v15  ;;  %v292_v22 = vadd.f32 %v291_v20, %v660_v54  ;;  %v365_v23 = vadd.f32 %v364_v21, %v662_v55 }
 0x102   :  { %399 = vst [vmem:[%s795_s3 + $0x60] sm:$0xff] %v290_v18  ;;  %401 = vst [vmem:[%s795_s3 + $0x70] sm:$0xff] %v363_v19 }
 0x103   :  { %400 = vst [vmem:[%s795_s3 + $0x68] sm:$0xff] %v292_v22  ;;  %402 = vst [vmem:[%s795_s3 + $0x78] sm:$0xff] %v365_v23 }
 0x105   :  { %v295_v24 = vpop.f32.mrb[8].mxu0  ;;  %v368_v25 = vpop.f32.mrb[8].mxu1 }
 0x106   :  { %v296_v26 = vadd.f32 %v295_v24, %v656_v52  ;;  %v369_v27 = vadd.f32 %v368_v25, %v658_v53  ;;  %v297_v28 = vpop.f32.mrb[9].mxu0  ;;  %v370_v29 = vpop.f32.mrb[9].mxu1 }
 0x107   :  { %v298_v30 = vadd.f32 %v297_v28, %v660_v54  ;;  %v371_v31 = vadd.f32 %v370_v29, %v662_v55  ;;  %v299_v32 = vpop.f32.mrb[10].mxu0  ;;  %v372_v33 = vpop.f32.mrb[10].mxu1 }
 0x108   :  { %403 = vst [vmem:[%s795_s3 + $0x80] sm:$0xff] %v296_v26  ;;  %405 = vst [vmem:[%s795_s3 + $0x90] sm:$0xff] %v369_v27  ;;  %v300_v34 = vadd.f32 %v299_v32, %v656_v52  ;;  %v373_v35 = vadd.f32 %v372_v33, %v658_v53  ;;  %v301_v36 = vpop.f32.mrb[11].mxu0  ;;  %v374_v37 = vpop.f32.mrb[11].mxu1 }
 0x109   :  { %404 = vst [vmem:[%s795_s3 + $0x88] sm:$0xff] %v298_v30  ;;  %406 = vst [vmem:[%s795_s3 + $0x98] sm:$0xff] %v371_v31  ;;  %v302_v38 = vadd.f32 %v301_v36, %v660_v54  ;;  %v375_v39 = vadd.f32 %v374_v37, %v662_v55 }
 0x10a   :  { %407 = vst [vmem:[%s795_s3 + $0xa0] sm:$0xff] %v300_v34  ;;  %409 = vst [vmem:[%s795_s3 + $0xb0] sm:$0xff] %v373_v35 }
 0x10b   :  { %408 = vst [vmem:[%s795_s3 + $0xa8] sm:$0xff] %v302_v38  ;;  %410 = vst [vmem:[%s795_s3 + $0xb8] sm:$0xff] %v375_v39 }
 0x10d   :  { %v305_v40 = vpop.f32.mrb[12].mxu0  ;;  %v378_v41 = vpop.f32.mrb[12].mxu1 }
 0x10e   :  { %v306_v42 = vadd.f32 %v305_v40, %v656_v52  ;;  %v379_v43 = vadd.f32 %v378_v41, %v658_v53  ;;  %v307_v44 = vpop.f32.mrb[13].mxu0  ;;  %v380_v45 = vpop.f32.mrb[13].mxu1 }
 0x10f   :  { %v308_v46 = vadd.f32 %v307_v44, %v660_v54  ;;  %v381_v47 = vadd.f32 %v380_v45, %v662_v55  ;;  %v309_v48 = vpop.f32.mrb[14].mxu0  ;;  %v382_v49 = vpop.f32.mrb[14].mxu1 }
 0x110   :  { %411 = vst [vmem:[%s795_s3 + $0xc0] sm:$0xff] %v306_v42  ;;  %413 = vst [vmem:[%s795_s3 + $0xd0] sm:$0xff] %v379_v43  ;;  %v310_v50 = vadd.f32 %v309_v48, %v656_v52  ;;  %v383_v51 = vadd.f32 %v382_v49, %v658_v53  ;;  %v311_v56 = vpop.f32.mrb[15].mxu0  ;;  %v384_v57 = vpop.f32.mrb[15].mxu1 }
 0x111   :  { %412 = vst [vmem:[%s795_s3 + $0xc8] sm:$0xff] %v308_v46  ;;  %414 = vst [vmem:[%s795_s3 + $0xd8] sm:$0xff] %v381_v47  ;;  %v312_v58 = vadd.f32 %v311_v56, %v660_v54  ;;  %v385_v59 = vadd.f32 %v384_v57, %v662_v55 }
 0x112   :  { %415 = vst [vmem:[%s795_s3 + $0xe0] sm:$0xff] %v310_v50  ;;  %417 = vst [vmem:[%s795_s3 + $0xf0] sm:$0xff] %v383_v51 }
 0x113   :  { %416 = vst [vmem:[%s795_s3 + $0xe8] sm:$0xff] %v312_v58  ;;  %418 = vst [vmem:[%s795_s3 + $0xf8] sm:$0xff] %v385_v59 }

// kernel: lstm_onehot_forward.5
= control target key start
LH: loop header
LB: loop body
LE: loop exit
PB: predicated region body
PF: predicated region fallthrough
CT: control target
= control target key end

     0   :  { %8 = vsyncpa [#allocation3], 0  ;;  %s623_s12 = smov [#allocation2]   ;;  %s833_s0 = inlined_call_operand.vmem [shape: s32[64,1], index: 0, kind: input, shape index: {}]   ;;  %s834_s1 = inlined_call_operand.hbm [shape: bf16[128,512], index: 1, kind: input, shape index: {}]   ;;  %s835_s2 = inlined_call_operand.vmem [shape: f32[1,512], index: 2, kind: input, shape index: {}]   ;;  %s836_s3 = inlined_call_operand.vmem [shape: f32[64,512], index: 3, kind: output, shape index: {}]  }
   0x1   :  { %s16_s13 = sshll.u32 %s623_s12, 4  ;;  %s599_s16 = scalar_lea.hbm %s834_s1, 4096  ;;  %s17_s13 = int_to_ptr.vmem [resolvable:$true] %s16_s13 }
   0x2   :  { %p600_p0 = scmp.ne.s32.totalorder %s834_s1, %s599_s16  ;;  %p603_p1 = scmp.lt.u32.totalorder %s599_s16, %s834_s1 }
   0x4   :  { %p605_p2 = pnand %p603_p1, %p600_p0 }
   0x6   :  { %608 = shalt.err (!%p605_p2)
}
   0x7   :  { %s609_s21 = scalar_lea.vmem %s17_s13, 4096  ;;  %p614_p4 = scmp.lt.s32.totalorder %s17_s13, %s17_s13 }
   0x8   :  { %p610_p3 = scmp.ne.s32.totalorder %s17_s13, %s609_s21  ;;  %p615_p5 = scmp.lt.s32.totalorder %s609_s21, %s609_s21 }
   0xa   :  { %p616_p6 = por %p615_p5, %p614_p4 }
   0xc   :  { %p617_p7 = pnand %p616_p6, %p610_p3 }
   0xe   :  { %620 = shalt.err (!%p617_p7)
}
   0xf   :  { %s624_s22 = smov 256   ;;  %s625_s23 = smov 16  }
  0x10   :  { %22 = dma.hbm_to_vmem [thread:$0]  %s834_s1, 4096, %s17_s13, [#allocation3], %s624_s22, %s624_s22, %s625_s23  }
  0x11   :  { %621 = dma.done.wait [#allocation3], 4096  }
  0x12   :  { %622 = vsyncadd [#allocation3], 4294963200  ;;  %v626_v0 = vmov 0   ;;  %v31_v1 = vld [vmem:[%s833_s0 + $0x10] sm:$0xff]  ;;  %v29_v2 = vld [vmem:[%s833_s0] sm:$0xff]  ;;  %v37_v41 = vlaneseq }
  0x13   :  { %550 = vset.pattern.permute.xlu1 %v626_v0  ;;  %549 = vset.pattern.permute.xlu0 %v626_v0  ;;  %v32_v3 = vld [vmem:[%s833_s0 + $0x18] sm:$0xff]  ;;  %v30_v4 = vld [vmem:[%s833_s0 + $0x8] sm:$0xff]  ;;  %v551_v5 = vld [vmem:[#allocation2 + $0x4] ss:$16 sps:$4 sm:$0xff]   ;;  %v627_v46 = vmov 1.0|1.0  }
  0x14   :  { %337 = vmatprep.mubr.bf16.mxu0 %v626_v0  ;;  %410 = vmatprep.mubr.bf16.mxu1 %v626_v0  ;;  %v34_v6 = vld [vmem:[%s833_s0 + $0x28] sm:$0xff]  ;;  %v33_v7 = vld [vmem:[%s833_s0 + $0x20] sm:$0xff]  ;;  %v36_v15 = vld [vmem:[%s833_s0 + $0x38] sm:$0xff]  ;;  %v38_v43 = vand.u32 127, %v37_v41  ;;  %v126_v52 = vshrl.u32 %v37_v41, 7 }
  0x15   :  { %46 = vperm.xlu1 %550, %v31_v1   ;;  %40 = vperm.xlu0 %549, %v29_v2   ;;  %v553_v8 = vld [vmem:[#allocation2 + $0xc] ss:$16 sps:$4 sm:$0xff]   ;;  %v555_v9 = vld [vmem:[#allocation2] ss:$16 sps:$4 sm:$0xff]   ;;  %v556_v10 = vld [vmem:[#allocation2 + $0x8] ss:$16 sps:$4 sm:$0xff]  }
  0x16   :  { %305 = vmatprep.subr.bf16.mxu0 %v551_v5  ;;  %378 = vmatprep.subr.bf16.mxu1 %v553_v8  ;;  %v557_v11 = vld [vmem:[#allocation2 + $0x24] ss:$16 sps:$4 sm:$0xff]   ;;  %v559_v12 = vld [vmem:[#allocation2 + $0x2c] ss:$16 sps:$4 sm:$0xff]   ;;  %v561_v13 = vld [vmem:[#allocation2 + $0x20] ss:$16 sps:$4 sm:$0xff]  }
  0x17   :  { %306 = vmatpush1.bf16.msra.mxu0 %v555_v9  ;;  %379 = vmatpush1.bf16.msra.mxu1 %v556_v10  ;;  %v562_v14 = vld [vmem:[#allocation2 + $0x28] ss:$16 sps:$4 sm:$0xff]   ;;  %v563_v16 = vld [vmem:[#allocation2 + $0x44] ss:$16 sps:$4 sm:$0xff]   ;;  %v565_v17 = vld [vmem:[#allocation2 + $0x4c] ss:$16 sps:$4 sm:$0xff]  }
  0x18   :  { %307 = vmatprep.subr.bf16.mxu0 %v557_v11  ;;  %v35_v18 = vld [vmem:[%s833_s0 + $0x30] sm:$0xff]  ;;  %380 = vmatprep.subr.bf16.mxu1 %v559_v12  ;;  %v568_v20 = vld [vmem:[#allocation2 + $0x48] ss:$16 sps:$4 sm:$0xff]   ;;  %v571_v22 = vld [vmem:[#allocation2 + $0x6c] ss:$16 sps:$4 sm:$0xff]   ;;  %v127_v53 = vsub.s32 0, %v126_v52 }
  0x19   :  { %49 = vperm.xlu1 %550, %v32_v3   ;;  %43 = vperm.xlu0 %549, %v30_v4   ;;  %v567_v19 = vld [vmem:[#allocation2 + $0x40] ss:$16 sps:$4 sm:$0xff]   ;;  %v569_v21 = vld [vmem:[#allocation2 + $0x64] ss:$16 sps:$4 sm:$0xff]   ;;  %v574_v24 = vld [vmem:[#allocation2 + $0x68] ss:$16 sps:$4 sm:$0xff]  }
  0x1a   :  { %v573_v23 = vld [vmem:[#allocation2 + $0x60] ss:$16 sps:$4 sm:$0xff]   ;;  %v575_v25 = vld [vmem:[#allocation2 + $0x84] ss:$16 sps:$4 sm:$0xff]   ;;  %v577_v26 = vld [vmem:[#allocation2 + $0x8c] ss:$16 sps:$4 sm:$0xff]  }
  0x1b   :  { %308 = vmatpush1.bf16.msra.mxu0 %v561_v13  ;;  %381 = vmatpush1.bf16.msra.mxu1 %v562_v14  ;;  %v579_v27 = vld [vmem:[#allocation2 + $0x80] ss:$16 sps:$4 sm:$0xff]   ;;  %v580_v28 = vld [vmem:[#allocation2 + $0x88] ss:$16 sps:$4 sm:$0xff]   ;;  %v581_v29 = vld [vmem:[#allocation2 + $0xa4] ss:$16 sps:$4 sm:$0xff]  }
  0x1c   :  { %309 = vmatprep.subr.bf16.mxu0 %v563_v16  ;;  %382 = vmatprep.subr.bf16.mxu1 %v565_v17  ;;  %v583_v30 = vld [vmem:[#allocation2 + $0xac] ss:$16 sps:$4 sm:$0xff]   ;;  %v585_v31 = vld [vmem:[#allocation2 + $0xa0] ss:$16 sps:$4 sm:$0xff]   ;;  %v586_v32 = vld [vmem:[#allocation2 + $0xa8] ss:$16 sps:$4 sm:$0xff]  }
  0x1d   :  { %55 = vperm.xlu1 %550, %v34_v6   ;;  %52 = vperm.xlu0 %549, %v33_v7   ;;  %v587_v33 = vld [vmem:[#allocation2 + $0xc4] ss:$16 sps:$4 sm:$0xff]   ;;  %v589_v34 = vld [vmem:[#allocation2 + $0xcc] ss:$16 sps:$4 sm:$0xff]   ;;  %v591_v35 = vld [vmem:[#allocation2 + $0xc0] ss:$16 sps:$4 sm:$0xff]  }
  0x1e   :  { %v592_v36 = vld [vmem:[#allocation2 + $0xc8] ss:$16 sps:$4 sm:$0xff]   ;;  %v593_v37 = vld [vmem:[#allocation2 + $0xe4] ss:$16 sps:$4 sm:$0xff]   ;;  %v595_v38 = vld [vmem:[#allocation2 + $0xec] ss:$16 sps:$4 sm:$0xff]  }
  0x1f   :  { %310 = vmatpush1.bf16.msra.mxu0 %v567_v19  ;;  %383 = vmatpush1.bf16.msra.mxu1 %v568_v20  ;;  %v597_v39 = vld [vmem:[#allocation2 + $0xe0] ss:$16 sps:$4 sm:$0xff]   ;;  %v598_v40 = vld [vmem:[#allocation2 + $0xe8] ss:$16 sps:$4 sm:$0xff]   ;;  %v135_v54 = vsub.s32 2, %v126_v52  ;;  %v131_v56 = vsub.s32 1, %v126_v52 }
  0x20   :  { %311 = vmatprep.subr.bf16.mxu0 %v569_v21  ;;  %384 = vmatprep.subr.bf16.mxu1 %v571_v22  ;;  %v123_v55 = vld [vmem:[%s835_s2] sm:$0xf]  ;;  %v139_v57 = vsub.s32 3, %v126_v52 }
  0x21   :  { %61 = vperm.xlu1 %550, %v36_v15   ;;  %58 = vperm.xlu0 %549, %v35_v18   ;;  %v697_v58 = vrot.slane %v123_v55, %v127_v53  ;;  %v699_v59 = vrot.slane %v123_v55, %v135_v54  ;;  %v701_v60 = vrot.slane %v123_v55, %v131_v56 }
  0x22   :  { %v703_v61 = vrot.slane %v123_v55, %v139_v57 }
  0x23   :  { %312 = vmatpush1.bf16.msra.mxu0 %v573_v23  ;;  %385 = vmatpush1.bf16.msra.mxu1 %v574_v24 }
  0x24   :  { %313 = vmatprep.subr.bf16.mxu0 %v575_v25  ;;  %386 = vmatprep.subr.bf16.mxu1 %v577_v26 }
  0x27   :  { %314 = vmatpush1.bf16.msra.mxu0 %v579_v27  ;;  %387 = vmatpush1.bf16.msra.mxu1 %v580_v28 }
  0x28   :  { %315 = vmatprep.subr.bf16.mxu0 %v581_v29  ;;  %388 = vmatprep.subr.bf16.mxu1 %v583_v30 }
  0x2b   :  { %316 = vmatpush1.bf16.msra.mxu0 %v585_v31  ;;  %389 = vmatpush1.bf16.msra.mxu1 %v586_v32 }
  0x2c   :  { %317 = vmatprep.subr.bf16.mxu0 %v587_v33  ;;  %390 = vmatprep.subr.bf16.mxu1 %v589_v34 }
  0x2f   :  { %318 = vmatpush1.bf16.msra.mxu0 %v591_v35  ;;  %391 = vmatpush1.bf16.msra.mxu1 %v592_v36 }
  0x30   :  { %319 = vmatprep.subr.bf16.mxu0 %v593_v37  ;;  %392 = vmatprep.subr.bf16.mxu1 %v595_v38 }
  0x33   :  { %320 = vmatpush1.bf16.msra.mxu0 %v597_v39  ;;  %393 = vmatpush1.bf16.msra.mxu1 %v598_v40 }
  0x94   :  { %v41_v42 = vpop.permute.xlu0 %40  ;;  %v47_v45 = vpop.permute.xlu1 %46 }
  0x95   :  { %vm63_vm1 = vcmp.eq.s32.totalorder %v38_v43, %v41_v42  ;;  %vm65_vm3 = vcmp.eq.s32.totalorder %v38_v43, %v47_v45 }
  0x98   :  { %v44_v44 = vpop.permute.xlu0 %43  ;;  %v50_v47 = vpop.permute.xlu1 %49 }
  0x99   :  { %vm64_vm0 = vcmp.eq.s32.totalorder %v38_v43, %v44_v44  ;;  %vm66_vm4 = vcmp.eq.s32.totalorder %v38_v43, %v50_v47 }
  0x9a   :  { %vm528_vm2 = vmpackc.low %vm64_vm0, %vm63_vm1 }
  0x9b   :  { %529 = vmatmul.mubr.msk.bf16.vlgmr.msra.gmra.mrb[0].mxu0 %vm528_vm2, %v627_v46  ;;  %537 = vmatmul.mubr.msk.bf16.vlgmr.msra.gmra.mrb[0].mxu1 %vm528_vm2, %v627_v46  ;;  %vm530_vm5 = vmpackc.low %vm66_vm4, %vm65_vm3 }
  0x9c   :  { %347 = vmatprep.mubr.bf16.mxu0 %v626_v0  ;;  %420 = vmatprep.mubr.bf16.mxu1 %v626_v0  ;;  %v56_v48 = vpop.permute.xlu1 %55  ;;  %v53_v49 = vpop.permute.xlu0 %52 }
  0x9d   :  { %vm68_vm6 = vcmp.eq.s32.totalorder %v38_v43, %v56_v48  ;;  %vm67_vm7 = vcmp.eq.s32.totalorder %v38_v43, %v53_v49 }
  0x9e   :  { %vm532_vm8 = vmpackc.low %vm68_vm6, %vm67_vm7 }
  0xa0   :  { %v62_v50 = vpop.permute.xlu1 %61  ;;  %v59_v51 = vpop.permute.xlu0 %58 }
  0xa1   :  { %vm70_vm9 = vcmp.eq.s32.totalorder %v38_v43, %v62_v50  ;;  %vm69_vm10 = vcmp.eq.s32.totalorder %v38_v43, %v59_v51 }
  0xa2   :  { %vm534_vm11 = vmpackc.low %vm70_vm9, %vm69_vm10 }
  0xa3   :  { %531 = vmatmul.mubr.msk.bf16.gmra.mrb[4].mxu0 %vm530_vm5, %v627_v46  ;;  %539 = vmatmul.mubr.msk.bf16.gmra.mrb[4].mxu1 %vm530_vm5, %v627_v46 }
  0xa4   :  { %357 = vmatprep.mubr.bf16.mxu0 %v626_v0  ;;  %430 = vmatprep.mubr.bf16.mxu1 %v626_v0 }
  0xab   :  { %533 = vmatmul.mubr.msk.bf16.gmra.mrb[8].mxu0 %vm532_vm8, %v627_v46  ;;  %541 = vmatmul.mubr.msk.bf16.gmra.mrb[8].mxu1 %vm532_vm8, %v627_v46 }
  0xac   :  { %367 = vmatprep.mubr.bf16.mxu0 %v626_v0  ;;  %440 = vmatprep.mubr.bf16.mxu1 %v626_v0 }
  0xb3   :  { %535 = vmatmul.mubr.msk.bf16.gmra.mrb[12].mxu0 %vm534_vm11, %v627_v46  ;;  %543 = vmatmul.mubr.msk.bf16.gmra.mrb[12].mxu1 %vm534_vm11, %v627_v46 }
 0x16e   :  { %v339_v62 = vpop.f32.mrb[0].mxu0  ;;  %v412_v63 = vpop.f32.mrb[0].mxu1 }
 0x16f   :  { %v340_v0 = vadd.f32 %v339_v62, %v697_v58  ;;  %v413_v1 = vadd.f32 %v412_v63, %v699_v59  ;;  %v341_v2 = vpop.f32.mrb[1].mxu0  ;;  %v414_v3 = vpop.f32.mrb[1].mxu1 }
 0x170   :  { %v342_v4 = vadd.f32 %v341_v2, %v701_v60  ;;  %v415_v5 = vadd.f32 %v414_v3, %v703_v61  ;;  %v343_v6 = vpop.f32.mrb[2].mxu0  ;;  %v416_v7 = vpop.f32.mrb[2].mxu1 }
 0x171   :  { %451 = vst [vmem:[%s836_s3] sm:$0xff] %v340_v0  ;;  %453 = vst [vmem:[%s836_s3 + $0x10] sm:$0xff] %v413_v1  ;;  %v344_v8 = vadd.f32 %v343_v6, %v697_v58  ;;  %v417_v9 = vadd.f32 %v416_v7, %v699_v59  ;;  %v345_v10 = vpop.f32.mrb[3].mxu0  ;;  %v418_v11 = vpop.f32.mrb[3].mxu1 }
 0x172   :  { %452 = vst [vmem:[%s836_s3 + $0x8] sm:$0xff] %v342_v4  ;;  %454 = vst [vmem:[%s836_s3 + $0x18] sm:$0xff] %v415_v5  ;;  %v346_v12 = vadd.f32 %v345_v10, %v701_v60  ;;  %v419_v13 = vadd.f32 %v418_v11, %v703_v61 }
 0x173   :  { %455 = vst [vmem:[%s836_s3 + $0x20] sm:$0xff] %v344_v8  ;;  %457 = vst [vmem:[%s836_s3 + $0x30] sm:$0xff] %v417_v9 }
 0x174   :  { %456 = vst [vmem:[%s836_s3 + $0x28] sm:$0xff] %v346_v12  ;;  %458 = vst [vmem:[%s836_s3 + $0x38] sm:$0xff] %v419_v13 }
 0x176   :  { %v349_v14 = vpop.f32.mrb[4].mxu0  ;;  %v422_v15 = vpop.f32.mrb[4].mxu1 }
 0x177   :  { %v350_v16 = vadd.f32 %v349_v14, %v697_v58  ;;  %v423_v17 = vadd.f32 %v422_v15, %v699_v59  ;;  %v351_v18 = vpop.f32.mrb[5].mxu0  ;;  %v424_v19 = vpop.f32.mrb[5].mxu1 }
 0x178   :  { %v352_v20 = vadd.f32 %v351_v18, %v701_v60  ;;  %v425_v21 = vadd.f32 %v424_v19, %v703_v61  ;;  %v353_v22 = vpop.f32.mrb[6].mxu0  ;;  %v426_v23 = vpop.f32.mrb[6].mxu1 }
 0x179   :  { %459 = vst [vmem:[%s836_s3 + $0x40] sm:$0xff] %v350_v16  ;;  %461 = vst [vmem:[%s836_s3 + $0x50] sm:$0xff] %v423_v17  ;;  %v354_v24 = vadd.f32 %v353_v22, %v697_v58  ;;  %v427_v25 = vadd.f32 %v426_v23, %v699_v59  ;;  %v355_v26 = vpop.f32.mrb[7].mxu0  ;;  %v428_v27 = vpop.f32.mrb[7].mxu1 }
 0x17a   :  { %460 = vst [vmem:[%s836_s3 + $0x48] sm:$0xff] %v352_v20  ;;  %462 = vst [vmem:[%s836_s3 + $0x58] sm:$0xff] %v425_v21  ;;  %v356_v28 = vadd.f32 %v355_v26, %v701_v60  ;;  %v429_v29 = vadd.f32 %v428_v27, %v703_v61 }
 0x17b   :  { %463 = vst [vmem:[%s836_s3 + $0x60] sm:$0xff] %v354_v24  ;;  %465 = vst [vmem:[%s836_s3 + $0x70] sm:$0xff] %v427_v25 }
 0x17c   :  { %464 = vst [vmem:[%s836_s3 + $0x68] sm:$0xff] %v356_v28  ;;  %466 = vst [vmem:[%s836_s3 + $0x78] sm:$0xff] %v429_v29 }
 0x17e   :  { %v359_v30 = vpop.f32.mrb[8].mxu0  ;;  %v432_v31 = vpop.f32.mrb[8].mxu1 }
 0x17f   :  { %v360_v32 = vadd.f32 %v359_v30, %v697_v58  ;;  %v433_v33 = vadd.f32 %v432_v31, %v699_v59  ;;  %v361_v34 = vpop.f32.mrb[9].mxu0  ;;  %v434_v35 = vpop.f32.mrb[9].mxu1 }
 0x180   :  { %v362_v36 = vadd.f32 %v361_v34, %v701_v60  ;;  %v435_v37 = vadd.f32 %v434_v35, %v703_v61  ;;  %v363_v38 = vpop.f32.mrb[10].mxu0  ;;  %v436_v39 = vpop.f32.mrb[10].mxu1 }
 0x181   :  { %467 = vst [vmem:[%s836_s3 + $0x80] sm:$0xff] %v360_v32  ;;  %469 = vst [vmem:[%s836_s3 + $0x90] sm:$0xff] %v433_v33  ;;  %v364_v40 = vadd.f32 %v363_v38, %v697_v58  ;;  %v437_v41 = vadd.f32 %v436_v39, %v699_v59  ;;  %v365_v42 = vpop.f32.mrb[11].mxu0  ;;  %v438_v43 = vpop.f32.mrb[11].mxu1 }
 0x182   :  { %468 = vst [vmem:[%s836_s3 + $0x88] sm:$0xff] %v362_v36  ;;  %470 = vst [vmem:[%s836_s3 + $0x98] sm:$0xff] %v435_v37  ;;  %v366_v44 = vadd.f32 %v365_v42, %v701_v60  ;;  %v439_v45 = vadd.f32 %v438_v43, %v703_v61 }
 0x183   :  { %471 = vst [vmem:[%s836_s3 + $0xa0] sm:$0xff] %v364_v40  ;;  %473 = vst [vmem:[%s836_s3 + $0xb0] sm:$0xff] %v437_v41 }
 0x184   :  { %472 = vst [vmem:[%s836_s3 + $0xa8] sm:$0xff] %v366_v44  ;;  %474 = vst [vmem:[%s836_s3 + $0xb8] sm:$0xff] %v439_v45 }
 0x186   :  { %v369_v46 = vpop.f32.mrb[12].mxu0  ;;  %v442_v47 = vpop.f32.mrb[12].mxu1 }
 0x187   :  { %v370_v48 = vadd.f32 %v369_v46, %v697_v58  ;;  %v443_v49 = vadd.f32 %v442_v47, %v699_v59  ;;  %v371_v50 = vpop.f32.mrb[13].mxu0  ;;  %v444_v51 = vpop.f32.mrb[13].mxu1 }
 0x188   :  { %v372_v52 = vadd.f32 %v371_v50, %v701_v60  ;;  %v445_v53 = vadd.f32 %v444_v51, %v703_v61  ;;  %v373_v54 = vpop.f32.mrb[14].mxu0  ;;  %v446_v55 = vpop.f32.mrb[14].mxu1 }
 0x189   :  { %475 = vst [vmem:[%s836_s3 + $0xc0] sm:$0xff] %v370_v48  ;;  %477 = vst [vmem:[%s836_s3 + $0xd0] sm:$0xff] %v443_v49  ;;  %v374_v56 = vadd.f32 %v373_v54, %v697_v58  ;;  %v447_v57 = vadd.f32 %v446_v55, %v699_v59  ;;  %v375_v62 = vpop.f32.mrb[15].mxu0  ;;  %v448_v63 = vpop.f32.mrb[15].mxu1 }
 0x18a   :  { %476 = vst [vmem:[%s836_s3 + $0xc8] sm:$0xff] %v372_v52  ;;  %478 = vst [vmem:[%s836_s3 + $0xd8] sm:$0xff] %v445_v53  ;;  %v376_v0 = vadd.f32 %v375_v62, %v701_v60  ;;  %v449_v1 = vadd.f32 %v448_v63, %v703_v61 }
 0x18b   :  { %479 = vst [vmem:[%s836_s3 + $0xe0] sm:$0xff] %v374_v56  ;;  %481 = vst [vmem:[%s836_s3 + $0xf0] sm:$0xff] %v447_v57 }
 0x18c   :  { %480 = vst [vmem:[%s836_s3 + $0xe8] sm:$0xff] %v376_v0  ;;  %482 = vst [vmem:[%s836_s3 + $0xf8] sm:$0xff] %v449_v1 }
 0x18d   :  { %487 = vsyncpa [#allocation3], 1 }

// kernel: lstm_onehot_forward.6
= control target key start
LH: loop header
LB: loop body
LE: loop exit
PB: predicated region body
PF: predicated region fallthrough
CT: control target
= control target key end

     0   :  { %s2575_s0 = inlined_call_operand.vmem [shape: f32[8,8,512], index: 0, kind: input, shape index: {}]   ;;  %s2576_s1 = inlined_call_operand.vmem [shape: bf16[128,512], index: 1, kind: input, shape index: {}]   ;;  %s2577_s2 = inlined_call_operand.vmem [shape: f32[8,128], index: 2, kind: input, shape index: {}]   ;;  %s2578_s3 = inlined_call_operand.vmem [shape: f32[8,128], index: 3, kind: input, shape index: {}]   ;;  %s2579_s4 = inlined_call_operand.vmem [shape: f32[8,8,128], index: 4, kind: output, shape index: {0}]   ;;  %s2580_s5 = inlined_call_operand.vmem [shape: f32[8,128], index: 5, kind: output, shape index: {1}]   ;;  %s2581_s6 = inlined_call_operand.vmem [shape: f32[8,128], index: 6, kind: output, shape index: {2}]  }
   0x1   :  { %v40_v0 = vld [vmem:[%s2576_s1] sm:$0xf]  ;;  %v42_v1 = vld [vmem:[%s2576_s1 + $0x10] sm:$0xf]  ;;  %v44_v2 = vld [vmem:[%s2576_s1 + $0x4] sm:$0xf] }
   0x2   :  { %41 = vst [vmem:[#allocation2] sm:$0xf] %v40_v0  ;;  %43 = vst [vmem:[#allocation2 + $0x4] sm:$0xf] %v42_v1  ;;  %v46_v3 = vld [vmem:[%s2576_s1 + $0x14] sm:$0xf] }
   0x3   :  { %45 = vst [vmem:[#allocation2 + $0x8] sm:$0xf] %v44_v2  ;;  %v48_v4 = vld [vmem:[%s2576_s1 + $0x8] sm:$0xf]  ;;  %v50_v5 = vld [vmem:[%s2576_s1 + $0x18] sm:$0xf] }
   0x4   :  { %47 = vst [vmem:[#allocation2 + $0xc] sm:$0xf] %v46_v3  ;;  %49 = vst [vmem:[#allocation2 + $0x10] sm:$0xf] %v48_v4  ;;  %v52_v6 = vld [vmem:[%s2576_s1 + $0xc] sm:$0xf] }
   0x5   :  { %51 = vst [vmem:[#allocation2 + $0x14] sm:$0xf] %v50_v5  ;;  %v54_v7 = vld [vmem:[%s2576_s1 + $0x1c] sm:$0xff]   ;;  %v58_v8 = vld [vmem:[%s2576_s1 + $0x30] sm:$0xf] }
   0x6   :  { %53 = vst [vmem:[#allocation2 + $0x18] sm:$0xf] %v52_v6  ;;  %55 = vst [vmem:[#allocation2 + $0x1c] sm:$0xff] %v54_v7   ;;  %v60_v9 = vld [vmem:[%s2576_s1 + $0x24] sm:$0xf]  ;;  %v70_v14 = vld [vmem:[%s2576_s1 + $0x3c] sm:$0xff]  }
   0x7   :  { %59 = vst [vmem:[#allocation2 + $0x24] sm:$0xf] %v58_v8  ;;  %v62_v10 = vld [vmem:[%s2576_s1 + $0x34] sm:$0xf]  ;;  %v64_v11 = vld [vmem:[%s2576_s1 + $0x28] sm:$0xf] }
   0x8   :  { %61 = vst [vmem:[#allocation2 + $0x28] sm:$0xf] %v60_v9  ;;  %63 = vst [vmem:[#allocation2 + $0x2c] sm:$0xf] %v62_v10  ;;  %v66_v12 = vld [vmem:[%s2576_s1 + $0x38] sm:$0xf] }
   0x9   :  { %65 = vst [vmem:[#allocation2 + $0x30] sm:$0xf] %v64_v11  ;;  %v68_v13 = vld [vmem:[%s2576_s1 + $0x2c] sm:$0xf]  ;;  %67 = vst [vmem:[#allocation2 + $0x34] sm:$0xf] %v66_v12 }
   0xa   :  { %69 = vst [vmem:[#allocation2 + $0x38] sm:$0xf] %v68_v13  ;;  %71 = vst [vmem:[#allocation2 + $0x3c] sm:$0xff] %v70_v14   ;;  %v74_v15 = vld [vmem:[%s2576_s1 + $0x50] sm:$0xf]  ;;  %v86_v21 = vld [vmem:[%s2576_s1 + $0x5c] sm:$0xff]  }
   0xb   :  { %v76_v16 = vld [vmem:[%s2576_s1 + $0x44] sm:$0xf]  ;;  %v78_v17 = vld [vmem:[%s2576_s1 + $0x54] sm:$0xf]  ;;  %75 = vst [vmem:[#allocation2 + $0x44] sm:$0xf] %v74_v15 }
   0xc   :  { %77 = vst [vmem:[#allocation2 + $0x48] sm:$0xf] %v76_v16  ;;  %79 = vst [vmem:[#allocation2 + $0x4c] sm:$0xf] %v78_v17  ;;  %v80_v18 = vld [vmem:[%s2576_s1 + $0x48] sm:$0xf] }
   0xd   :  { %v82_v19 = vld [vmem:[%s2576_s1 + $0x58] sm:$0xf]  ;;  %v84_v20 = vld [vmem:[%s2576_s1 + $0x4c] sm:$0xf]  ;;  %81 = vst [vmem:[#allocation2 + $0x50] sm:$0xf] %v80_v18 }
   0xe   :  { %83 = vst [vmem:[#allocation2 + $0x54] sm:$0xf] %v82_v19  ;;  %85 = vst [vmem:[#allocation2 + $0x58] sm:$0xf] %v84_v20  ;;  %v90_v22 = vld [vmem:[%s2576_s1 + $0x70] sm:$0xf] }
   0xf   :  { %v92_v23 = vld [vmem:[%s2576_s1 + $0x64] sm:$0xf]  ;;  %87 = vst [vmem:[#allocation2 + $0x5c] sm:$0xff] %v86_v21   ;;  %91 = vst [vmem:[#allocation2 + $0x64] sm:$0xf] %v90_v22  ;;  %v102_v28 = vld [vmem:[%s2576_s1 + $0x7c] sm:$0xff]  }
  0x10   :  { %93 = vst [vmem:[#allocation2 + $0x68] sm:$0xf] %v92_v23  ;;  %v94_v24 = vld [vmem:[%s2576_s1 + $0x74] sm:$0xf]  ;;  %v96_v25 = vld [vmem:[%s2576_s1 + $0x68] sm:$0xf] }
  0x11   :  { %v98_v26 = vld [vmem:[%s2576_s1 + $0x78] sm:$0xf]  ;;  %95 = vst [vmem:[#allocation2 + $0x6c] sm:$0xf] %v94_v24  ;;  %97 = vst [vmem:[#allocation2 + $0x70] sm:$0xf] %v96_v25 }
  0x12   :  { %99 = vst [vmem:[#allocation2 + $0x74] sm:$0xf] %v98_v26  ;;  %v100_v27 = vld [vmem:[%s2576_s1 + $0x6c] sm:$0xf]  ;;  %v106_v29 = vld [vmem:[%s2576_s1 + $0x90] sm:$0xf] }
  0x13   :  { %101 = vst [vmem:[#allocation2 + $0x78] sm:$0xf] %v100_v27  ;;  %103 = vst [vmem:[#allocation2 + $0x7c] sm:$0xff] %v102_v28   ;;  %v108_v30 = vld [vmem:[%s2576_s1 + $0x84] sm:$0xf]  ;;  %v118_v35 = vld [vmem:[%s2576_s1 + $0x9c] sm:$0xff]  }
  0x14   :  { %107 = vst [vmem:[#allocation2 + $0x84] sm:$0xf] %v106_v29  ;;  %v110_v31 = vld [vmem:[%s2576_s1 + $0x94] sm:$0xf]  ;;  %v112_v32 = vld [vmem:[%s2576_s1 + $0x88] sm:$0xf] }
  0x15   :  { %109 = vst [vmem:[#allocation2 + $0x88] sm:$0xf] %v108_v30  ;;  %111 = vst [vmem:[#allocation2 + $0x8c] sm:$0xf] %v110_v31  ;;  %v114_v33 = vld [vmem:[%s2576_s1 + $0x98] sm:$0xf] }
  0x16   :  { %113 = vst [vmem:[#allocation2 + $0x90] sm:$0xf] %v112_v32  ;;  %v116_v34 = vld [vmem:[%s2576_s1 + $0x8c] sm:$0xf]  ;;  %115 = vst [vmem:[#allocation2 + $0x94] sm:$0xf] %v114_v33 }
  0x17   :  { %117 = vst [vmem:[#allocation2 + $0x98] sm:$0xf] %v116_v34  ;;  %119 = vst [vmem:[#allocation2 + $0x9c] sm:$0xff] %v118_v35   ;;  %v122_v36 = vld [vmem:[%s2576_s1 + $0xb0] sm:$0xf]  ;;  %v134_v42 = vld [vmem:[%s2576_s1 + $0xbc] sm:$0xff]  }
  0x18   :  { %v124_v37 = vld [vmem:[%s2576_s1 + $0xa4] sm:$0xf]  ;;  %v126_v38 = vld [vmem:[%s2576_s1 + $0xb4] sm:$0xf]  ;;  %123 = vst [vmem:[#allocation2 + $0xa4] sm:$0xf] %v122_v36 }
  0x19   :  { %125 = vst [vmem:[#allocation2 + $0xa8] sm:$0xf] %v124_v37  ;;  %127 = vst [vmem:[#allocation2 + $0xac] sm:$0xf] %v126_v38  ;;  %v128_v39 = vld [vmem:[%s2576_s1 + $0xa8] sm:$0xf] }
  0x1a   :  { %v130_v40 = vld [vmem:[%s2576_s1 + $0xb8] sm:$0xf]  ;;  %v132_v41 = vld [vmem:[%s2576_s1 + $0xac] sm:$0xf]  ;;  %129 = vst [vmem:[#allocation2 + $0xb0] sm:$0xf] %v128_v39 }
  0x1b   :  { %131 = vst [vmem:[#allocation2 + $0xb4] sm:$0xf] %v130_v40  ;;  %133 = vst [vmem:[#allocation2 + $0xb8] sm:$0xf] %v132_v41  ;;  %v138_v43 = vld [vmem:[%s2576_s1 + $0xd0] sm:$0xf] }
  0x1c   :  { %v140_v44 = vld [vmem:[%s2576_s1 + $0xc4] sm:$0xf]  ;;  %135 = vst [vmem:[#allocation2 + $0xbc] sm:$0xff] %v134_v42   ;;  %139 = vst [vmem:[#allocation2 + $0xc4] sm:$0xf] %v138_v43  ;;  %v150_v49 = vld [vmem:[%s2576_s1 + $0xdc] sm:$0xff]  }
  0x1d   :  { %141 = vst [vmem:[#allocation2 + $0xc8] sm:$0xf] %v140_v44  ;;  %v142_v45 = vld [vmem:[%s2576_s1 + $0xd4] sm:$0xf]  ;;  %v144_v46 = vld [vmem:[%s2576_s1 + $0xc8] sm:$0xf] }
  0x1e   :  { %v146_v47 = vld [vmem:[%s2576_s1 + $0xd8] sm:$0xf]  ;;  %143 = vst [vmem:[#allocation2 + $0xcc] sm:$0xf] %v142_v45  ;;  %145 = vst [vmem:[#allocation2 + $0xd0] sm:$0xf] %v144_v46 }
  0x1f   :  { %147 = vst [vmem:[#allocation2 + $0xd4] sm:$0xf] %v146_v47  ;;  %v148_v48 = vld [vmem:[%s2576_s1 + $0xcc] sm:$0xf]  ;;  %v154_v50 = vld [vmem:[%s2576_s1 + $0xf0] sm:$0xf] }
  0x20   :  { %149 = vst [vmem:[#allocation2 + $0xd8] sm:$0xf] %v148_v48  ;;  %151 = vst [vmem:[#allocation2 + $0xdc] sm:$0xff] %v150_v49   ;;  %v156_v51 = vld [vmem:[%s2576_s1 + $0xe4] sm:$0xf] }
  0x21   :  { %155 = vst [vmem:[#allocation2 + $0xe4] sm:$0xf] %v154_v50  ;;  %v158_v52 = vld [vmem:[%s2576_s1 + $0xf4] sm:$0xf]  ;;  %v160_v53 = vld [vmem:[%s2576_s1 + $0xe8] sm:$0xf] }
  0x22   :  { %157 = vst [vmem:[#allocation2 + $0xe8] sm:$0xf] %v156_v51  ;;  %159 = vst [vmem:[#allocation2 + $0xec] sm:$0xf] %v158_v52  ;;  %v162_v54 = vld [vmem:[%s2576_s1 + $0xf8] sm:$0xf] }
  0x23   :  { %161 = vst [vmem:[#allocation2 + $0xf0] sm:$0xf] %v160_v53  ;;  %v164_v55 = vld [vmem:[%s2576_s1 + $0xec] sm:$0xf]  ;;  %v166_v56 = vld [vmem:[%s2576_s1 + $0xfc] sm:$0xf] }
  0x24   :  { %163 = vst [vmem:[#allocation2 + $0xf4] sm:$0xf] %v162_v54  ;;  %165 = vst [vmem:[#allocation2 + $0xf8] sm:$0xf] %v164_v55 }
  0x25   :  { %167 = vst [vmem:[#allocation2 + $0xfc] sm:$0xf] %v166_v56 }
  0x26   :  { %326 = vsyncadd [#allocation5], 4096 }
  0x27   :  { %1814 = dma.done.wait [#allocation5], 4096 }
  0x28   :  { %1815 = vsyncadd [#allocation5], 4294963200  ;;  %v1816_v57 = vmov 0   ;;  %v2025_v58 = vld [vmem:[#allocation2 + $0x8] sm:$0xff]  ;;  %v2027_v59 = vld [vmem:[#allocation2] sm:$0xff] }
  0x29   :  { %407 = vmatprep.mubr.bf16.mxu0 %v1816_v57  ;;  %448 = vmatprep.mubr.bf16.mxu1 %v1816_v57  ;;  %v2029_v60 = vld [vmem:[#allocation2 + $0x28] sm:$0xff]  ;;  %v2033_v61 = vld [vmem:[#allocation2 + $0x18] sm:$0xff]  ;;  %v2036_v62 = vld [vmem:[#allocation2 + $0x20] sm:$0xff] }
  0x2a   :  { %375 = vmatprep.subr.bf16.mxu0 %v2025_v58  ;;  %416 = vmatprep.subr.bf16.mxu1 %v2033_v61  ;;  %v2039_v63 = vld [vmem:[#allocation2 + $0x10] sm:$0xff]  ;;  %v2041_v0 = vld [vmem:[#allocation2 + $0x38] sm:$0xff]  ;;  %v2043_v1 = vld [vmem:[#allocation2 + $0x48] sm:$0xff] }
  0x2b   :  { %376 = vmatpush1.bf16.msra.mxu0 %v2027_v59  ;;  %417 = vmatpush1.bf16.msra.mxu1 %v2039_v63  ;;  %v2047_v2 = vld [vmem:[#allocation2 + $0x30] sm:$0xff]  ;;  %v2050_v3 = vld [vmem:[#allocation2 + $0x58] sm:$0xff]  ;;  %v2053_v4 = vld [vmem:[#allocation2 + $0x40] sm:$0xff] }
  0x2c   :  { %377 = vmatprep.subr.bf16.mxu0 %v2029_v60  ;;  %418 = vmatprep.subr.bf16.mxu1 %v2041_v0  ;;  %v2055_v5 = vld [vmem:[#allocation2 + $0x68] sm:$0xff]  ;;  %v2059_v6 = vld [vmem:[#allocation2 + $0x50] sm:$0xff]  ;;  %v2062_v7 = vld [vmem:[#allocation2 + $0x78] sm:$0xff] }
  0x2d   :  { %v2065_v8 = vld [vmem:[#allocation2 + $0x60] sm:$0xff]  ;;  %v2067_v9 = vld [vmem:[#allocation2 + $0x88] sm:$0xff]  ;;  %v2071_v10 = vld [vmem:[#allocation2 + $0x70] sm:$0xff] }
  0x2e   :  { %v2074_v11 = vld [vmem:[#allocation2 + $0x98] sm:$0xff]  ;;  %v2077_v12 = vld [vmem:[#allocation2 + $0x80] sm:$0xff]  ;;  %v2079_v13 = vld [vmem:[#allocation2 + $0xa8] sm:$0xff] }
  0x2f   :  { %378 = vmatpush1.bf16.msra.mxu0 %v2036_v62  ;;  %419 = vmatpush1.bf16.msra.mxu1 %v2047_v2  ;;  %v2083_v14 = vld [vmem:[#allocation2 + $0x90] sm:$0xff]  ;;  %v2086_v15 = vld [vmem:[#allocation2 + $0xb8] sm:$0xff]  ;;  %v2089_v16 = vld [vmem:[#allocation2 + $0xa0] sm:$0xff] }
  0x30   :  { %379 = vmatprep.subr.bf16.mxu0 %v2043_v1  ;;  %420 = vmatprep.subr.bf16.mxu1 %v2050_v3  ;;  %v2091_v17 = vld [vmem:[#allocation2 + $0xc8] sm:$0xff]  ;;  %v2095_v18 = vld [vmem:[#allocation2 + $0xb0] sm:$0xff]  ;;  %v2098_v19 = vld [vmem:[#allocation2 + $0xd8] sm:$0xff] }
  0x31   :  { %v2101_v20 = vld [vmem:[#allocation2 + $0xc0] sm:$0xff]  ;;  %v2103_v21 = vld [vmem:[#allocation2 + $0xe8] sm:$0xff]  ;;  %v2107_v22 = vld [vmem:[#allocation2 + $0xd0] sm:$0xff] }
  0x32   :  { %v331_v23 = vld [vmem:[%s2577_s2] sm:$0xff]  ;;  %v2113_v24 = vld [vmem:[#allocation2 + $0xf8] sm:$0xff]  ;;  %v2120_v27 = vld [vmem:[#allocation2 + $0xf0] sm:$0xff] }
  0x33   :  { %380 = vmatpush1.bf16.msra.mxu0 %v2053_v4  ;;  %421 = vmatpush1.bf16.msra.mxu1 %v2059_v6  ;;  %v2116_v25 = vld [vmem:[#allocation2 + $0xe0] sm:$0xff]  ;;  %v342_v26 = vpack.c.bf16 %v331_v23, %v331_v23  ;;  %v339_v29 = vld [vmem:[%s2575_s0 + $0x8] sm:$0xff]  ;;  %v341_v40 = vld [vmem:[%s2575_s0 + $0x18] sm:$0xff] }
  0x34   :  { %381 = vmatprep.subr.bf16.mxu0 %v2055_v5  ;;  %422 = vmatprep.subr.bf16.mxu1 %v2062_v7  ;;  %v338_v28 = vld [vmem:[%s2575_s0] sm:$0xff]  ;;  %v340_v44 = vld [vmem:[%s2575_s0 + $0x10] sm:$0xff] }
  0x35   :  { %v333_v53 = vld [vmem:[%s2578_s3] sm:$0xff] }
  0x37   :  { %382 = vmatpush1.bf16.msra.mxu0 %v2065_v8  ;;  %423 = vmatpush1.bf16.msra.mxu1 %v2071_v10 }
  0x38   :  { %383 = vmatprep.subr.bf16.mxu0 %v2067_v9  ;;  %424 = vmatprep.subr.bf16.mxu1 %v2074_v11 }
  0x3b   :  { %384 = vmatpush1.bf16.msra.mxu0 %v2077_v12  ;;  %425 = vmatpush1.bf16.msra.mxu1 %v2083_v14 }
  0x3c   :  { %385 = vmatprep.subr.bf16.mxu0 %v2079_v13  ;;  %426 = vmatprep.subr.bf16.mxu1 %v2086_v15 }
  0x3f   :  { %386 = vmatpush1.bf16.msra.mxu0 %v2089_v16  ;;  %427 = vmatpush1.bf16.msra.mxu1 %v2095_v18 }
  0x40   :  { %387 = vmatprep.subr.bf16.mxu0 %v2091_v17  ;;  %428 = vmatprep.subr.bf16.mxu1 %v2098_v19 }
  0x43   :  { %388 = vmatpush1.bf16.msra.mxu0 %v2101_v20  ;;  %429 = vmatpush1.bf16.msra.mxu1 %v2107_v22 }
  0x44   :  { %389 = vmatprep.subr.bf16.mxu0 %v2103_v21  ;;  %430 = vmatprep.subr.bf16.mxu1 %v2113_v24 }
  0x47   :  { %390 = vmatpush1.bf16.msra.mxu0 %v2116_v25  ;;  %431 = vmatpush1.bf16.msra.mxu1 %v2120_v27 }
  0x48   :  { %530 = vmatprep.subr.bf16.mxu0 %v2025_v58  ;;  %571 = vmatprep.subr.bf16.mxu1 %v2033_v61 }
  0x4a   :  { %408 = vmatmul.mubr.bf16.vlgmr.msra.gmra.mrb[0].mxu0 %v342_v26  ;;  %449 = vmatmul.mubr.bf16.vlgmr.msra.gmra.mrb[0].mxu1 %v342_v26 }
  0x4b   :  { %531 = vmatpush1.bf16.msra.mxu0 %v2027_v59  ;;  %562 = vmatprep.mubr.bf16.mxu0 %v1816_v57 }
  0x4c   :  { %532 = vmatprep.subr.bf16.mxu0 %v2029_v60  ;;  %572 = vmatpush1.bf16.msra.mxu1 %v2039_v63 }
  0x4d   :  { %603 = vmatprep.mubr.bf16.mxu1 %v1816_v57  ;;  %573 = vmatprep.subr.bf16.mxu1 %v2041_v0 }
  0x4f   :  { %533 = vmatpush1.bf16.msra.mxu0 %v2036_v62 }
  0x50   :  { %534 = vmatprep.subr.bf16.mxu0 %v2043_v1  ;;  %574 = vmatpush1.bf16.msra.mxu1 %v2047_v2 }
  0x51   :  { %575 = vmatprep.subr.bf16.mxu1 %v2050_v3 }
  0x53   :  { %535 = vmatpush1.bf16.msra.mxu0 %v2053_v4 }
  0x54   :  { %536 = vmatprep.subr.bf16.mxu0 %v2055_v5  ;;  %576 = vmatpush1.bf16.msra.mxu1 %v2059_v6 }
  0x55   :  { %577 = vmatprep.subr.bf16.mxu1 %v2062_v7 }
  0x57   :  { %537 = vmatpush1.bf16.msra.mxu0 %v2065_v8 }
  0x58   :  { %538 = vmatprep.subr.bf16.mxu0 %v2067_v9  ;;  %578 = vmatpush1.bf16.msra.mxu1 %v2071_v10 }
  0x59   :  { %579 = vmatprep.subr.bf16.mxu1 %v2074_v11 }
  0x5b   :  { %539 = vmatpush1.bf16.msra.mxu0 %v2077_v12 }
  0x5c   :  { %540 = vmatprep.subr.bf16.mxu0 %v2079_v13  ;;  %580 = vmatpush1.bf16.msra.mxu1 %v2083_v14 }
  0x5d   :  { %581 = vmatprep.subr.bf16.mxu1 %v2086_v15 }
  0x5f   :  { %541 = vmatpush1.bf16.msra.mxu0 %v2089_v16 }
  0x60   :  { %542 = vmatprep.subr.bf16.mxu0 %v2091_v17  ;;  %582 = vmatpush1.bf16.msra.mxu1 %v2095_v18 }
  0x61   :  { %583 = vmatprep.subr.bf16.mxu1 %v2098_v19 }
  0x63   :  { %543 = vmatpush1.bf16.msra.mxu0 %v2101_v20 }
  0x64   :  { %544 = vmatprep.subr.bf16.mxu0 %v2103_v21  ;;  %584 = vmatpush1.bf16.msra.mxu1 %v2107_v22 }
  0x65   :  { %585 = vmatprep.subr.bf16.mxu1 %v2113_v24 }
  0x67   :  { %545 = vmatpush1.bf16.msra.mxu0 %v2116_v25 }
  0x68   :  { %687 = vmatprep.subr.bf16.mxu0 %v2025_v58  ;;  %586 = vmatpush1.bf16.msra.mxu1 %v2120_v27 }
  0x69   :  { %728 = vmatprep.subr.bf16.mxu1 %v2033_v61 }
 0x11d   :  { %v409_v30 = vpop.f32.mrb[0].mxu0  ;;  %v450_v35 = vpop.f32.mrb[0].mxu1 }
 0x11e   :  { %v457_v31 = vadd.f32 %v409_v30, %v338_v28  ;;  %v411_v32 = vpop.f32.mrb[1].mxu0  ;;  %v452_v38 = vpop.f32.mrb[1].mxu1  ;;  %v459_v46 = vadd.f32 %v450_v35, %v340_v44 }
 0x11f   :  { %v458_v33 = vadd.f32 %v411_v32, %v339_v29  ;;  %v413_v34 = vpop.f32.mrb[2].mxu0  ;;  %v454_v41 = vpop.f32.mrb[2].mxu1  ;;  %v460_v43 = vadd.f32 %v452_v38, %v341_v40 }
 0x120   :  { %v1625_v36 = vmul.f32 -1.442695, %v457_v31  ;;  %v414_v37 = vpop.f32.mrb[3].mxu0  ;;  %v455_v42 = vpop.f32.mrb[3].mxu1  ;;  %v1629_v34 = vld [vmem:[%s2575_s0 + $0x28] sm:$0xff] }
 0x121   :  { %v1626_v39 = vmul.f32 -1.442695, %v458_v33  ;;  %v1627_v45 = vmul.f32 -1.442695, %v460_v43  ;;  %v1628_v33 = vld [vmem:[%s2575_s0 + $0x20] sm:$0xff] }
 0x122   :  { %1686 = vpow2.f32 %v1625_v36 }
 0x123   :  { %1688 = vpow2.f32 %v1626_v39 }
 0x124   :  { %1690 = vpow2.f32 %v1627_v45 }
 0x125   :  { %1692 = vtanh.f32 %v459_v46 }
 0x12c   :  { %v1687_v47 = vpop.eup %1686 }
 0x12d   :  { %v1689_v48 = vpop.eup %1688  ;;  %v464_v49 = vadd.f32 1.0, %v1687_v47  ;;  %v1631_v47 = vld [vmem:[%s2575_s0 + $0x38] sm:$0xff] }
 0x12e   :  { %v470_v50 = vadd.f32 1.0, %v1689_v48  ;;  %v1691_v51 = vpop.eup %1690 }
 0x12f   :  { %1694 = vrcp.f32 %v464_v49  ;;  %v1693_v52 = vpop.eup %1692  ;;  %v477_v55 = vadd.f32 1.0, %v1691_v51  ;;  %v1630_v49 = vld [vmem:[%s2575_s0 + $0x30] sm:$0xff] }
 0x130   :  { %1696 = vrcp.f32 %v470_v50 }
 0x131   :  { %1698 = vrcp.f32 %v477_v55 }
 0x139   :  { %v1695_v54 = vpop.eup %1694 }
 0x13a   :  { %v1697_v56 = vpop.eup %1696  ;;  %v481_v23 = vmul.f32 %v1695_v54, %v1693_v52 }
 0x13b   :  { %v480_v26 = vmul.f32 %v1697_v56, %v333_v53  ;;  %v1699_v29 = vpop.eup %1698 }
 0x13d   :  { %v2175_v28 = vadd.f32 %v481_v23, %v480_v26 }
 0x13f   :  { %1700 = vtanh.f32 %v2175_v28 }
 0x149   :  { %v1701_v30 = vpop.eup %1700 }
 0x14a   :  { %v484_v31 = vmul.f32 %v1701_v30, %v1699_v29 }
 0x14c   :  { %485 = vst [vmem:[%s2579_s4] sm:$0xff] %v484_v31  ;;  %v497_v32 = vpack.c.bf16 %v484_v31, %v484_v31 }
 0x14e   :  { %563 = vmatmul.mubr.bf16.vlgmr.msra.gmra.mrb[4].mxu0 %v497_v32  ;;  %604 = vmatmul.mubr.bf16.vlgmr.msra.gmra.mrb[4].mxu1 %v497_v32 }
 0x14f   :  { %688 = vmatpush1.bf16.msra.mxu0 %v2027_v59  ;;  %729 = vmatpush1.bf16.msra.mxu1 %v2039_v63 }
 0x150   :  { %689 = vmatprep.subr.bf16.mxu0 %v2029_v60  ;;  %730 = vmatprep.subr.bf16.mxu1 %v2041_v0 }
 0x151   :  { %719 = vmatprep.mubr.bf16.mxu0 %v1816_v57  ;;  %760 = vmatprep.mubr.bf16.mxu1 %v1816_v57 }
 0x153   :  { %690 = vmatpush1.bf16.msra.mxu0 %v2036_v62  ;;  %731 = vmatpush1.bf16.msra.mxu1 %v2047_v2 }
 0x154   :  { %691 = vmatprep.subr.bf16.mxu0 %v2043_v1  ;;  %732 = vmatprep.subr.bf16.mxu1 %v2050_v3 }
 0x157   :  { %692 = vmatpush1.bf16.msra.mxu0 %v2053_v4  ;;  %733 = vmatpush1.bf16.msra.mxu1 %v2059_v6 }
 0x158   :  { %693 = vmatprep.subr.bf16.mxu0 %v2055_v5  ;;  %734 = vmatprep.subr.bf16.mxu1 %v2062_v7 }
 0x15b   :  { %694 = vmatpush1.bf16.msra.mxu0 %v2065_v8  ;;  %735 = vmatpush1.bf16.msra.mxu1 %v2071_v10 }
 0x15c   :  { %695 = vmatprep.subr.bf16.mxu0 %v2067_v9  ;;  %736 = vmatprep.subr.bf16.mxu1 %v2074_v11 }
 0x15f   :  { %696 = vmatpush1.bf16.msra.mxu0 %v2077_v12  ;;  %737 = vmatpush1.bf16.msra.mxu1 %v2083_v14 }
 0x160   :  { %697 = vmatprep.subr.bf16.mxu0 %v2079_v13  ;;  %738 = vmatprep.subr.bf16.mxu1 %v2086_v15 }
 0x163   :  { %698 = vmatpush1.bf16.msra.mxu0 %v2089_v16  ;;  %739 = vmatpush1.bf16.msra.mxu1 %v2095_v18 }
 0x164   :  { %699 = vmatprep.subr.bf16.mxu0 %v2091_v17  ;;  %740 = vmatprep.subr.bf16.mxu1 %v2098_v19 }
 0x167   :  { %700 = vmatpush1.bf16.msra.mxu0 %v2101_v20  ;;  %741 = vmatpush1.bf16.msra.mxu1 %v2107_v22 }
 0x168   :  { %701 = vmatprep.subr.bf16.mxu0 %v2103_v21  ;;  %742 = vmatprep.subr.bf16.mxu1 %v2113_v24 }
 0x16b   :  { %702 = vmatpush1.bf16.msra.mxu0 %v2116_v25  ;;  %743 = vmatpush1.bf16.msra.mxu1 %v2120_v27 }
 0x16c   :  { %844 = vmatprep.subr.bf16.mxu0 %v2025_v58  ;;  %885 = vmatprep.subr.bf16.mxu1 %v2033_v61 }
 0x221   :  { %v564_v35 = vpop.f32.mrb[4].mxu0  ;;  %v605_v36 = vpop.f32.mrb[4].mxu1 }
 0x222   :  { %v612_v37 = vadd.f32 %v1628_v33, %v564_v35  ;;  %v566_v38 = vpop.f32.mrb[5].mxu0  ;;  %v607_v39 = vpop.f32.mrb[5].mxu1  ;;  %v614_v51 = vadd.f32 %v1630_v49, %v605_v36 }
 0x223   :  { %v613_v40 = vadd.f32 %v1629_v34, %v566_v38  ;;  %v568_v41 = vpop.f32.mrb[6].mxu0  ;;  %v609_v42 = vpop.f32.mrb[6].mxu1  ;;  %v615_v48 = vadd.f32 %v1631_v47, %v607_v39  ;;  %v1637_v38 = vld [vmem:[%s2575_s0 + $0x48] sm:$0xff] }
 0x224   :  { %v1632_v43 = vmul.f32 -1.442695, %v612_v37  ;;  %v569_v44 = vpop.f32.mrb[7].mxu0  ;;  %v610_v45 = vpop.f32.mrb[7].mxu1 }
 0x225   :  { %v1633_v46 = vmul.f32 -1.442695, %v613_v40  ;;  %v1634_v50 = vmul.f32 -1.442695, %v615_v48 }
 0x226   :  { %1702 = vpow2.f32 %v1632_v43 }
 0x227   :  { %1704 = vpow2.f32 %v1633_v46 }
 0x228   :  { %1706 = vpow2.f32 %v1634_v50  ;;  %v1639_v50 = vld [vmem:[%s2575_s0 + $0x58] sm:$0xff] }
 0x229   :  { %1708 = vtanh.f32 %v614_v51 }
 0x230   :  { %v1703_v52 = vpop.eup %1702 }
 0x231   :  { %v1705_v53 = vpop.eup %1704  ;;  %v619_v54 = vadd.f32 1.0, %v1703_v52  ;;  %v1638_v52 = vld [vmem:[%s2575_s0 + $0x50] sm:$0xff] }
 0x232   :  { %v625_v55 = vadd.f32 1.0, %v1705_v53  ;;  %v1707_v56 = vpop.eup %1706 }
 0x233   :  { %1710 = vrcp.f32 %v619_v54  ;;  %v1709_v23 = vpop.eup %1708  ;;  %v632_v31 = vadd.f32 1.0, %v1707_v56 }
 0x234   :  { %1712 = vrcp.f32 %v625_v55 }
 0x235   :  { %1714 = vrcp.f32 %v632_v31 }
 0x23d   :  { %v1711_v26 = vpop.eup %1710 }
 0x23e   :  { %v1713_v29 = vpop.eup %1712  ;;  %v636_v30 = vmul.f32 %v1711_v26, %v1709_v23 }
 0x23f   :  { %v635_v32 = vmul.f32 %v1713_v29, %v2175_v28  ;;  %v1715_v34 = vpop.eup %1714  ;;  %v1636_v28 = vld [vmem:[%s2575_s0 + $0x40] sm:$0xff] }
 0x241   :  { %v2228_v33 = vadd.f32 %v636_v30, %v635_v32 }
 0x243   :  { %1716 = vtanh.f32 %v2228_v33 }
 0x24d   :  { %v1717_v35 = vpop.eup %1716 }
 0x24e   :  { %v639_v36 = vmul.f32 %v1717_v35, %v1715_v34 }
 0x250   :  { %1635 = vst [vmem:[%s2579_s4 + $0x8] sm:$0xff] %v639_v36  ;;  %v654_v37 = vpack.c.bf16 %v639_v36, %v639_v36 }
 0x252   :  { %720 = vmatmul.mubr.bf16.vlgmr.msra.gmra.mrb[8].mxu0 %v654_v37  ;;  %761 = vmatmul.mubr.bf16.vlgmr.msra.gmra.mrb[8].mxu1 %v654_v37 }
 0x253   :  { %845 = vmatpush1.bf16.msra.mxu0 %v2027_v59  ;;  %886 = vmatpush1.bf16.msra.mxu1 %v2039_v63 }
 0x254   :  { %846 = vmatprep.subr.bf16.mxu0 %v2029_v60  ;;  %887 = vmatprep.subr.bf16.mxu1 %v2041_v0 }
 0x255   :  { %876 = vmatprep.mubr.bf16.mxu0 %v1816_v57  ;;  %917 = vmatprep.mubr.bf16.mxu1 %v1816_v57 }
 0x257   :  { %847 = vmatpush1.bf16.msra.mxu0 %v2036_v62  ;;  %888 = vmatpush1.bf16.msra.mxu1 %v2047_v2 }
 0x258   :  { %848 = vmatprep.subr.bf16.mxu0 %v2043_v1  ;;  %889 = vmatprep.subr.bf16.mxu1 %v2050_v3 }
 0x25b   :  { %849 = vmatpush1.bf16.msra.mxu0 %v2053_v4  ;;  %890 = vmatpush1.bf16.msra.mxu1 %v2059_v6 }
 0x25c   :  { %850 = vmatprep.subr.bf16.mxu0 %v2055_v5  ;;  %891 = vmatprep.subr.bf16.mxu1 %v2062_v7 }
 0x25f   :  { %851 = vmatpush1.bf16.msra.mxu0 %v2065_v8  ;;  %892 = vmatpush1.bf16.msra.mxu1 %v2071_v10 }
 0x260   :  { %852 = vmatprep.subr.bf16.mxu0 %v2067_v9  ;;  %893 = vmatprep.subr.bf16.mxu1 %v2074_v11 }
 0x263   :  { %853 = vmatpush1.bf16.msra.mxu0 %v2077_v12  ;;  %894 = vmatpush1.bf16.msra.mxu1 %v2083_v14 }
 0x264   :  { %854 = vmatprep.subr.bf16.mxu0 %v2079_v13  ;;  %895 = vmatprep.subr.bf16.mxu1 %v2086_v15 }
 0x267   :  { %855 = vmatpush1.bf16.msra.mxu0 %v2089_v16  ;;  %896 = vmatpush1.bf16.msra.mxu1 %v2095_v18 }
 0x268   :  { %856 = vmatprep.subr.bf16.mxu0 %v2091_v17  ;;  %897 = vmatprep.subr.bf16.mxu1 %v2098_v19 }
 0x26b   :  { %857 = vmatpush1.bf16.msra.mxu0 %v2101_v20  ;;  %898 = vmatpush1.bf16.msra.mxu1 %v2107_v22 }
 0x26c   :  { %858 = vmatprep.subr.bf16.mxu0 %v2103_v21  ;;  %899 = vmatprep.subr.bf16.mxu1 %v2113_v24 }
 0x26f   :  { %859 = vmatpush1.bf16.msra.mxu0 %v2116_v25  ;;  %900 = vmatpush1.bf16.msra.mxu1 %v2120_v27 }
 0x270   :  { %1001 = vmatprep.subr.bf16.mxu0 %v2025_v58  ;;  %1042 = vmatprep.subr.bf16.mxu1 %v2033_v61 }
 0x325   :  { %v721_v39 = vpop.f32.mrb[8].mxu0  ;;  %v762_v40 = vpop.f32.mrb[8].mxu1 }
 0x326   :  { %v769_v41 = vadd.f32 %v1636_v28, %v721_v39  ;;  %v723_v42 = vpop.f32.mrb[9].mxu0  ;;  %v764_v43 = vpop.f32.mrb[9].mxu1  ;;  %v771_v54 = vadd.f32 %v1638_v52, %v762_v40 }
 0x327   :  { %v770_v44 = vadd.f32 %v1637_v38, %v723_v42  ;;  %v725_v45 = vpop.f32.mrb[10].mxu0  ;;  %v766_v46 = vpop.f32.mrb[10].mxu1  ;;  %v772_v51 = vadd.f32 %v1639_v50, %v764_v43 }
 0x328   :  { %v1640_v47 = vmul.f32 -1.442695, %v769_v41  ;;  %v726_v58 = vpop.f32.mrb[11].mxu0  ;;  %v767_v48 = vpop.f32.mrb[11].mxu1 }
 0x329   :  { %v1641_v49 = vmul.f32 -1.442695, %v770_v44  ;;  %v1642_v53 = vmul.f32 -1.442695, %v772_v51 }
 0x32a   :  { %1718 = vpow2.f32 %v1640_v47 }
 0x32b   :  { %1720 = vpow2.f32 %v1641_v49 }
 0x32c   :  { %1722 = vpow2.f32 %v1642_v53 }
 0x32d   :  { %1724 = vtanh.f32 %v771_v54 }
 0x334   :  { %v1719_v55 = vpop.eup %1718 }
 0x335   :  { %v1721_v56 = vpop.eup %1720  ;;  %v776_v23 = vadd.f32 1.0, %v1719_v55 }
 0x336   :  { %v782_v26 = vadd.f32 1.0, %v1721_v56  ;;  %v1723_v29 = vpop.eup %1722  ;;  %v2391_v56 = vld [vmem:[#allocation2 + $0xf0] sm:$0xff] }
 0x337   :  { %1726 = vrcp.f32 %v776_v23  ;;  %v1725_v30 = vpop.eup %1724  ;;  %v789_v35 = vadd.f32 1.0, %v1723_v29  ;;  %v2393_v23 = vld [vmem:[#allocation2 + $0xc8] sm:$0xff] }
 0x338   :  { %1728 = vrcp.f32 %v782_v26  ;;  %v2399_v26 = vld [vmem:[#allocation2 + $0xc0] sm:$0xff]  ;;  %v2401_v29 = vld [vmem:[#allocation2 + $0xe8] sm:$0xff] }
 0x339   :  { %1730 = vrcp.f32 %v789_v35 }
 0x341   :  { %v1727_v31 = vpop.eup %1726 }
 0x342   :  { %v1729_v32 = vpop.eup %1728  ;;  %v793_v34 = vmul.f32 %v1727_v31, %v1725_v30  ;;  %v2405_v30 = vld [vmem:[#allocation2 + $0xe0] sm:$0xff] }
 0x343   :  { %v792_v36 = vmul.f32 %v1729_v32, %v2228_v33  ;;  %v1731_v28 = vpop.eup %1730  ;;  %v1652_v31 = vld [vmem:[%s2575_s0 + $0x80] sm:$0xff]  ;;  %v1653_v32 = vld [vmem:[%s2575_s0 + $0x88] sm:$0xff] }
 0x345   :  { %v2281_v37 = vadd.f32 %v793_v34, %v792_v36 }
 0x347   :  { %1732 = vtanh.f32 %v2281_v37 }
 0x351   :  { %v1733_v38 = vpop.eup %1732 }
 0x352   :  { %v796_v39 = vmul.f32 %v1733_v38, %v1731_v28 }
 0x354   :  { %1643 = vst [vmem:[%s2579_s4 + $0x10] sm:$0xff] %v796_v39  ;;  %v811_v40 = vpack.c.bf16 %v796_v39, %v796_v39 }
 0x356   :  { %877 = vmatmul.mubr.bf16.vlgmr.msra.gmra.mrb[12].mxu0 %v811_v40  ;;  %918 = vmatmul.mubr.bf16.vlgmr.msra.gmra.mrb[12].mxu1 %v811_v40 }
 0x357   :  { %1002 = vmatpush1.bf16.msra.mxu0 %v2027_v59  ;;  %1043 = vmatpush1.bf16.msra.mxu1 %v2039_v63  ;;  %v1644_v59 = vld [vmem:[%s2575_s0 + $0x60] sm:$0xff] }
 0x358   :  { %1003 = vmatprep.subr.bf16.mxu0 %v2029_v60  ;;  %1044 = vmatprep.subr.bf16.mxu1 %v2041_v0  ;;  %v1645_v60 = vld [vmem:[%s2575_s0 + $0x68] sm:$0xff] }
 0x359   :  { %1033 = vmatprep.mubr.bf16.mxu0 %v1816_v57  ;;  %1074 = vmatprep.mubr.bf16.mxu1 %v1816_v57 }
 0x35b   :  { %1004 = vmatpush1.bf16.msra.mxu0 %v2036_v62  ;;  %1045 = vmatpush1.bf16.msra.mxu1 %v2047_v2 }
 0x35c   :  { %1005 = vmatprep.subr.bf16.mxu0 %v2043_v1  ;;  %1046 = vmatprep.subr.bf16.mxu1 %v2050_v3 }
 0x35f   :  { %1006 = vmatpush1.bf16.msra.mxu0 %v2053_v4  ;;  %1047 = vmatpush1.bf16.msra.mxu1 %v2059_v6 }
 0x360   :  { %1007 = vmatprep.subr.bf16.mxu0 %v2055_v5  ;;  %1048 = vmatprep.subr.bf16.mxu1 %v2062_v7 }
 0x363   :  { %1008 = vmatpush1.bf16.msra.mxu0 %v2065_v8  ;;  %1049 = vmatpush1.bf16.msra.mxu1 %v2071_v10 }
 0x364   :  { %1009 = vmatprep.subr.bf16.mxu0 %v2067_v9  ;;  %1050 = vmatprep.subr.bf16.mxu1 %v2074_v11 }
 0x367   :  { %1010 = vmatpush1.bf16.msra.mxu0 %v2077_v12  ;;  %1051 = vmatpush1.bf16.msra.mxu1 %v2083_v14 }
 0x368   :  { %1011 = vmatprep.subr.bf16.mxu0 %v2079_v13  ;;  %1052 = vmatprep.subr.bf16.mxu1 %v2086_v15 }
 0x36b   :  { %1012 = vmatpush1.bf16.msra.mxu0 %v2089_v16  ;;  %1053 = vmatpush1.bf16.msra.mxu1 %v2095_v18 }
 0x36c   :  { %1013 = vmatprep.subr.bf16.mxu0 %v2091_v17  ;;  %1054 = vmatprep.subr.bf16.mxu1 %v2098_v19 }
 0x36f   :  { %1014 = vmatpush1.bf16.msra.mxu0 %v2101_v20  ;;  %1055 = vmatpush1.bf16.msra.mxu1 %v2107_v22 }
 0x370   :  { %1015 = vmatprep.subr.bf16.mxu0 %v2103_v21  ;;  %1056 = vmatprep.subr.bf16.mxu1 %v2113_v24  ;;  %v1647_v21 = vld [vmem:[%s2575_s0 + $0x78] sm:$0xff] }
 0x373   :  { %1016 = vmatpush1.bf16.msra.mxu0 %v2116_v25  ;;  %1057 = vmatpush1.bf16.msra.mxu1 %v2120_v27  ;;  %v1646_v25 = vld [vmem:[%s2575_s0 + $0x70] sm:$0xff] }
 0x374   :  { %1199 = vmatprep.subr.bf16.mxu1 %v2033_v61 }
 0x429   :  { %v878_v62 = vpop.f32.mrb[12].mxu0  ;;  %v919_v1 = vpop.f32.mrb[12].mxu1 }
 0x42a   :  { %v926_v4 = vadd.f32 %v1644_v59, %v878_v62  ;;  %v880_v5 = vpop.f32.mrb[13].mxu0  ;;  %v921_v8 = vpop.f32.mrb[13].mxu1  ;;  %v928_v33 = vadd.f32 %v1646_v25, %v919_v1 }
 0x42b   :  { %v927_v9 = vadd.f32 %v1645_v60, %v880_v5  ;;  %v882_v12 = vpop.f32.mrb[14].mxu0  ;;  %v923_v13 = vpop.f32.mrb[14].mxu1  ;;  %v929_v24 = vadd.f32 %v1647_v21, %v921_v8  ;;  %v1654_v8 = vld [vmem:[%s2575_s0 + $0x90] sm:$0xff] }
 0x42c   :  { %v1648_v16 = vmul.f32 -1.442695, %v926_v4  ;;  %v883_v17 = vpop.f32.mrb[15].mxu0  ;;  %v924_v20 = vpop.f32.mrb[15].mxu1  ;;  %v1655_v4 = vld [vmem:[%s2575_s0 + $0x98] sm:$0xff] }
 0x42d   :  { %v1649_v61 = vmul.f32 -1.442695, %v927_v9  ;;  %v1650_v27 = vmul.f32 -1.442695, %v929_v24 }
 0x42e   :  { %1734 = vpow2.f32 %v1648_v16 }
 0x42f   :  { %1736 = vpow2.f32 %v1649_v61 }
 0x430   :  { %1738 = vpow2.f32 %v1650_v27 }
 0x431   :  { %1740 = vtanh.f32 %v928_v33 }
 0x438   :  { %v1735_v41 = vpop.eup %1734 }
 0x439   :  { %v1737_v42 = vpop.eup %1736  ;;  %v933_v43 = vadd.f32 1.0, %v1735_v41 }
 0x43a   :  { %v939_v44 = vadd.f32 1.0, %v1737_v42  ;;  %v1739_v45 = vpop.eup %1738 }
 0x43b   :  { %1742 = vrcp.f32 %v933_v43  ;;  %v1741_v46 = vpop.eup %1740  ;;  %v946_v49 = vadd.f32 1.0, %v1739_v45 }
 0x43c   :  { %1744 = vrcp.f32 %v939_v44 }
 0x43d   :  { %1746 = vrcp.f32 %v946_v49  ;;  %v2452_v49 = vld [vmem:[#allocation2 + $0x30] sm:$0xff] }
 0x445   :  { %v1743_v47 = vpop.eup %1742 }
 0x446   :  { %v1745_v58 = vpop.eup %1744  ;;  %v950_v48 = vmul.f32 %v1743_v47, %v1741_v46  ;;  %v1286_v47 = vld [vmem:[#allocation2 + $0x18] sm:$0xff] }
 0x447   :  { %v949_v50 = vmul.f32 %v1745_v58, %v2281_v37  ;;  %v1747_v52 = vpop.eup %1746  ;;  %v2446_v58 = vld [vmem:[#allocation2 + $0x10] sm:$0xff] }
 0x449   :  { %v2333_v51 = vadd.f32 %v950_v48, %v949_v50  ;;  %v2449_v48 = vld [vmem:[#allocation2 + $0x38] sm:$0xff] }
 0x44a   :  { %v2455_v50 = vld [vmem:[#allocation2 + $0x58] sm:$0xff] }
 0x44b   :  { %1748 = vtanh.f32 %v2333_v51 }
 0x455   :  { %v1749_v53 = vpop.eup %1748 }
 0x456   :  { %v953_v54 = vmul.f32 %v1749_v53, %v1747_v52  ;;  %v2461_v52 = vld [vmem:[#allocation2 + $0x78] sm:$0xff]  ;;  %v2464_v53 = vld [vmem:[#allocation2 + $0x70] sm:$0xff] }
 0x458   :  { %1651 = vst [vmem:[%s2579_s4 + $0x18] sm:$0xff] %v953_v54  ;;  %v968_v55 = vpack.c.bf16 %v953_v54, %v953_v54  ;;  %v2467_v54 = vld [vmem:[#allocation2 + $0x98] sm:$0xff] }
 0x45a   :  { %1034 = vmatmul.mubr.bf16.vlgmr.msra.gmra.mrb[16].mxu0 %v968_v55  ;;  %1075 = vmatmul.mubr.bf16.vlgmr.msra.gmra.mrb[16].mxu1 %v968_v55  ;;  %v2470_v55 = vld [vmem:[#allocation2 + $0x90] sm:$0xff] }
 0x45b   :  { %1200 = vmatpush1.bf16.msra.mxu1 %v2039_v63  ;;  %1190 = vmatprep.mubr.bf16.mxu0 %v1816_v57  ;;  %v2354_v63 = vld [vmem:[#allocation2 + $0x8] sm:$0xff] }
 0x45c   :  { %1201 = vmatprep.subr.bf16.mxu1 %v2041_v0  ;;  %1231 = vmatprep.mubr.bf16.mxu1 %v1816_v57  ;;  %v2357_v0 = vld [vmem:[#allocation2] sm:$0xff] }
 0x45d   :  { %1158 = vmatprep.subr.bf16.mxu0 %v2354_v63 }
 0x45e   :  { %1159 = vmatpush1.bf16.msra.mxu0 %v2357_v0 }
 0x45f   :  { %1202 = vmatpush1.bf16.msra.mxu1 %v2047_v2  ;;  %v2360_v2 = vld [vmem:[#allocation2 + $0x28] sm:$0xff] }
 0x460   :  { %1203 = vmatprep.subr.bf16.mxu1 %v2050_v3  ;;  %1160 = vmatprep.subr.bf16.mxu0 %v2360_v2  ;;  %v2363_v3 = vld [vmem:[#allocation2 + $0x20] sm:$0xff] }
 0x462   :  { %1161 = vmatpush1.bf16.msra.mxu0 %v2363_v3 }
 0x463   :  { %1204 = vmatpush1.bf16.msra.mxu1 %v2059_v6  ;;  %v2366_v6 = vld [vmem:[#allocation2 + $0x48] sm:$0xff] }
 0x464   :  { %1205 = vmatprep.subr.bf16.mxu1 %v2062_v7  ;;  %1162 = vmatprep.subr.bf16.mxu0 %v2366_v6  ;;  %v2369_v7 = vld [vmem:[#allocation2 + $0x40] sm:$0xff] }
 0x466   :  { %1163 = vmatpush1.bf16.msra.mxu0 %v2369_v7 }
 0x467   :  { %1206 = vmatpush1.bf16.msra.mxu1 %v2071_v10  ;;  %v2372_v10 = vld [vmem:[#allocation2 + $0x68] sm:$0xff] }
 0x468   :  { %1207 = vmatprep.subr.bf16.mxu1 %v2074_v11  ;;  %1164 = vmatprep.subr.bf16.mxu0 %v2372_v10  ;;  %v2375_v11 = vld [vmem:[#allocation2 + $0x60] sm:$0xff] }
 0x46a   :  { %1165 = vmatpush1.bf16.msra.mxu0 %v2375_v11 }
 0x46b   :  { %1208 = vmatpush1.bf16.msra.mxu1 %v2083_v14  ;;  %v2378_v14 = vld [vmem:[#allocation2 + $0x88] sm:$0xff] }
 0x46c   :  { %1209 = vmatprep.subr.bf16.mxu1 %v2086_v15  ;;  %1166 = vmatprep.subr.bf16.mxu0 %v2378_v14  ;;  %v2381_v15 = vld [vmem:[#allocation2 + $0x80] sm:$0xff] }
 0x46e   :  { %1167 = vmatpush1.bf16.msra.mxu0 %v2381_v15 }
 0x46f   :  { %1210 = vmatpush1.bf16.msra.mxu1 %v2095_v18  ;;  %v2383_v18 = vld [vmem:[#allocation2 + $0xa8] sm:$0xff] }
 0x470   :  { %1211 = vmatprep.subr.bf16.mxu1 %v2098_v19  ;;  %1168 = vmatprep.subr.bf16.mxu0 %v2383_v18  ;;  %v2387_v19 = vld [vmem:[#allocation2 + $0xa0] sm:$0xff] }
 0x472   :  { %1169 = vmatpush1.bf16.msra.mxu0 %v2387_v19 }
 0x473   :  { %1212 = vmatpush1.bf16.msra.mxu1 %v2107_v22  ;;  %v2389_v22 = vld [vmem:[#allocation2 + $0xf8] sm:$0xff]  ;;  %1170 = vmatprep.subr.bf16.mxu0 %v2393_v23 }
 0x474   :  { %1213 = vmatprep.subr.bf16.mxu1 %v2389_v22 }
 0x476   :  { %1171 = vmatpush1.bf16.msra.mxu0 %v2399_v26 }
 0x477   :  { %1214 = vmatpush1.bf16.msra.mxu1 %v2391_v56  ;;  %1172 = vmatprep.subr.bf16.mxu0 %v2401_v29 }
 0x478   :  { %1356 = vmatprep.subr.bf16.mxu1 %v1286_v47 }
 0x47a   :  { %1173 = vmatpush1.bf16.msra.mxu0 %v2405_v30 }
 0x47b   :  { %1315 = vmatprep.subr.bf16.mxu0 %v2354_v63 }
 0x52d   :  { %v1035_v34 = vpop.f32.mrb[16].mxu0  ;;  %v1076_v35 = vpop.f32.mrb[16].mxu1 }
 0x52e   :  { %v1083_v36 = vadd.f32 %v1652_v31, %v1035_v34  ;;  %v1037_v37 = vpop.f32.mrb[17].mxu0  ;;  %v1078_v28 = vpop.f32.mrb[17].mxu1  ;;  %v1085_v12 = vadd.f32 %v1654_v8, %v1076_v35  ;;  %v2476_v31 = vld [vmem:[#allocation2 + $0xb0] sm:$0xff]  ;;  %v1660_v35 = vld [vmem:[%s2575_s0 + $0xa0] sm:$0xff] }
 0x52f   :  { %v1084_v38 = vadd.f32 %v1653_v32, %v1037_v37  ;;  %v1039_v39 = vpop.f32.mrb[18].mxu0  ;;  %v1080_v40 = vpop.f32.mrb[18].mxu1  ;;  %v1086_v5 = vadd.f32 %v1655_v4, %v1078_v28  ;;  %v2478_v32 = vld [vmem:[#allocation2 + $0xd8] sm:$0xff]  ;;  %v2482_v34 = vld [vmem:[#allocation2 + $0xd0] sm:$0xff] }
 0x530   :  { %v1656_v59 = vmul.f32 -1.442695, %v1083_v36  ;;  %v1040_v60 = vpop.f32.mrb[19].mxu0  ;;  %v1081_v62 = vpop.f32.mrb[19].mxu1  ;;  %v1661_v36 = vld [vmem:[%s2575_s0 + $0xa8] sm:$0xff] }
 0x531   :  { %v1657_v1 = vmul.f32 -1.442695, %v1084_v38  ;;  %v1658_v9 = vmul.f32 -1.442695, %v1086_v5 }
 0x532   :  { %1750 = vpow2.f32 %v1656_v59 }
 0x533   :  { %1752 = vpow2.f32 %v1657_v1 }
 0x534   :  { %1754 = vpow2.f32 %v1658_v9  ;;  %v1663_v9 = vld [vmem:[%s2575_s0 + $0xb8] sm:$0xff] }
 0x535   :  { %1756 = vtanh.f32 %v1085_v12 }
 0x53c   :  { %v1751_v13 = vpop.eup %1750 }
 0x53d   :  { %v1753_v16 = vpop.eup %1752  ;;  %v1090_v17 = vadd.f32 1.0, %v1751_v13  ;;  %v1662_v13 = vld [vmem:[%s2575_s0 + $0xb0] sm:$0xff] }
 0x53e   :  { %v1096_v20 = vadd.f32 1.0, %v1753_v16  ;;  %v1755_v61 = vpop.eup %1754 }
 0x53f   :  { %1758 = vrcp.f32 %v1090_v17  ;;  %v1757_v21 = vpop.eup %1756  ;;  %v1103_v33 = vadd.f32 1.0, %v1755_v61 }
 0x540   :  { %1760 = vrcp.f32 %v1096_v20 }
 0x541   :  { %1762 = vrcp.f32 %v1103_v33 }
 0x549   :  { %v1759_v24 = vpop.eup %1758 }
 0x54a   :  { %v1761_v25 = vpop.eup %1760  ;;  %v1107_v27 = vmul.f32 %v1759_v24, %v1757_v21 }
 0x54b   :  { %v1106_v41 = vmul.f32 %v1761_v25, %v2333_v51  ;;  %v1763_v43 = vpop.eup %1762  ;;  %v2458_v51 = vld [vmem:[#allocation2 + $0x50] sm:$0xff] }
 0x54d   :  { %v2422_v42 = vadd.f32 %v1107_v27, %v1106_v41 }
 0x54f   :  { %1764 = vtanh.f32 %v2422_v42 }
 0x559   :  { %v1765_v44 = vpop.eup %1764 }
 0x55a   :  { %v1110_v45 = vmul.f32 %v1765_v44, %v1763_v43 }
 0x55c   :  { %1659 = vst [vmem:[%s2579_s4 + $0x20] sm:$0xff] %v1110_v45  ;;  %v1125_v46 = vpack.c.bf16 %v1110_v45, %v1110_v45 }
 0x55e   :  { %1191 = vmatmul.mubr.bf16.vlgmr.msra.gmra.mrb[20].mxu0 %v1125_v46  ;;  %1232 = vmatmul.mubr.bf16.vlgmr.msra.gmra.mrb[20].mxu1 %v1125_v46 }
 0x55f   :  { %1316 = vmatpush1.bf16.msra.mxu0 %v2357_v0  ;;  %1347 = vmatprep.mubr.bf16.mxu0 %v1816_v57 }
 0x560   :  { %1317 = vmatprep.subr.bf16.mxu0 %v2360_v2  ;;  %1388 = vmatprep.mubr.bf16.mxu1 %v1816_v57 }
 0x561   :  { %1357 = vmatpush1.bf16.msra.mxu1 %v2446_v58 }
 0x562   :  { %1358 = vmatprep.subr.bf16.mxu1 %v2449_v48 }
 0x563   :  { %1318 = vmatpush1.bf16.msra.mxu0 %v2363_v3 }
 0x564   :  { %1319 = vmatprep.subr.bf16.mxu0 %v2366_v6 }
 0x565   :  { %1359 = vmatpush1.bf16.msra.mxu1 %v2452_v49 }
 0x566   :  { %1360 = vmatprep.subr.bf16.mxu1 %v2455_v50 }
 0x567   :  { %1320 = vmatpush1.bf16.msra.mxu0 %v2369_v7 }
 0x568   :  { %1321 = vmatprep.subr.bf16.mxu0 %v2372_v10 }
 0x569   :  { %1361 = vmatpush1.bf16.msra.mxu1 %v2458_v51 }
 0x56a   :  { %1362 = vmatprep.subr.bf16.mxu1 %v2461_v52 }
 0x56b   :  { %1322 = vmatpush1.bf16.msra.mxu0 %v2375_v11 }
 0x56c   :  { %1323 = vmatprep.subr.bf16.mxu0 %v2378_v14 }
 0x56d   :  { %1363 = vmatpush1.bf16.msra.mxu1 %v2464_v53 }
 0x56e   :  { %1364 = vmatprep.subr.bf16.mxu1 %v2467_v54 }
 0x56f   :  { %1324 = vmatpush1.bf16.msra.mxu0 %v2381_v15 }
 0x570   :  { %1325 = vmatprep.subr.bf16.mxu0 %v2383_v18 }
 0x571   :  { %1365 = vmatpush1.bf16.msra.mxu1 %v2470_v55 }
 0x573   :  { %1326 = vmatpush1.bf16.msra.mxu0 %v2387_v19 }
 0x574   :  { %1327 = vmatprep.subr.bf16.mxu0 %v2393_v23 }
 0x577   :  { %1328 = vmatpush1.bf16.msra.mxu0 %v2399_v26 }
 0x578   :  { %1329 = vmatprep.subr.bf16.mxu0 %v2401_v29 }
 0x57b   :  { %1330 = vmatpush1.bf16.msra.mxu0 %v2405_v30 }
 0x57c   :  { %1472 = vmatprep.subr.bf16.mxu0 %v2354_v63  ;;  %v2472_v63 = vld [vmem:[#allocation2 + $0xb8] sm:$0xff] }
 0x57d   :  { %1366 = vmatprep.subr.bf16.mxu1 %v2472_v63 }
 0x57e   :  { %1367 = vmatpush1.bf16.msra.mxu1 %v2476_v31 }
 0x57f   :  { %1368 = vmatprep.subr.bf16.mxu1 %v2478_v32 }
 0x582   :  { %1369 = vmatpush1.bf16.msra.mxu1 %v2482_v34 }
 0x583   :  { %1370 = vmatprep.subr.bf16.mxu1 %v2389_v22 }
 0x586   :  { %1371 = vmatpush1.bf16.msra.mxu1 %v2391_v56 }
 0x587   :  { %1513 = vmatprep.subr.bf16.mxu1 %v1286_v47 }
 0x631   :  { %v1192_v37 = vpop.f32.mrb[20].mxu0  ;;  %v1233_v28 = vpop.f32.mrb[20].mxu1 }
 0x632   :  { %v1240_v38 = vadd.f32 %v1660_v35, %v1192_v37  ;;  %v1194_v39 = vpop.f32.mrb[21].mxu0  ;;  %v1235_v40 = vpop.f32.mrb[21].mxu1  ;;  %v1242_v17 = vadd.f32 %v1662_v13, %v1233_v28 }
 0x633   :  { %v1241_v59 = vadd.f32 %v1661_v36, %v1194_v39  ;;  %v1196_v60 = vpop.f32.mrb[22].mxu0  ;;  %v1237_v62 = vpop.f32.mrb[22].mxu1  ;;  %v1243_v12 = vadd.f32 %v1663_v9, %v1235_v40  ;;  %v1676_v40 = vld [vmem:[%s2575_s0 + $0xe0] sm:$0xff] }
 0x634   :  { %v1664_v1 = vmul.f32 -1.442695, %v1240_v38  ;;  %v1197_v4 = vpop.f32.mrb[23].mxu0  ;;  %v1238_v5 = vpop.f32.mrb[23].mxu1 }
 0x635   :  { %v1665_v8 = vmul.f32 -1.442695, %v1241_v59  ;;  %v1666_v16 = vmul.f32 -1.442695, %v1243_v12  ;;  %v1677_v59 = vld [vmem:[%s2575_s0 + $0xe8] sm:$0xff] }
 0x636   :  { %1766 = vpow2.f32 %v1664_v1 }
 0x637   :  { %1768 = vpow2.f32 %v1665_v8 }
 0x638   :  { %1770 = vpow2.f32 %v1666_v16 }
 0x639   :  { %1772 = vtanh.f32 %v1242_v17 }
 0x640   :  { %v1767_v20 = vpop.eup %1766 }
 0x641   :  { %v1769_v61 = vpop.eup %1768  ;;  %v1247_v21 = vadd.f32 1.0, %v1767_v20 }
 0x642   :  { %v1253_v24 = vadd.f32 1.0, %v1769_v61  ;;  %v1771_v25 = vpop.eup %1770  ;;  %v1679_v61 = vld [vmem:[%s2575_s0 + $0xf8] sm:$0xff] }
 0x643   :  { %1774 = vrcp.f32 %v1247_v21  ;;  %v1773_v27 = vpop.eup %1772  ;;  %v1260_v44 = vadd.f32 1.0, %v1771_v25 }
 0x644   :  { %1776 = vrcp.f32 %v1253_v24  ;;  %v1678_v24 = vld [vmem:[%s2575_s0 + $0xf0] sm:$0xff] }
 0x645   :  { %1778 = vrcp.f32 %v1260_v44 }
 0x64d   :  { %v1775_v33 = vpop.eup %1774 }
 0x64e   :  { %v1777_v41 = vpop.eup %1776  ;;  %v1264_v43 = vmul.f32 %v1775_v33, %v1773_v27 }
 0x64f   :  { %v1263_v45 = vmul.f32 %v1777_v41, %v2422_v42  ;;  %v1779_v47 = vpop.eup %1778 }
 0x651   :  { %v2500_v46 = vadd.f32 %v1264_v43, %v1263_v45 }
 0x653   :  { %1780 = vtanh.f32 %v2500_v46 }
 0x65d   :  { %v1781_v35 = vpop.eup %1780 }
 0x65e   :  { %v1267_v36 = vmul.f32 %v1781_v35, %v1779_v47 }
 0x660   :  { %1667 = vst [vmem:[%s2579_s4 + $0x28] sm:$0xff] %v1267_v36  ;;  %v1282_v37 = vpack.c.bf16 %v1267_v36, %v1267_v36 }
 0x662   :  { %1348 = vmatmul.mubr.bf16.vlgmr.msra.gmra.mrb[24].mxu0 %v1282_v37  ;;  %1389 = vmatmul.mubr.bf16.vlgmr.msra.gmra.mrb[24].mxu1 %v1282_v37 }
 0x663   :  { %1473 = vmatpush1.bf16.msra.mxu0 %v2357_v0  ;;  %1514 = vmatpush1.bf16.msra.mxu1 %v2446_v58  ;;  %v1669_v0 = vld [vmem:[%s2575_s0 + $0xc8] sm:$0xff] }
 0x664   :  { %1474 = vmatprep.subr.bf16.mxu0 %v2360_v2  ;;  %1515 = vmatprep.subr.bf16.mxu1 %v2449_v48 }
 0x665   :  { %1504 = vmatprep.mubr.bf16.mxu0 %v1816_v57  ;;  %1545 = vmatprep.mubr.bf16.mxu1 %v1816_v57  ;;  %v1668_v57 = vld [vmem:[%s2575_s0 + $0xc0] sm:$0xff] }
 0x667   :  { %1475 = vmatpush1.bf16.msra.mxu0 %v2363_v3  ;;  %1516 = vmatpush1.bf16.msra.mxu1 %v2452_v49 }
 0x668   :  { %1476 = vmatprep.subr.bf16.mxu0 %v2366_v6  ;;  %1517 = vmatprep.subr.bf16.mxu1 %v2455_v50 }
 0x66b   :  { %1477 = vmatpush1.bf16.msra.mxu0 %v2369_v7  ;;  %1518 = vmatpush1.bf16.msra.mxu1 %v2458_v51 }
 0x66c   :  { %1478 = vmatprep.subr.bf16.mxu0 %v2372_v10  ;;  %1519 = vmatprep.subr.bf16.mxu1 %v2461_v52 }
 0x66f   :  { %1479 = vmatpush1.bf16.msra.mxu0 %v2375_v11  ;;  %1520 = vmatpush1.bf16.msra.mxu1 %v2464_v53 }
 0x670   :  { %1480 = vmatprep.subr.bf16.mxu0 %v2378_v14  ;;  %1521 = vmatprep.subr.bf16.mxu1 %v2467_v54 }
 0x673   :  { %1481 = vmatpush1.bf16.msra.mxu0 %v2381_v15  ;;  %1522 = vmatpush1.bf16.msra.mxu1 %v2470_v55 }
 0x674   :  { %1482 = vmatprep.subr.bf16.mxu0 %v2383_v18  ;;  %1523 = vmatprep.subr.bf16.mxu1 %v2472_v63 }
 0x677   :  { %1483 = vmatpush1.bf16.msra.mxu0 %v2387_v19  ;;  %1524 = vmatpush1.bf16.msra.mxu1 %v2476_v31 }
 0x678   :  { %1484 = vmatprep.subr.bf16.mxu0 %v2393_v23  ;;  %1525 = vmatprep.subr.bf16.mxu1 %v2478_v32  ;;  %v1671_v23 = vld [vmem:[%s2575_s0 + $0xd8] sm:$0xff] }
 0x67b   :  { %1485 = vmatpush1.bf16.msra.mxu0 %v2399_v26  ;;  %1526 = vmatpush1.bf16.msra.mxu1 %v2482_v34 }
 0x67c   :  { %1486 = vmatprep.subr.bf16.mxu0 %v2401_v29  ;;  %1527 = vmatprep.subr.bf16.mxu1 %v2389_v22  ;;  %v1670_v29 = vld [vmem:[%s2575_s0 + $0xd0] sm:$0xff] }
 0x67f   :  { %1487 = vmatpush1.bf16.msra.mxu0 %v2405_v30  ;;  %1528 = vmatpush1.bf16.msra.mxu1 %v2391_v56 }
 0x735   :  { %v1349_v2 = vpop.f32.mrb[24].mxu0  ;;  %v1390_v3 = vpop.f32.mrb[24].mxu1 }
 0x736   :  { %v1397_v6 = vadd.f32 %v1668_v57, %v1349_v2  ;;  %v1351_v7 = vpop.f32.mrb[25].mxu0  ;;  %v1392_v10 = vpop.f32.mrb[25].mxu1  ;;  %v1399_v42 = vadd.f32 %v1670_v29, %v1390_v3 }
 0x737   :  { %v1398_v11 = vadd.f32 %v1669_v0, %v1351_v7  ;;  %v1353_v14 = vpop.f32.mrb[26].mxu0  ;;  %v1394_v15 = vpop.f32.mrb[26].mxu1  ;;  %v1400_v26 = vadd.f32 %v1671_v23, %v1392_v10 }
 0x738   :  { %v1672_v18 = vmul.f32 -1.442695, %v1397_v6  ;;  %v1354_v19 = vpop.f32.mrb[27].mxu0  ;;  %v1395_v22 = vpop.f32.mrb[27].mxu1 }
 0x739   :  { %v1673_v56 = vmul.f32 -1.442695, %v1398_v11  ;;  %v1674_v30 = vmul.f32 -1.442695, %v1400_v26 }
 0x73a   :  { %1782 = vpow2.f32 %v1672_v18 }
 0x73b   :  { %1784 = vpow2.f32 %v1673_v56 }
 0x73c   :  { %1786 = vpow2.f32 %v1674_v30 }
 0x73d   :  { %1788 = vtanh.f32 %v1399_v42 }
 0x744   :  { %v1783_v58 = vpop.eup %1782 }
 0x745   :  { %v1785_v48 = vpop.eup %1784  ;;  %v1404_v49 = vadd.f32 1.0, %v1783_v58 }
 0x746   :  { %v1410_v50 = vadd.f32 1.0, %v1785_v48  ;;  %v1787_v51 = vpop.eup %1786 }
 0x747   :  { %1790 = vrcp.f32 %v1404_v49  ;;  %v1789_v52 = vpop.eup %1788  ;;  %v1417_v63 = vadd.f32 1.0, %v1787_v51 }
 0x748   :  { %1792 = vrcp.f32 %v1410_v50 }
 0x749   :  { %1794 = vrcp.f32 %v1417_v63 }
 0x751   :  { %v1791_v53 = vpop.eup %1790 }
 0x752   :  { %v1793_v54 = vpop.eup %1792  ;;  %v1421_v55 = vmul.f32 %v1791_v53, %v1789_v52 }
 0x753   :  { %v1420_v31 = vmul.f32 %v1793_v54, %v2500_v46  ;;  %v1795_v34 = vpop.eup %1794 }
 0x755   :  { %v1422_v32 = vadd.f32 %v1421_v55, %v1420_v31 }
 0x757   :  { %1796 = vtanh.f32 %v1422_v32 }
 0x761   :  { %v1797_v28 = vpop.eup %1796 }
 0x762   :  { %v1424_v38 = vmul.f32 %v1797_v28, %v1795_v34 }
 0x764   :  { %1675 = vst [vmem:[%s2579_s4 + $0x30] sm:$0xff] %v1424_v38  ;;  %v1439_v39 = vpack.c.bf16 %v1424_v38, %v1424_v38 }
 0x766   :  { %1505 = vmatmul.mubr.bf16.vlgmr.msra.gmra.mrb[28].mxu0 %v1439_v39  ;;  %1546 = vmatmul.mubr.bf16.vlgmr.msra.gmra.mrb[28].mxu1 %v1439_v39 }
 0x839   :  { %v1506_v60 = vpop.f32.mrb[28].mxu0  ;;  %v1547_v62 = vpop.f32.mrb[28].mxu1 }
 0x83a   :  { %v1554_v1 = vadd.f32 %v1676_v40, %v1506_v60  ;;  %v1508_v4 = vpop.f32.mrb[29].mxu0  ;;  %v1549_v5 = vpop.f32.mrb[29].mxu1  ;;  %v1556_v27 = vadd.f32 %v1678_v24, %v1547_v62 }
 0x83b   :  { %v1555_v8 = vadd.f32 %v1677_v59, %v1508_v4  ;;  %v1510_v9 = vpop.f32.mrb[30].mxu0  ;;  %v1551_v12 = vpop.f32.mrb[30].mxu1  ;;  %v1557_v21 = vadd.f32 %v1679_v61, %v1549_v5 }
 0x83c   :  { %v1680_v13 = vmul.f32 -1.442695, %v1554_v1  ;;  %v1511_v16 = vpop.f32.mrb[31].mxu0  ;;  %v1552_v17 = vpop.f32.mrb[31].mxu1 }
 0x83d   :  { %v1681_v20 = vmul.f32 -1.442695, %v1555_v8  ;;  %v1682_v25 = vmul.f32 -1.442695, %v1557_v21 }
 0x83e   :  { %1798 = vpow2.f32 %v1680_v13 }
 0x83f   :  { %1800 = vpow2.f32 %v1681_v20 }
 0x840   :  { %1802 = vpow2.f32 %v1682_v25 }
 0x841   :  { %1804 = vtanh.f32 %v1556_v27 }
 0x848   :  { %v1799_v33 = vpop.eup %1798 }
 0x849   :  { %v1801_v41 = vpop.eup %1800  ;;  %v1561_v43 = vadd.f32 1.0, %v1799_v33 }
 0x84a   :  { %v1567_v44 = vadd.f32 1.0, %v1801_v41  ;;  %v1803_v45 = vpop.eup %1802 }
 0x84b   :  { %1806 = vrcp.f32 %v1561_v43  ;;  %v1805_v46 = vpop.eup %1804  ;;  %v1574_v37 = vadd.f32 1.0, %v1803_v45 }
 0x84c   :  { %1808 = vrcp.f32 %v1567_v44 }
 0x84d   :  { %1810 = vrcp.f32 %v1574_v37 }
 0x855   :  { %v1807_v47 = vpop.eup %1806 }
 0x856   :  { %v1809_v35 = vpop.eup %1808  ;;  %v1578_v36 = vmul.f32 %v1807_v47, %v1805_v46 }
 0x857   :  { %v1577_v57 = vmul.f32 %v1809_v35, %v1422_v32  ;;  %v1811_v2 = vpop.eup %1810 }
 0x859   :  { %v1579_v0 = vadd.f32 %v1578_v36, %v1577_v57 }
 0x85b   :  { %1812 = vtanh.f32 %v1579_v0  ;;  %1590 = vst [vmem:[%s2581_s6] sm:$0xff] %v1579_v0 }
 0x865   :  { %v1813_v3 = vpop.eup %1812 }
 0x866   :  { %v1581_v6 = vmul.f32 %v1813_v3, %v1811_v2 }
 0x868   :  { %1683 = vst [vmem:[%s2579_s4 + $0x38] sm:$0xff] %v1581_v6  ;;  %1589 = vst [vmem:[%s2580_s5] sm:$0xff] %v1581_v6 }
 0x869   :  { %1605 = vsyncmov [#allocation5] }
 0x86c   :  { %s1606_s19 = vpop.sfrf %1605 }
 0x86d   :  { %p1684_p0 = scmp.ne.s32.totalorder %s1606_s19, 0 }
 0x86f   :  { %1610 = shalt.err (%p1684_p0)  }

</bundles_post_ra>
